<compile_context>
chip_gen: v7x
topology: tpu7x:2x2x1
jax: 0.10.0
libtpu: 0.0.40
codegen_flags: <defaults>
</compile_context>

<pallas_src>
import jax
import jax.numpy as jnp
from jax.experimental import pallas as pl
from jax.experimental.pallas import tpu as pltpu

EPS = 1e-5          # InstanceNorm3d default eps
NEG_SLOPE = 0.2     # LeakyReLU negative slope


def _round_up(x, m):
    return (x + m - 1) // m * m


def double_conv(x, params, compute_dtype=jnp.bfloat16):
    # NOTE: the PyTorch module ignores its `batch_norm` ctor arg; forward is
    # always conv -> InstanceNorm3d(affine=False) -> LeakyReLU(0.2), twice.
    N, C_in, D, H, W = x.shape
    w1 = params["w1"]
    w2 = params["w2"]
    C_out = w1.shape[0]

    Dp, Hp, Wp = D + 2, H + 2, W + 2          # 1-voxel zero halo
    Sp = Dp * Hp * Wp                         # flattened padded volume
    SW = _round_up(Sp, 128)                   # lane-dense compute/output width
    halo = Hp * Wp + Wp + 1                   # max |tap offset| in flat coords
    M = _round_up(halo, 128)                  # 128-aligned margin
    Sp_ext = SW + 2 * M                       # extended slab width
    S = D * H * W                             # real voxels per channel
    inv_S = 1.0 / float(S)
    K1 = 27 * C_in                            # stage-1 contraction depth
    K2 = 27 * C_out                           # stage-2 contraction depth

    # ---- host-side prep: halo pad + flat margin pad, single pad chain ------
    # TODO(synk): pass unpadded x via memory_space=pl.ANY and DMA rows into a
    # pre-zeroed VMEM slab in-kernel to drop this host pre-pass entirely.
    xp = jnp.pad(x.astype(compute_dtype), ((0, 0), (0, 0), (1, 1), (1, 1), (1, 1)))
    xp = xp.reshape(N, C_in, Sp)
    x_ext = jnp.pad(xp, ((0, 0), (0, 0), (M, M + SW - Sp)))

    # dense K-major weights: column index = t*C + c, tap t = kd*9 + kh*3 + kw
    w1f = jnp.transpose(w1, (0, 2, 3, 4, 1)).reshape(C_out, K1).astype(compute_dtype)
    w2f = jnp.transpose(w2, (0, 2, 3, 4, 1)).reshape(C_out, K2).astype(compute_dtype)

    # interior-voxel mask in the flattened padded layout, (1, SW) f32
    q = jnp.arange(SW, dtype=jnp.int32)
    dq = q // (Hp * Wp)
    rq = q % (Hp * Wp)
    hq = rq // Wp
    wq = rq % Wp
    interior = ((q < Sp) & (dq >= 1) & (dq <= D) & (hq >= 1) & (hq <= H)
                & (wq >= 1) & (wq <= W))
    mask = interior.astype(jnp.float32).reshape(1, SW)

    # flattened offset of tap (kd, kh, kw) relative to the output voxel
    offsets = [(kd - 1) * Hp * Wp + (kh - 1) * Wp + (kw - 1)
               for kd in range(3) for kh in range(3) for kw in range(3)]

    def kernel(x_ref, w1_ref, w2_ref, m_ref, o_ref, act_ref, im1_ref, im2_ref):
        # Zero ONLY the two M-wide margins of the activation scratch (4 KiB,
        # vs the whole slab before).  Done every step so correctness does not
        # depend on program_id==0 having run on this core's private scratch.
        act_ref[:, pl.ds(0, M)] = jnp.zeros((C_out, M), act_ref.dtype)
        act_ref[:, pl.ds(M + SW, M)] = jnp.zeros((C_out, M), act_ref.dtype)

        maskb = jnp.broadcast_to(m_ref[...], (C_out, SW))   # hoisted once

        def build_im2col(slab_ref, im_ref, c):
            # 27 static lane-shifted copies of the halo'd slab -> (27*c, SW)
            for t, off in enumerate(offsets):                 # static, unrolled
                im_ref[pl.ds(t * c, c), :] = slab_ref[:, pl.ds(M + off, SW)]

        def inorm_lrelu(y):
            # InstanceNorm3d(affine=False) over the S interior voxels (f32
            # stats), then LeakyReLU(0.2).  Non-interior columns -> exactly 0,
            # which stage 2 relies on as its zero padding.
            ym = y * maskb
            mean = jnp.sum(ym, axis=-1, keepdims=True) * inv_S
            d = (y - mean) * maskb
            var = jnp.sum(d * d, axis=-1, keepdims=True) * inv_S
            yn = d * jax.lax.rsqrt(var + EPS)
            return jnp.where(yn >= 0, yn, NEG_SLOPE * yn)

        # ---- stage 1 (bias dropped: cancels exactly inside InstanceNorm) ---
        build_im2col(x_ref, im1_ref, C_in)
        y1 = jnp.dot(w1_ref[...], im1_ref[...], preferred_element_type=jnp.float32)
        a1 = inorm_lrelu(y1)                                  # (C_out, SW) f32
        act_ref[:, pl.ds(M, SW)] = a1.astype(act_ref.dtype)   # VMEM-resident

        # ---- stage 2 --------------------------------------------------------
        build_im2col(act_ref, im2_ref, C_out)
        y2 = jnp.dot(w2_ref[...], im2_ref[...], preferred_element_type=jnp.float32)
        o_ref[...] = inorm_lrelu(y2).astype(o_ref.dtype)

    itemsize = jnp.dtype(compute_dtype).itemsize
    flops = 2 * N * SW * C_out * (K1 + K2)
    bytes_accessed = (N * C_in * Sp_ext * itemsize
                      + (w1f.size + w2f.size) * itemsize
                      + mask.size * 4
                      + N * C_out * SW * itemsize)

    # VMEM budget: double-buffered input/output blocks + weights + scratch.
    vmem_needed = (2 * C_in * Sp_ext * itemsize
                   + 2 * C_out * SW * itemsize
                   + (w1f.size + w2f.size) * itemsize + mask.size * 4
                   + (C_out * Sp_ext + K1 * SW + K2 * SW) * itemsize)
    try:
        vmem_cap = int(pltpu.get_tpu_info().vmem_capacity_bytes)
    except Exception:
        vmem_cap = 64 * 1024 * 1024            # conservative (v7x per-TC)
    vmem_limit = int(min(vmem_cap * 3 // 4,
                         max(32 * 1024 * 1024, 2 * vmem_needed)))

    # TODO(synk): for N==1 on v7x, add a parallel spatial/channel grid axis
    # (or pltpu.CORE_PARALLEL) so both TensorCores get work.
    out = pl.pallas_call(
        kernel,
        out_shape=jax.ShapeDtypeStruct((N, C_out, SW), compute_dtype),
        grid_spec=pltpu.PrefetchScalarGridSpec(
            num_scalar_prefetch=0,
            grid=(N,),
            in_specs=[
                pl.BlockSpec((None, C_in, Sp_ext), lambda n: (n, 0, 0)),
                pl.BlockSpec((C_out, K1), lambda n: (0, 0)),
                pl.BlockSpec((C_out, K2), lambda n: (0, 0)),
                pl.BlockSpec((1, SW), lambda n: (0, 0)),
            ],
            out_specs=pl.BlockSpec((None, C_out, SW), lambda n: (n, 0, 0)),
            scratch_shapes=[
                pltpu.VMEM((C_out, Sp_ext), compute_dtype),   # stage-1 act slab
                pltpu.VMEM((K1, SW), compute_dtype),          # im2col stage 1
                pltpu.VMEM((K2, SW), compute_dtype),          # im2col stage 2
            ],
        ),
        compiler_params=pltpu.CompilerParams(
            dimension_semantics=("parallel",),
            vmem_limit_bytes=vmem_limit,
        ),
        cost_estimate=pl.CostEstimate(
            flops=flops,
            transcendentals=2 * N * C_out,
            bytes_accessed=bytes_accessed),
    )(x_ext, w1f, w2f, mask)

    # drop alignment columns + halo ring, back to (N, C_out, D, H, W) (bf16)
    out = out[:, :, :Sp].reshape(N, C_out, Dp, Hp, Wp)
    return out[:, :, 1:Dp - 1, 1:Hp - 1, 1:Wp - 1]


def init_params(key, c_in, c_out):
    # PyTorch default Conv3d init: U(-1/sqrt(fan_in), 1/sqrt(fan_in))
    k1, k2, k3, k4 = jax.random.split(key, 4)
    fan1 = c_in * 27
    b1lim = 1.0 / float(fan1) ** 0.5
    w1 = jax.random.uniform(k1, (c_out, c_in, 3, 3, 3), jnp.float32, -b1lim, b1lim)
    b1 = jax.random.uniform(k2, (c_out,), jnp.float32, -b1lim, b1lim)
    fan2 = c_out * 27
    b2lim = 1.0 / float(fan2) ** 0.5
    w2 = jax.random.uniform(k3, (c_out, c_out, 3, 3, 3), jnp.float32, -b2lim, b2lim)
    b2 = jax.random.uniform(k4, (c_out,), jnp.float32, -b2lim, b2lim)
    return dict(w1=w1, b1=b1, w2=w2, b2=b2)


def _ref_stage(x, w, b, quant_dtype=None):
    if quant_dtype is not None:
        # emulate the kernel's bf16 MXU operands (accumulation stays f32)
        x = x.astype(quant_dtype).astype(jnp.float32)
        w = w.astype(quant_dtype).astype(jnp.float32)
    y = jax.lax.conv_general_dilated(
        x, w, window_strides=(1, 1, 1),
        padding=[(1, 1), (1, 1), (1, 1)],
        dimension_numbers=("NCDHW", "OIDHW", "NCDHW"),
        precision=jax.lax.Precision.HIGHEST)
    y = y + b[None, :, None, None, None]           # cancels in InstanceNorm
    mean = y.mean(axis=(2, 3, 4), keepdims=True)
    var = ((y - mean) ** 2).mean(axis=(2, 3, 4), keepdims=True)
    yn = (y - mean) * jax.lax.rsqrt(var + EPS)
    return jnp.where(yn >= 0, yn, NEG_SLOPE * yn)


def _ref_double_conv(x, params, quant_dtype=None):
    y = _ref_stage(x, params["w1"], params["b1"], quant_dtype)
    return _ref_stage(y, params["w2"], params["b2"], quant_dtype)


if __name__ == "__main__":
    key = jax.random.PRNGKey(0)
    kx, kp = jax.random.split(key)

    N, C_IN, C_OUT = 2, 4, 8
    D = H = W = 8
    x = jax.random.normal(kx, (N, C_IN, D, H, W), jnp.float32)
    params = init_params(kp, C_IN, C_OUT)

    out = jax.block_until_ready(jax.jit(double_conv)(x, params))
    assert out.shape == (N, C_OUT, D, H, W)
    out_f = out.astype(jnp.float32)

    # Check vs a reference that quantizes the conv operands to bf16 the same
    # way the kernel does (stats / accumulation in f32 in both).  Output is
    # bf16, so allow the extra rounding.
    ref_q = jax.block_until_ready(_ref_double_conv(x, params, jnp.bfloat16))
    err_q = float(jnp.max(jnp.abs(out_f - ref_q)))
    assert jnp.allclose(out_f, ref_q, rtol=1e-2, atol=1e-2), err_q

    # Looser sanity check vs the pure-f32, PyTorch-faithful reference.
    ref_f = jax.block_until_ready(_ref_double_conv(x, params, None))
    err_f = float(jnp.max(jnp.abs(out_f - ref_f)))
    assert jnp.allclose(out_f, ref_f, rtol=5e-2, atol=5e-2), err_f

    print("KERNEL_OK")
</pallas_src>

<mosaic_0001>
module attributes {stable_mosaic.version = 11 : i64} {
  func.func @kernel(%arg0: i32, %arg1: memref<1x4x1280xbf16, #tpu.memory_space<vmem>>, %arg2: memref<8x108xbf16, #tpu.memory_space<vmem>>, %arg3: memref<8x216xbf16, #tpu.memory_space<vmem>>, %arg4: memref<1x1024xf32, #tpu.memory_space<vmem>>, %arg5: memref<1x8x1024xbf16, #tpu.memory_space<vmem>>, %arg6: memref<8x1280xbf16, #tpu.memory_space<vmem>>, %arg7: memref<108x1024xbf16, #tpu.memory_space<vmem>>, %arg8: memref<216x1024xbf16, #tpu.memory_space<vmem>>) attributes {dimension_semantics = [#tpu.dimension_semantics<parallel>], iteration_bounds = array<i64: 2>, scalar_prefetch = 0 : i64, scratch_operands = 3 : i64, tpu.core_type = #tpu.core_type<tc>, window_params = [{transform_indices = @transform_0, window_bounds = array<i64: 1, 4, 1280>}, {pipeline_mode = #tpu.pipeline_mode<synchronous>, transform_indices = @transform_1, window_bounds = array<i64: 8, 108>}, {pipeline_mode = #tpu.pipeline_mode<synchronous>, transform_indices = @transform_2, window_bounds = array<i64: 8, 216>}, {pipeline_mode = #tpu.pipeline_mode<synchronous>, transform_indices = @transform_3, window_bounds = array<i64: 1, 1024>}, {transform_indices = @transform_4, window_bounds = array<i64: 1, 8, 1024>}]} {
    %cst = arith.constant 0.000000e+00 : bf16
    %0 = vector.broadcast %cst : bf16 to vector<8x128xbf16>
    %c0 = arith.constant 0 : index
    %c0_0 = arith.constant 0 : index
    %1 = vector.load %arg6[%c0, %c0_0] : memref<8x1280xbf16, #tpu.memory_space<vmem>>, vector<8x128xbf16>
    tpu.vector_store %arg6[%c0, %c0_0], %0 {strides = array<i32>} : memref<8x1280xbf16, #tpu.memory_space<vmem>>, vector<8x128xbf16>,
    %cst_1 = arith.constant 0.000000e+00 : bf16
    %2 = vector.broadcast %cst_1 : bf16 to vector<8x128xbf16>
    %c0_2 = arith.constant 0 : index
    %c1152 = arith.constant 1152 : index
    %3 = vector.load %arg6[%c0_2, %c1152] : memref<8x1280xbf16, #tpu.memory_space<vmem>>, vector<8x128xbf16>
    tpu.vector_store %arg6[%c0_2, %c1152], %2 {strides = array<i32>} : memref<8x1280xbf16, #tpu.memory_space<vmem>>, vector<8x128xbf16>,
    %c0_3 = arith.constant 0 : index
    %c0_4 = arith.constant 0 : index
    %4 = vector.load %arg4[%c0_3, %c0_4] : memref<1x1024xf32, #tpu.memory_space<vmem>>, vector<1x1024xf32>
    %5 = vector.shape_cast %4 : vector<1x1024xf32> to vector<1x1024xf32>
    %6 = vector.broadcast %5 : vector<1x1024xf32> to vector<8x1024xf32>
    %c0_5 = arith.constant 0 : index
    %c0_6 = arith.constant 0 : index
    %c17 = arith.constant 17 : index
    %7 = vector.load %arg1[%c0_5, %c0_6, %c17] : memref<1x4x1280xbf16, #tpu.memory_space<vmem>>, vector<1x4x1024xbf16>
    %8 = vector.shape_cast %7 : vector<1x4x1024xbf16> to vector<4x1024xbf16>
    %c0_7 = arith.constant 0 : index
    %c0_8 = arith.constant 0 : index
    %9 = vector.load %arg7[%c0_7, %c0_8] : memref<108x1024xbf16, #tpu.memory_space<vmem>>, vector<4x1024xbf16>
    tpu.vector_store %arg7[%c0_7, %c0_8], %8 {strides = array<i32>} : memref<108x1024xbf16, #tpu.memory_space<vmem>>, vector<4x1024xbf16>,
    %c0_9 = arith.constant 0 : index
    %c0_10 = arith.constant 0 : index
    %c18 = arith.constant 18 : index
    %10 = vector.load %arg1[%c0_9, %c0_10, %c18] : memref<1x4x1280xbf16, #tpu.memory_space<vmem>>, vector<1x4x1024xbf16>
    %11 = vector.shape_cast %10 : vector<1x4x1024xbf16> to vector<4x1024xbf16>
    %c4 = arith.constant 4 : index
    %c0_11 = arith.constant 0 : index
    %12 = vector.load %arg7[%c4, %c0_11] : memref<108x1024xbf16, #tpu.memory_space<vmem>>, vector<4x1024xbf16>
    tpu.vector_store %arg7[%c4, %c0_11], %11 {strides = array<i32>} : memref<108x1024xbf16, #tpu.memory_space<vmem>>, vector<4x1024xbf16>,
    %c0_12 = arith.constant 0 : index
    %c0_13 = arith.constant 0 : index
    %c19 = arith.constant 19 : index
    %13 = vector.load %arg1[%c0_12, %c0_13, %c19] : memref<1x4x1280xbf16, #tpu.memory_space<vmem>>, vector<1x4x1024xbf16>
    %14 = vector.shape_cast %13 : vector<1x4x1024xbf16> to vector<4x1024xbf16>
    %c8 = arith.constant 8 : index
    %c0_14 = arith.constant 0 : index
    %15 = vector.load %arg7[%c8, %c0_14] : memref<108x1024xbf16, #tpu.memory_space<vmem>>, vector<4x1024xbf16>
    tpu.vector_store %arg7[%c8, %c0_14], %14 {strides = array<i32>} : memref<108x1024xbf16, #tpu.memory_space<vmem>>, vector<4x1024xbf16>,
    %c0_15 = arith.constant 0 : index
    %c0_16 = arith.constant 0 : index
    %c27 = arith.constant 27 : index
    %16 = vector.load %arg1[%c0_15, %c0_16, %c27] : memref<1x4x1280xbf16, #tpu.memory_space<vmem>>, vector<1x4x1024xbf16>
    %17 = vector.shape_cast %16 : vector<1x4x1024xbf16> to vector<4x1024xbf16>
    %c12 = arith.constant 12 : index
    %c0_17 = arith.constant 0 : index
    %18 = vector.load %arg7[%c12, %c0_17] : memref<108x1024xbf16, #tpu.memory_space<vmem>>, vector<4x1024xbf16>
    tpu.vector_store %arg7[%c12, %c0_17], %17 {strides = array<i32>} : memref<108x1024xbf16, #tpu.memory_space<vmem>>, vector<4x1024xbf16>,
    %c0_18 = arith.constant 0 : index
    %c0_19 = arith.constant 0 : index
    %c28 = arith.constant 28 : index
    %19 = vector.load %arg1[%c0_18, %c0_19, %c28] : memref<1x4x1280xbf16, #tpu.memory_space<vmem>>, vector<1x4x1024xbf16>
    %20 = vector.shape_cast %19 : vector<1x4x1024xbf16> to vector<4x1024xbf16>
    %c16 = arith.constant 16 : index
    %c0_20 = arith.constant 0 : index
    %21 = vector.load %arg7[%c16, %c0_20] : memref<108x1024xbf16, #tpu.memory_space<vmem>>, vector<4x1024xbf16>
    tpu.vector_store %arg7[%c16, %c0_20], %20 {strides = array<i32>} : memref<108x1024xbf16, #tpu.memory_space<vmem>>, vector<4x1024xbf16>,
    %c0_21 = arith.constant 0 : index
    %c0_22 = arith.constant 0 : index
    %c29 = arith.constant 29 : index
    %22 = vector.load %arg1[%c0_21, %c0_22, %c29] : memref<1x4x1280xbf16, #tpu.memory_space<vmem>>, vector<1x4x1024xbf16>
    %23 = vector.shape_cast %22 : vector<1x4x1024xbf16> to vector<4x1024xbf16>
    %c20 = arith.constant 20 : index
    %c0_23 = arith.constant 0 : index
    %24 = vector.load %arg7[%c20, %c0_23] : memref<108x1024xbf16, #tpu.memory_space<vmem>>, vector<4x1024xbf16>
    tpu.vector_store %arg7[%c20, %c0_23], %23 {strides = array<i32>} : memref<108x1024xbf16, #tpu.memory_space<vmem>>, vector<4x1024xbf16>,
    %c0_24 = arith.constant 0 : index
    %c0_25 = arith.constant 0 : index
    %c37 = arith.constant 37 : index
    %25 = vector.load %arg1[%c0_24, %c0_25, %c37] : memref<1x4x1280xbf16, #tpu.memory_space<vmem>>, vector<1x4x1024xbf16>
    %26 = vector.shape_cast %25 : vector<1x4x1024xbf16> to vector<4x1024xbf16>
    %c24 = arith.constant 24 : index
    %c0_26 = arith.constant 0 : index
    %27 = vector.load %arg7[%c24, %c0_26] : memref<108x1024xbf16, #tpu.memory_space<vmem>>, vector<4x1024xbf16>
    tpu.vector_store %arg7[%c24, %c0_26], %26 {strides = array<i32>} : memref<108x1024xbf16, #tpu.memory_space<vmem>>, vector<4x1024xbf16>,
    %c0_27 = arith.constant 0 : index
    %c0_28 = arith.constant 0 : index
    %c38 = arith.constant 38 : index
    %28 = vector.load %arg1[%c0_27, %c0_28, %c38] : memref<1x4x1280xbf16, #tpu.memory_space<vmem>>, vector<1x4x1024xbf16>
    %29 = vector.shape_cast %28 : vector<1x4x1024xbf16> to vector<4x1024xbf16>
    %c28_29 = arith.constant 28 : index
    %c0_30 = arith.constant 0 : index
    %30 = vector.load %arg7[%c28_29, %c0_30] : memref<108x1024xbf16, #tpu.memory_space<vmem>>, vector<4x1024xbf16>
    tpu.vector_store %arg7[%c28_29, %c0_30], %29 {strides = array<i32>} : memref<108x1024xbf16, #tpu.memory_space<vmem>>, vector<4x1024xbf16>,
    %c0_31 = arith.constant 0 : index
    %c0_32 = arith.constant 0 : index
    %c39 = arith.constant 39 : index
    %31 = vector.load %arg1[%c0_31, %c0_32, %c39] : memref<1x4x1280xbf16, #tpu.memory_space<vmem>>, vector<1x4x1024xbf16>
    %32 = vector.shape_cast %31 : vector<1x4x1024xbf16> to vector<4x1024xbf16>
    %c32 = arith.constant 32 : index
    %c0_33 = arith.constant 0 : index
    %33 = vector.load %arg7[%c32, %c0_33] : memref<108x1024xbf16, #tpu.memory_space<vmem>>, vector<4x1024xbf16>
    tpu.vector_store %arg7[%c32, %c0_33], %32 {strides = array<i32>} : memref<108x1024xbf16, #tpu.memory_space<vmem>>, vector<4x1024xbf16>,
    %c0_34 = arith.constant 0 : index
    %c0_35 = arith.constant 0 : index
    %c117 = arith.constant 117 : index
    %34 = vector.load %arg1[%c0_34, %c0_35, %c117] : memref<1x4x1280xbf16, #tpu.memory_space<vmem>>, vector<1x4x1024xbf16>
    %35 = vector.shape_cast %34 : vector<1x4x1024xbf16> to vector<4x1024xbf16>
    %c36 = arith.constant 36 : index
    %c0_36 = arith.constant 0 : index
    %36 = vector.load %arg7[%c36, %c0_36] : memref<108x1024xbf16, #tpu.memory_space<vmem>>, vector<4x1024xbf16>
    tpu.vector_store %arg7[%c36, %c0_36], %35 {strides = array<i32>} : memref<108x1024xbf16, #tpu.memory_space<vmem>>, vector<4x1024xbf16>,
    %c0_37 = arith.constant 0 : index
    %c0_38 = arith.constant 0 : index
    %c118 = arith.constant 118 : index
    %37 = vector.load %arg1[%c0_37, %c0_38, %c118] : memref<1x4x1280xbf16, #tpu.memory_space<vmem>>, vector<1x4x1024xbf16>
    %38 = vector.shape_cast %37 : vector<1x4x1024xbf16> to vector<4x1024xbf16>
    %c40 = arith.constant 40 : index
    %c0_39 = arith.constant 0 : index
    %39 = vector.load %arg7[%c40, %c0_39] : memref<108x1024xbf16, #tpu.memory_space<vmem>>, vector<4x1024xbf16>
    tpu.vector_store %arg7[%c40, %c0_39], %38 {strides = array<i32>} : memref<108x1024xbf16, #tpu.memory_space<vmem>>, vector<4x1024xbf16>,
    %c0_40 = arith.constant 0 : index
    %c0_41 = arith.constant 0 : index
    %c119 = arith.constant 119 : index
    %40 = vector.load %arg1[%c0_40, %c0_41, %c119] : memref<1x4x1280xbf16, #tpu.memory_space<vmem>>, vector<1x4x1024xbf16>
    %41 = vector.shape_cast %40 : vector<1x4x1024xbf16> to vector<4x1024xbf16>
    %c44 = arith.constant 44 : index
    %c0_42 = arith.constant 0 : index
    %42 = vector.load %arg7[%c44, %c0_42] : memref<108x1024xbf16, #tpu.memory_space<vmem>>, vector<4x1024xbf16>
    tpu.vector_store %arg7[%c44, %c0_42], %41 {strides = array<i32>} : memref<108x1024xbf16, #tpu.memory_space<vmem>>, vector<4x1024xbf16>,
    %c0_43 = arith.constant 0 : index
    %c0_44 = arith.constant 0 : index
    %c127 = arith.constant 127 : index
    %43 = vector.load %arg1[%c0_43, %c0_44, %c127] : memref<1x4x1280xbf16, #tpu.memory_space<vmem>>, vector<1x4x1024xbf16>
    %44 = vector.shape_cast %43 : vector<1x4x1024xbf16> to vector<4x1024xbf16>
    %c48 = arith.constant 48 : index
    %c0_45 = arith.constant 0 : index
    %45 = vector.load %arg7[%c48, %c0_45] : memref<108x1024xbf16, #tpu.memory_space<vmem>>, vector<4x1024xbf16>
    tpu.vector_store %arg7[%c48, %c0_45], %44 {strides = array<i32>} : memref<108x1024xbf16, #tpu.memory_space<vmem>>, vector<4x1024xbf16>,
    %c0_46 = arith.constant 0 : index
    %c0_47 = arith.constant 0 : index
    %c128 = arith.constant 128 : index
    %46 = vector.load %arg1[%c0_46, %c0_47, %c128] : memref<1x4x1280xbf16, #tpu.memory_space<vmem>>, vector<1x4x1024xbf16>
    %47 = vector.shape_cast %46 : vector<1x4x1024xbf16> to vector<4x1024xbf16>
    %c52 = arith.constant 52 : index
    %c0_48 = arith.constant 0 : index
    %48 = vector.load %arg7[%c52, %c0_48] : memref<108x1024xbf16, #tpu.memory_space<vmem>>, vector<4x1024xbf16>
    tpu.vector_store %arg7[%c52, %c0_48], %47 {strides = array<i32>} : memref<108x1024xbf16, #tpu.memory_space<vmem>>, vector<4x1024xbf16>,
    %c0_49 = arith.constant 0 : index
    %c0_50 = arith.constant 0 : index
    %c129 = arith.constant 129 : index
    %49 = vector.load %arg1[%c0_49, %c0_50, %c129] : memref<1x4x1280xbf16, #tpu.memory_space<vmem>>, vector<1x4x1024xbf16>
    %50 = vector.shape_cast %49 : vector<1x4x1024xbf16> to vector<4x1024xbf16>
    %c56 = arith.constant 56 : index
    %c0_51 = arith.constant 0 : index
    %51 = vector.load %arg7[%c56, %c0_51] : memref<108x1024xbf16, #tpu.memory_space<vmem>>, vector<4x1024xbf16>
    tpu.vector_store %arg7[%c56, %c0_51], %50 {strides = array<i32>} : memref<108x1024xbf16, #tpu.memory_space<vmem>>, vector<4x1024xbf16>,
    %c0_52 = arith.constant 0 : index
    %c0_53 = arith.constant 0 : index
    %c137 = arith.constant 137 : index
    %52 = vector.load %arg1[%c0_52, %c0_53, %c137] : memref<1x4x1280xbf16, #tpu.memory_space<vmem>>, vector<1x4x1024xbf16>
    %53 = vector.shape_cast %52 : vector<1x4x1024xbf16> to vector<4x1024xbf16>
    %c60 = arith.constant 60 : index
    %c0_54 = arith.constant 0 : index
    %54 = vector.load %arg7[%c60, %c0_54] : memref<108x1024xbf16, #tpu.memory_space<vmem>>, vector<4x1024xbf16>
    tpu.vector_store %arg7[%c60, %c0_54], %53 {strides = array<i32>} : memref<108x1024xbf16, #tpu.memory_space<vmem>>, vector<4x1024xbf16>,
    %c0_55 = arith.constant 0 : index
    %c0_56 = arith.constant 0 : index
    %c138 = arith.constant 138 : index
    %55 = vector.load %arg1[%c0_55, %c0_56, %c138] : memref<1x4x1280xbf16, #tpu.memory_space<vmem>>, vector<1x4x1024xbf16>
    %56 = vector.shape_cast %55 : vector<1x4x1024xbf16> to vector<4x1024xbf16>
    %c64 = arith.constant 64 : index
    %c0_57 = arith.constant 0 : index
    %57 = vector.load %arg7[%c64, %c0_57] : memref<108x1024xbf16, #tpu.memory_space<vmem>>, vector<4x1024xbf16>
    tpu.vector_store %arg7[%c64, %c0_57], %56 {strides = array<i32>} : memref<108x1024xbf16, #tpu.memory_space<vmem>>, vector<4x1024xbf16>,
    %c0_58 = arith.constant 0 : index
    %c0_59 = arith.constant 0 : index
    %c139 = arith.constant 139 : index
    %58 = vector.load %arg1[%c0_58, %c0_59, %c139] : memref<1x4x1280xbf16, #tpu.memory_space<vmem>>, vector<1x4x1024xbf16>
    %59 = vector.shape_cast %58 : vector<1x4x1024xbf16> to vector<4x1024xbf16>
    %c68 = arith.constant 68 : index
    %c0_60 = arith.constant 0 : index
    %60 = vector.load %arg7[%c68, %c0_60] : memref<108x1024xbf16, #tpu.memory_space<vmem>>, vector<4x1024xbf16>
    tpu.vector_store %arg7[%c68, %c0_60], %59 {strides = array<i32>} : memref<108x1024xbf16, #tpu.memory_space<vmem>>, vector<4x1024xbf16>,
    %c0_61 = arith.constant 0 : index
    %c0_62 = arith.constant 0 : index
    %c217 = arith.constant 217 : index
    %61 = vector.load %arg1[%c0_61, %c0_62, %c217] : memref<1x4x1280xbf16, #tpu.memory_space<vmem>>, vector<1x4x1024xbf16>
    %62 = vector.shape_cast %61 : vector<1x4x1024xbf16> to vector<4x1024xbf16>
    %c72 = arith.constant 72 : index
    %c0_63 = arith.constant 0 : index
    %63 = vector.load %arg7[%c72, %c0_63] : memref<108x1024xbf16, #tpu.memory_space<vmem>>, vector<4x1024xbf16>
    tpu.vector_store %arg7[%c72, %c0_63], %62 {strides = array<i32>} : memref<108x1024xbf16, #tpu.memory_space<vmem>>, vector<4x1024xbf16>,
    %c0_64 = arith.constant 0 : index
    %c0_65 = arith.constant 0 : index
    %c218 = arith.constant 218 : index
    %64 = vector.load %arg1[%c0_64, %c0_65, %c218] : memref<1x4x1280xbf16, #tpu.memory_space<vmem>>, vector<1x4x1024xbf16>
    %65 = vector.shape_cast %64 : vector<1x4x1024xbf16> to vector<4x1024xbf16>
    %c76 = arith.constant 76 : index
    %c0_66 = arith.constant 0 : index
    %66 = vector.load %arg7[%c76, %c0_66] : memref<108x1024xbf16, #tpu.memory_space<vmem>>, vector<4x1024xbf16>
    tpu.vector_store %arg7[%c76, %c0_66], %65 {strides = array<i32>} : memref<108x1024xbf16, #tpu.memory_space<vmem>>, vector<4x1024xbf16>,
    %c0_67 = arith.constant 0 : index
    %c0_68 = arith.constant 0 : index
    %c219 = arith.constant 219 : index
    %67 = vector.load %arg1[%c0_67, %c0_68, %c219] : memref<1x4x1280xbf16, #tpu.memory_space<vmem>>, vector<1x4x1024xbf16>
    %68 = vector.shape_cast %67 : vector<1x4x1024xbf16> to vector<4x1024xbf16>
    %c80 = arith.constant 80 : index
    %c0_69 = arith.constant 0 : index
    %69 = vector.load %arg7[%c80, %c0_69] : memref<108x1024xbf16, #tpu.memory_space<vmem>>, vector<4x1024xbf16>
    tpu.vector_store %arg7[%c80, %c0_69], %68 {strides = array<i32>} : memref<108x1024xbf16, #tpu.memory_space<vmem>>, vector<4x1024xbf16>,
    %c0_70 = arith.constant 0 : index
    %c0_71 = arith.constant 0 : index
    %c227 = arith.constant 227 : index
    %70 = vector.load %arg1[%c0_70, %c0_71, %c227] : memref<1x4x1280xbf16, #tpu.memory_space<vmem>>, vector<1x4x1024xbf16>
    %71 = vector.shape_cast %70 : vector<1x4x1024xbf16> to vector<4x1024xbf16>
    %c84 = arith.constant 84 : index
    %c0_72 = arith.constant 0 : index
    %72 = vector.load %arg7[%c84, %c0_72] : memref<108x1024xbf16, #tpu.memory_space<vmem>>, vector<4x1024xbf16>
    tpu.vector_store %arg7[%c84, %c0_72], %71 {strides = array<i32>} : memref<108x1024xbf16, #tpu.memory_space<vmem>>, vector<4x1024xbf16>,
    %c0_73 = arith.constant 0 : index
    %c0_74 = arith.constant 0 : index
    %c228 = arith.constant 228 : index
    %73 = vector.load %arg1[%c0_73, %c0_74, %c228] : memref<1x4x1280xbf16, #tpu.memory_space<vmem>>, vector<1x4x1024xbf16>
    %74 = vector.shape_cast %73 : vector<1x4x1024xbf16> to vector<4x1024xbf16>
    %c88 = arith.constant 88 : index
    %c0_75 = arith.constant 0 : index
    %75 = vector.load %arg7[%c88, %c0_75] : memref<108x1024xbf16, #tpu.memory_space<vmem>>, vector<4x1024xbf16>
    tpu.vector_store %arg7[%c88, %c0_75], %74 {strides = array<i32>} : memref<108x1024xbf16, #tpu.memory_space<vmem>>, vector<4x1024xbf16>,
    %c0_76 = arith.constant 0 : index
    %c0_77 = arith.constant 0 : index
    %c229 = arith.constant 229 : index
    %76 = vector.load %arg1[%c0_76, %c0_77, %c229] : memref<1x4x1280xbf16, #tpu.memory_space<vmem>>, vector<1x4x1024xbf16>
    %77 = vector.shape_cast %76 : vector<1x4x1024xbf16> to vector<4x1024xbf16>
    %c92 = arith.constant 92 : index
    %c0_78 = arith.constant 0 : index
    %78 = vector.load %arg7[%c92, %c0_78] : memref<108x1024xbf16, #tpu.memory_space<vmem>>, vector<4x1024xbf16>
    tpu.vector_store %arg7[%c92, %c0_78], %77 {strides = array<i32>} : memref<108x1024xbf16, #tpu.memory_space<vmem>>, vector<4x1024xbf16>,
    %c0_79 = arith.constant 0 : index
    %c0_80 = arith.constant 0 : index
    %c237 = arith.constant 237 : index
    %79 = vector.load %arg1[%c0_79, %c0_80, %c237] : memref<1x4x1280xbf16, #tpu.memory_space<vmem>>, vector<1x4x1024xbf16>
    %80 = vector.shape_cast %79 : vector<1x4x1024xbf16> to vector<4x1024xbf16>
    %c96 = arith.constant 96 : index
    %c0_81 = arith.constant 0 : index
    %81 = vector.load %arg7[%c96, %c0_81] : memref<108x1024xbf16, #tpu.memory_space<vmem>>, vector<4x1024xbf16>
    tpu.vector_store %arg7[%c96, %c0_81], %80 {strides = array<i32>} : memref<108x1024xbf16, #tpu.memory_space<vmem>>, vector<4x1024xbf16>,
    %c0_82 = arith.constant 0 : index
    %c0_83 = arith.constant 0 : index
    %c238 = arith.constant 238 : index
    %82 = vector.load %arg1[%c0_82, %c0_83, %c238] : memref<1x4x1280xbf16, #tpu.memory_space<vmem>>, vector<1x4x1024xbf16>
    %83 = vector.shape_cast %82 : vector<1x4x1024xbf16> to vector<4x1024xbf16>
    %c100 = arith.constant 100 : index
    %c0_84 = arith.constant 0 : index
    %84 = vector.load %arg7[%c100, %c0_84] : memref<108x1024xbf16, #tpu.memory_space<vmem>>, vector<4x1024xbf16>
    tpu.vector_store %arg7[%c100, %c0_84], %83 {strides = array<i32>} : memref<108x1024xbf16, #tpu.memory_space<vmem>>, vector<4x1024xbf16>,
    %c0_85 = arith.constant 0 : index
    %c0_86 = arith.constant 0 : index
    %c239 = arith.constant 239 : index
    %85 = vector.load %arg1[%c0_85, %c0_86, %c239] : memref<1x4x1280xbf16, #tpu.memory_space<vmem>>, vector<1x4x1024xbf16>
    %86 = vector.shape_cast %85 : vector<1x4x1024xbf16> to vector<4x1024xbf16>
    %c104 = arith.constant 104 : index
    %c0_87 = arith.constant 0 : index
    %87 = vector.load %arg7[%c104, %c0_87] : memref<108x1024xbf16, #tpu.memory_space<vmem>>, vector<4x1024xbf16>
    tpu.vector_store %arg7[%c104, %c0_87], %86 {strides = array<i32>} : memref<108x1024xbf16, #tpu.memory_space<vmem>>, vector<4x1024xbf16>,
    %c0_88 = arith.constant 0 : index
    %c0_89 = arith.constant 0 : index
    %88 = vector.load %arg2[%c0_88, %c0_89] : memref<8x108xbf16, #tpu.memory_space<vmem>>, vector<8x108xbf16>
    %c0_90 = arith.constant 0 : index
    %c0_91 = arith.constant 0 : index
    %89 = vector.load %arg7[%c0_90, %c0_91] : memref<108x1024xbf16, #tpu.memory_space<vmem>>, vector<108x1024xbf16>
    %cst_92 = arith.constant dense<0.000000e+00> : vector<8x1024xf32>
    %90 = tpu.matmul %88, %89, %cst_92 {dimension_numbers = #tpu.dot_dimension_numbers<[1], [0], [0], [1], [0, 0, 1, 1], [], []>} : vector<8x108xbf16>, vector<108x1024xbf16>, vector<8x1024xf32> -> vector<8x1024xf32>
    %91 = arith.mulf %90, %6 : vector<8x1024xf32>
    %cst_93 = arith.constant dense<0.000000e+00> : vector<8xf32>
    %92 = vector.multi_reduction <add>, %91, %cst_93 [1] : vector<8x1024xf32> to vector<8xf32>
    %93 = vector.shape_cast %92 : vector<8xf32> to vector<8x1xf32>
    %cst_94 = arith.constant 0.001953125 : f32
    %94 = vector.broadcast %cst_94 : f32 to vector<8x1xf32>
    %95 = arith.mulf %93, %94 : vector<8x1xf32>
    %96 = vector.broadcast %95 : vector<8x1xf32> to vector<8x1024xf32>
    %97 = arith.subf %90, %96 : vector<8x1024xf32>
    %98 = arith.mulf %97, %6 : vector<8x1024xf32>
    %99 = arith.mulf %98, %98 : vector<8x1024xf32>
    %cst_95 = arith.constant dense<0.000000e+00> : vector<8xf32>
    %100 = vector.multi_reduction <add>, %99, %cst_95 [1] : vector<8x1024xf32> to vector<8xf32>
    %101 = vector.shape_cast %100 : vector<8xf32> to vector<8x1xf32>
    %cst_96 = arith.constant 0.001953125 : f32
    %102 = vector.broadcast %cst_96 : f32 to vector<8x1xf32>
    %103 = arith.mulf %101, %102 : vector<8x1xf32>
    %cst_97 = arith.constant 9.99999974E-6 : f32
    %104 = vector.broadcast %cst_97 : f32 to vector<8x1xf32>
    %105 = arith.addf %103, %104 : vector<8x1xf32>
    %106 = math.rsqrt %105 : vector<8x1xf32>
    %107 = vector.broadcast %106 : vector<8x1xf32> to vector<8x1024xf32>
    %108 = arith.mulf %98, %107 : vector<8x1024xf32>
    %cst_98 = arith.constant 0.000000e+00 : f32
    %109 = vector.broadcast %cst_98 : f32 to vector<8x1024xf32>
    %110 = arith.cmpf oge, %108, %109 : vector<8x1024xf32>
    %cst_99 = arith.constant 2.000000e-01 : f32
    %111 = vector.broadcast %cst_99 : f32 to vector<8x1024xf32>
    %112 = arith.mulf %111, %108 : vector<8x1024xf32>
    %113 = arith.select %110, %108, %112 : vector<8x1024xi1>, vector<8x1024xf32>
    %114 = arith.truncf %113 : vector<8x1024xf32> to vector<8x1024xbf16>
    %c0_100 = arith.constant 0 : index
    %c128_101 = arith.constant 128 : index
    %115 = vector.load %arg6[%c0_100, %c128_101] : memref<8x1280xbf16, #tpu.memory_space<vmem>>, vector<8x1024xbf16>
    tpu.vector_store %arg6[%c0_100, %c128_101], %114 {strides = array<i32>} : memref<8x1280xbf16, #tpu.memory_space<vmem>>, vector<8x1024xbf16>,
    %c0_102 = arith.constant 0 : index
    %c17_103 = arith.constant 17 : index
    %116 = vector.load %arg6[%c0_102, %c17_103] : memref<8x1280xbf16, #tpu.memory_space<vmem>>, vector<8x1024xbf16>
    %c0_104 = arith.constant 0 : index
    %c0_105 = arith.constant 0 : index
    %117 = vector.load %arg8[%c0_104, %c0_105] : memref<216x1024xbf16, #tpu.memory_space<vmem>>, vector<8x1024xbf16>
    tpu.vector_store %arg8[%c0_104, %c0_105], %116 {strides = array<i32>} : memref<216x1024xbf16, #tpu.memory_space<vmem>>, vector<8x1024xbf16>,
    %c0_106 = arith.constant 0 : index
    %c18_107 = arith.constant 18 : index
    %118 = vector.load %arg6[%c0_106, %c18_107] : memref<8x1280xbf16, #tpu.memory_space<vmem>>, vector<8x1024xbf16>
    %c8_108 = arith.constant 8 : index
    %c0_109 = arith.constant 0 : index
    %119 = vector.load %arg8[%c8_108, %c0_109] : memref<216x1024xbf16, #tpu.memory_space<vmem>>, vector<8x1024xbf16>
    tpu.vector_store %arg8[%c8_108, %c0_109], %118 {strides = array<i32>} : memref<216x1024xbf16, #tpu.memory_space<vmem>>, vector<8x1024xbf16>,
    %c0_110 = arith.constant 0 : index
    %c19_111 = arith.constant 19 : index
    %120 = vector.load %arg6[%c0_110, %c19_111] : memref<8x1280xbf16, #tpu.memory_space<vmem>>, vector<8x1024xbf16>
    %c16_112 = arith.constant 16 : index
    %c0_113 = arith.constant 0 : index
    %121 = vector.load %arg8[%c16_112, %c0_113] : memref<216x1024xbf16, #tpu.memory_space<vmem>>, vector<8x1024xbf16>
    tpu.vector_store %arg8[%c16_112, %c0_113], %120 {strides = array<i32>} : memref<216x1024xbf16, #tpu.memory_space<vmem>>, vector<8x1024xbf16>,
    %c0_114 = arith.constant 0 : index
    %c27_115 = arith.constant 27 : index
    %122 = vector.load %arg6[%c0_114, %c27_115] : memref<8x1280xbf16, #tpu.memory_space<vmem>>, vector<8x1024xbf16>
    %c24_116 = arith.constant 24 : index
    %c0_117 = arith.constant 0 : index
    %123 = vector.load %arg8[%c24_116, %c0_117] : memref<216x1024xbf16, #tpu.memory_space<vmem>>, vector<8x1024xbf16>
    tpu.vector_store %arg8[%c24_116, %c0_117], %122 {strides = array<i32>} : memref<216x1024xbf16, #tpu.memory_space<vmem>>, vector<8x1024xbf16>,
    %c0_118 = arith.constant 0 : index
    %c28_119 = arith.constant 28 : index
    %124 = vector.load %arg6[%c0_118, %c28_119] : memref<8x1280xbf16, #tpu.memory_space<vmem>>, vector<8x1024xbf16>
    %c32_120 = arith.constant 32 : index
    %c0_121 = arith.constant 0 : index
    %125 = vector.load %arg8[%c32_120, %c0_121] : memref<216x1024xbf16, #tpu.memory_space<vmem>>, vector<8x1024xbf16>
    tpu.vector_store %arg8[%c32_120, %c0_121], %124 {strides = array<i32>} : memref<216x1024xbf16, #tpu.memory_space<vmem>>, vector<8x1024xbf16>,
    %c0_122 = arith.constant 0 : index
    %c29_123 = arith.constant 29 : index
    %126 = vector.load %arg6[%c0_122, %c29_123] : memref<8x1280xbf16, #tpu.memory_space<vmem>>, vector<8x1024xbf16>
    %c40_124 = arith.constant 40 : index
    %c0_125 = arith.constant 0 : index
    %127 = vector.load %arg8[%c40_124, %c0_125] : memref<216x1024xbf16, #tpu.memory_space<vmem>>, vector<8x1024xbf16>
    tpu.vector_store %arg8[%c40_124, %c0_125], %126 {strides = array<i32>} : memref<216x1024xbf16, #tpu.memory_space<vmem>>, vector<8x1024xbf16>,
    %c0_126 = arith.constant 0 : index
    %c37_127 = arith.constant 37 : index
    %128 = vector.load %arg6[%c0_126, %c37_127] : memref<8x1280xbf16, #tpu.memory_space<vmem>>, vector<8x1024xbf16>
    %c48_128 = arith.constant 48 : index
    %c0_129 = arith.constant 0 : index
    %129 = vector.load %arg8[%c48_128, %c0_129] : memref<216x1024xbf16, #tpu.memory_space<vmem>>, vector<8x1024xbf16>
    tpu.vector_store %arg8[%c48_128, %c0_129], %128 {strides = array<i32>} : memref<216x1024xbf16, #tpu.memory_space<vmem>>, vector<8x1024xbf16>,
    %c0_130 = arith.constant 0 : index
    %c38_131 = arith.constant 38 : index
    %130 = vector.load %arg6[%c0_130, %c38_131] : memref<8x1280xbf16, #tpu.memory_space<vmem>>, vector<8x1024xbf16>
    %c56_132 = arith.constant 56 : index
    %c0_133 = arith.constant 0 : index
    %131 = vector.load %arg8[%c56_132, %c0_133] : memref<216x1024xbf16, #tpu.memory_space<vmem>>, vector<8x1024xbf16>
    tpu.vector_store %arg8[%c56_132, %c0_133], %130 {strides = array<i32>} : memref<216x1024xbf16, #tpu.memory_space<vmem>>, vector<8x1024xbf16>,
    %c0_134 = arith.constant 0 : index
    %c39_135 = arith.constant 39 : index
    %132 = vector.load %arg6[%c0_134, %c39_135] : memref<8x1280xbf16, #tpu.memory_space<vmem>>, vector<8x1024xbf16>
    %c64_136 = arith.constant 64 : index
    %c0_137 = arith.constant 0 : index
    %133 = vector.load %arg8[%c64_136, %c0_137] : memref<216x1024xbf16, #tpu.memory_space<vmem>>, vector<8x1024xbf16>
    tpu.vector_store %arg8[%c64_136, %c0_137], %132 {strides = array<i32>} : memref<216x1024xbf16, #tpu.memory_space<vmem>>, vector<8x1024xbf16>,
    %c0_138 = arith.constant 0 : index
    %c117_139 = arith.constant 117 : index
    %134 = vector.load %arg6[%c0_138, %c117_139] : memref<8x1280xbf16, #tpu.memory_space<vmem>>, vector<8x1024xbf16>
    %c72_140 = arith.constant 72 : index
    %c0_141 = arith.constant 0 : index
    %135 = vector.load %arg8[%c72_140, %c0_141] : memref<216x1024xbf16, #tpu.memory_space<vmem>>, vector<8x1024xbf16>
    tpu.vector_store %arg8[%c72_140, %c0_141], %134 {strides = array<i32>} : memref<216x1024xbf16, #tpu.memory_space<vmem>>, vector<8x1024xbf16>,
    %c0_142 = arith.constant 0 : index
    %c118_143 = arith.constant 118 : index
    %136 = vector.load %arg6[%c0_142, %c118_143] : memref<8x1280xbf16, #tpu.memory_space<vmem>>, vector<8x1024xbf16>
    %c80_144 = arith.constant 80 : index
    %c0_145 = arith.constant 0 : index
    %137 = vector.load %arg8[%c80_144, %c0_145] : memref<216x1024xbf16, #tpu.memory_space<vmem>>, vector<8x1024xbf16>
    tpu.vector_store %arg8[%c80_144, %c0_145], %136 {strides = array<i32>} : memref<216x1024xbf16, #tpu.memory_space<vmem>>, vector<8x1024xbf16>,
    %c0_146 = arith.constant 0 : index
    %c119_147 = arith.constant 119 : index
    %138 = vector.load %arg6[%c0_146, %c119_147] : memref<8x1280xbf16, #tpu.memory_space<vmem>>, vector<8x1024xbf16>
    %c88_148 = arith.constant 88 : index
    %c0_149 = arith.constant 0 : index
    %139 = vector.load %arg8[%c88_148, %c0_149] : memref<216x1024xbf16, #tpu.memory_space<vmem>>, vector<8x1024xbf16>
    tpu.vector_store %arg8[%c88_148, %c0_149], %138 {strides = array<i32>} : memref<216x1024xbf16, #tpu.memory_space<vmem>>, vector<8x1024xbf16>,
    %c0_150 = arith.constant 0 : index
    %c127_151 = arith.constant 127 : index
    %140 = vector.load %arg6[%c0_150, %c127_151] : memref<8x1280xbf16, #tpu.memory_space<vmem>>, vector<8x1024xbf16>
    %c96_152 = arith.constant 96 : index
    %c0_153 = arith.constant 0 : index
    %141 = vector.load %arg8[%c96_152, %c0_153] : memref<216x1024xbf16, #tpu.memory_space<vmem>>, vector<8x1024xbf16>
    tpu.vector_store %arg8[%c96_152, %c0_153], %140 {strides = array<i32>} : memref<216x1024xbf16, #tpu.memory_space<vmem>>, vector<8x1024xbf16>,
    %c0_154 = arith.constant 0 : index
    %c128_155 = arith.constant 128 : index
    %142 = vector.load %arg6[%c0_154, %c128_155] : memref<8x1280xbf16, #tpu.memory_space<vmem>>, vector<8x1024xbf16>
    %c104_156 = arith.constant 104 : index
    %c0_157 = arith.constant 0 : index
    %143 = vector.load %arg8[%c104_156, %c0_157] : memref<216x1024xbf16, #tpu.memory_space<vmem>>, vector<8x1024xbf16>
    tpu.vector_store %arg8[%c104_156, %c0_157], %142 {strides = array<i32>} : memref<216x1024xbf16, #tpu.memory_space<vmem>>, vector<8x1024xbf16>,
    %c0_158 = arith.constant 0 : index
    %c129_159 = arith.constant 129 : index
    %144 = vector.load %arg6[%c0_158, %c129_159] : memref<8x1280xbf16, #tpu.memory_space<vmem>>, vector<8x1024xbf16>
    %c112 = arith.constant 112 : index
    %c0_160 = arith.constant 0 : index
    %145 = vector.load %arg8[%c112, %c0_160] : memref<216x1024xbf16, #tpu.memory_space<vmem>>, vector<8x1024xbf16>
    tpu.vector_store %arg8[%c112, %c0_160], %144 {strides = array<i32>} : memref<216x1024xbf16, #tpu.memory_space<vmem>>, vector<8x1024xbf16>,
    %c0_161 = arith.constant 0 : index
    %c137_162 = arith.constant 137 : index
    %146 = vector.load %arg6[%c0_161, %c137_162] : memref<8x1280xbf16, #tpu.memory_space<vmem>>, vector<8x1024xbf16>
    %c120 = arith.constant 120 : index
    %c0_163 = arith.constant 0 : index
    %147 = vector.load %arg8[%c120, %c0_163] : memref<216x1024xbf16, #tpu.memory_space<vmem>>, vector<8x1024xbf16>
    tpu.vector_store %arg8[%c120, %c0_163], %146 {strides = array<i32>} : memref<216x1024xbf16, #tpu.memory_space<vmem>>, vector<8x1024xbf16>,
    %c0_164 = arith.constant 0 : index
    %c138_165 = arith.constant 138 : index
    %148 = vector.load %arg6[%c0_164, %c138_165] : memref<8x1280xbf16, #tpu.memory_space<vmem>>, vector<8x1024xbf16>
    %c128_166 = arith.constant 128 : index
    %c0_167 = arith.constant 0 : index
    %149 = vector.load %arg8[%c128_166, %c0_167] : memref<216x1024xbf16, #tpu.memory_space<vmem>>, vector<8x1024xbf16>
    tpu.vector_store %arg8[%c128_166, %c0_167], %148 {strides = array<i32>} : memref<216x1024xbf16, #tpu.memory_space<vmem>>, vector<8x1024xbf16>,
    %c0_168 = arith.constant 0 : index
    %c139_169 = arith.constant 139 : index
    %150 = vector.load %arg6[%c0_168, %c139_169] : memref<8x1280xbf16, #tpu.memory_space<vmem>>, vector<8x1024xbf16>
    %c136 = arith.constant 136 : index
    %c0_170 = arith.constant 0 : index
    %151 = vector.load %arg8[%c136, %c0_170] : memref<216x1024xbf16, #tpu.memory_space<vmem>>, vector<8x1024xbf16>
    tpu.vector_store %arg8[%c136, %c0_170], %150 {strides = array<i32>} : memref<216x1024xbf16, #tpu.memory_space<vmem>>, vector<8x1024xbf16>,
    %c0_171 = arith.constant 0 : index
    %c217_172 = arith.constant 217 : index
    %152 = vector.load %arg6[%c0_171, %c217_172] : memref<8x1280xbf16, #tpu.memory_space<vmem>>, vector<8x1024xbf16>
    %c144 = arith.constant 144 : index
    %c0_173 = arith.constant 0 : index
    %153 = vector.load %arg8[%c144, %c0_173] : memref<216x1024xbf16, #tpu.memory_space<vmem>>, vector<8x1024xbf16>
    tpu.vector_store %arg8[%c144, %c0_173], %152 {strides = array<i32>} : memref<216x1024xbf16, #tpu.memory_space<vmem>>, vector<8x1024xbf16>,
    %c0_174 = arith.constant 0 : index
    %c218_175 = arith.constant 218 : index
    %154 = vector.load %arg6[%c0_174, %c218_175] : memref<8x1280xbf16, #tpu.memory_space<vmem>>, vector<8x1024xbf16>
    %c152 = arith.constant 152 : index
    %c0_176 = arith.constant 0 : index
    %155 = vector.load %arg8[%c152, %c0_176] : memref<216x1024xbf16, #tpu.memory_space<vmem>>, vector<8x1024xbf16>
    tpu.vector_store %arg8[%c152, %c0_176], %154 {strides = array<i32>} : memref<216x1024xbf16, #tpu.memory_space<vmem>>, vector<8x1024xbf16>,
    %c0_177 = arith.constant 0 : index
    %c219_178 = arith.constant 219 : index
    %156 = vector.load %arg6[%c0_177, %c219_178] : memref<8x1280xbf16, #tpu.memory_space<vmem>>, vector<8x1024xbf16>
    %c160 = arith.constant 160 : index
    %c0_179 = arith.constant 0 : index
    %157 = vector.load %arg8[%c160, %c0_179] : memref<216x1024xbf16, #tpu.memory_space<vmem>>, vector<8x1024xbf16>
    tpu.vector_store %arg8[%c160, %c0_179], %156 {strides = array<i32>} : memref<216x1024xbf16, #tpu.memory_space<vmem>>, vector<8x1024xbf16>,
    %c0_180 = arith.constant 0 : index
    %c227_181 = arith.constant 227 : index
    %158 = vector.load %arg6[%c0_180, %c227_181] : memref<8x1280xbf16, #tpu.memory_space<vmem>>, vector<8x1024xbf16>
    %c168 = arith.constant 168 : index
    %c0_182 = arith.constant 0 : index
    %159 = vector.load %arg8[%c168, %c0_182] : memref<216x1024xbf16, #tpu.memory_space<vmem>>, vector<8x1024xbf16>
    tpu.vector_store %arg8[%c168, %c0_182], %158 {strides = array<i32>} : memref<216x1024xbf16, #tpu.memory_space<vmem>>, vector<8x1024xbf16>,
    %c0_183 = arith.constant 0 : index
    %c228_184 = arith.constant 228 : index
    %160 = vector.load %arg6[%c0_183, %c228_184] : memref<8x1280xbf16, #tpu.memory_space<vmem>>, vector<8x1024xbf16>
    %c176 = arith.constant 176 : index
    %c0_185 = arith.constant 0 : index
    %161 = vector.load %arg8[%c176, %c0_185] : memref<216x1024xbf16, #tpu.memory_space<vmem>>, vector<8x1024xbf16>
    tpu.vector_store %arg8[%c176, %c0_185], %160 {strides = array<i32>} : memref<216x1024xbf16, #tpu.memory_space<vmem>>, vector<8x1024xbf16>,
    %c0_186 = arith.constant 0 : index
    %c229_187 = arith.constant 229 : index
    %162 = vector.load %arg6[%c0_186, %c229_187] : memref<8x1280xbf16, #tpu.memory_space<vmem>>, vector<8x1024xbf16>
    %c184 = arith.constant 184 : index
    %c0_188 = arith.constant 0 : index
    %163 = vector.load %arg8[%c184, %c0_188] : memref<216x1024xbf16, #tpu.memory_space<vmem>>, vector<8x1024xbf16>
    tpu.vector_store %arg8[%c184, %c0_188], %162 {strides = array<i32>} : memref<216x1024xbf16, #tpu.memory_space<vmem>>, vector<8x1024xbf16>,
    %c0_189 = arith.constant 0 : index
    %c237_190 = arith.constant 237 : index
    %164 = vector.load %arg6[%c0_189, %c237_190] : memref<8x1280xbf16, #tpu.memory_space<vmem>>, vector<8x1024xbf16>
    %c192 = arith.constant 192 : index
    %c0_191 = arith.constant 0 : index
    %165 = vector.load %arg8[%c192, %c0_191] : memref<216x1024xbf16, #tpu.memory_space<vmem>>, vector<8x1024xbf16>
    tpu.vector_store %arg8[%c192, %c0_191], %164 {strides = array<i32>} : memref<216x1024xbf16, #tpu.memory_space<vmem>>, vector<8x1024xbf16>,
    %c0_192 = arith.constant 0 : index
    %c238_193 = arith.constant 238 : index
    %166 = vector.load %arg6[%c0_192, %c238_193] : memref<8x1280xbf16, #tpu.memory_space<vmem>>, vector<8x1024xbf16>
    %c200 = arith.constant 200 : index
    %c0_194 = arith.constant 0 : index
    %167 = vector.load %arg8[%c200, %c0_194] : memref<216x1024xbf16, #tpu.memory_space<vmem>>, vector<8x1024xbf16>
    tpu.vector_store %arg8[%c200, %c0_194], %166 {strides = array<i32>} : memref<216x1024xbf16, #tpu.memory_space<vmem>>, vector<8x1024xbf16>,
    %c0_195 = arith.constant 0 : index
    %c239_196 = arith.constant 239 : index
    %168 = vector.load %arg6[%c0_195, %c239_196] : memref<8x1280xbf16, #tpu.memory_space<vmem>>, vector<8x1024xbf16>
    %c208 = arith.constant 208 : index
    %c0_197 = arith.constant 0 : index
    %169 = vector.load %arg8[%c208, %c0_197] : memref<216x1024xbf16, #tpu.memory_space<vmem>>, vector<8x1024xbf16>
    tpu.vector_store %arg8[%c208, %c0_197], %168 {strides = array<i32>} : memref<216x1024xbf16, #tpu.memory_space<vmem>>, vector<8x1024xbf16>,
    %c0_198 = arith.constant 0 : index
    %c0_199 = arith.constant 0 : index
    %170 = vector.load %arg3[%c0_198, %c0_199] : memref<8x216xbf16, #tpu.memory_space<vmem>>, vector<8x216xbf16>
    %c0_200 = arith.constant 0 : index
    %c0_201 = arith.constant 0 : index
    %171 = vector.load %arg8[%c0_200, %c0_201] : memref<216x1024xbf16, #tpu.memory_space<vmem>>, vector<216x1024xbf16>
    %cst_202 = arith.constant dense<0.000000e+00> : vector<8x1024xf32>
    %172 = tpu.matmul %170, %171, %cst_202 {dimension_numbers = #tpu.dot_dimension_numbers<[1], [0], [0], [1], [0, 0, 1, 1], [], []>} : vector<8x216xbf16>, vector<216x1024xbf16>, vector<8x1024xf32> -> vector<8x1024xf32>
    %173 = arith.mulf %172, %6 : vector<8x1024xf32>
    %cst_203 = arith.constant dense<0.000000e+00> : vector<8xf32>
    %174 = vector.multi_reduction <add>, %173, %cst_203 [1] : vector<8x1024xf32> to vector<8xf32>
    %175 = vector.shape_cast %174 : vector<8xf32> to vector<8x1xf32>
    %cst_204 = arith.constant 0.001953125 : f32
    %176 = vector.broadcast %cst_204 : f32 to vector<8x1xf32>
    %177 = arith.mulf %175, %176 : vector<8x1xf32>
    %178 = vector.broadcast %177 : vector<8x1xf32> to vector<8x1024xf32>
    %179 = arith.subf %172, %178 : vector<8x1024xf32>
    %180 = arith.mulf %179, %6 : vector<8x1024xf32>
    %181 = arith.mulf %180, %180 : vector<8x1024xf32>
    %cst_205 = arith.constant dense<0.000000e+00> : vector<8xf32>
    %182 = vector.multi_reduction <add>, %181, %cst_205 [1] : vector<8x1024xf32> to vector<8xf32>
    %183 = vector.shape_cast %182 : vector<8xf32> to vector<8x1xf32>
    %cst_206 = arith.constant 0.001953125 : f32
    %184 = vector.broadcast %cst_206 : f32 to vector<8x1xf32>
    %185 = arith.mulf %183, %184 : vector<8x1xf32>
    %cst_207 = arith.constant 9.99999974E-6 : f32
    %186 = vector.broadcast %cst_207 : f32 to vector<8x1xf32>
    %187 = arith.addf %185, %186 : vector<8x1xf32>
    %188 = math.rsqrt %187 : vector<8x1xf32>
    %189 = vector.broadcast %188 : vector<8x1xf32> to vector<8x1024xf32>
    %190 = arith.mulf %180, %189 : vector<8x1024xf32>
    %cst_208 = arith.constant 0.000000e+00 : f32
    %191 = vector.broadcast %cst_208 : f32 to vector<8x1024xf32>
    %192 = arith.cmpf oge, %190, %191 : vector<8x1024xf32>
    %cst_209 = arith.constant 2.000000e-01 : f32
    %193 = vector.broadcast %cst_209 : f32 to vector<8x1024xf32>
    %194 = arith.mulf %193, %190 : vector<8x1024xf32>
    %195 = arith.select %192, %190, %194 : vector<8x1024xi1>, vector<8x1024xf32>
    %196 = arith.truncf %195 : vector<8x1024xf32> to vector<8x1024xbf16>
    %c0_210 = arith.constant 0 : index
    %c0_211 = arith.constant 0 : index
    %c0_212 = arith.constant 0 : index
    %197 = vector.load %arg5[%c0_210, %c0_211, %c0_212] : memref<1x8x1024xbf16, #tpu.memory_space<vmem>>, vector<1x8x1024xbf16>
    %198 = vector.shape_cast %197 : vector<1x8x1024xbf16> to vector<8x1024xbf16>
    %199 = vector.shape_cast %196 : vector<8x1024xbf16> to vector<1x8x1024xbf16>
    tpu.vector_store %arg5[%c0_210, %c0_211, %c0_212], %199 {strides = array<i32>} : memref<1x8x1024xbf16, #tpu.memory_space<vmem>>, vector<1x8x1024xbf16>,
    return
  }
  func.func @transform_0(%arg0: i32) -> (i32, i32, i32) {
    %c0_i32 = arith.constant 0 : i32
    %c0_i32_0 = arith.constant 0 : i32
    %c0_i32_1 = arith.constant 0 : i32
    return %arg0, %c0_i32, %c0_i32_0 : i32, i32, i32
  }
  func.func @transform_1(%arg0: i32) -> (i32, i32) {
    %c0_i32 = arith.constant 0 : i32
    %c0_i32_0 = arith.constant 0 : i32
    %c0_i32_1 = arith.constant 0 : i32
    return %c0_i32, %c0_i32_0 : i32, i32
  }
  func.func @transform_2(%arg0: i32) -> (i32, i32) {
    %c0_i32 = arith.constant 0 : i32
    %c0_i32_0 = arith.constant 0 : i32
    %c0_i32_1 = arith.constant 0 : i32
    return %c0_i32, %c0_i32_0 : i32, i32
  }
  func.func @transform_3(%arg0: i32) -> (i32, i32) {
    %c0_i32 = arith.constant 0 : i32
    %c0_i32_0 = arith.constant 0 : i32
    %c0_i32_1 = arith.constant 0 : i32
    return %c0_i32, %c0_i32_0 : i32, i32
  }
  func.func @transform_4(%arg0: i32) -> (i32, i32, i32) {
    %c0_i32 = arith.constant 0 : i32
    %c0_i32_0 = arith.constant 0 : i32
    %c0_i32_1 = arith.constant 0 : i32
    return %arg0, %c0_i32, %c0_i32_0 : i32, i32, i32
  }
}

</mosaic_0001>

<bundles_post_ra>
// kernel: double_conv.1
= control target key start
LH: loop header
LB: loop body
LE: loop exit
PB: predicated region body
PF: predicated region fallthrough
CT: control target
= control target key end

     0   :  { %s5347_s15 = smov 0   ;;  %s6905_s0 = inlined_call_operand.vmem [shape: bf16[2,4,1280], index: 0, kind: input, shape index: {}]   ;;  %s6906_s1 = inlined_call_operand.vmem [shape: bf16[8,108], index: 1, kind: input, shape index: {}]   ;;  %s6907_s2 = inlined_call_operand.vmem [shape: bf16[8,216], index: 2, kind: input, shape index: {}]   ;;  %s6908_s3 = inlined_call_operand.vmem [shape: f32[1,1024], index: 3, kind: input, shape index: {}]   ;;  %s6909_s4 = inlined_call_operand.vmem [shape: bf16[2,8,1024], index: 4, kind: output, shape index: {}]  }
   0x1 LB: > { %s4991_s16 = sadd.s32 4294967295, %s5292_s15   ;;  %p4995_p0 = scmp.ge.s32.totalorder %s5292_s15, 1  ;;  %s5292_s15 = sphi %s5347_s15, %s14_s15  }
   0x2   : > { %p162_p1 = scmp.lt.s32.totalorder %s5292_s15, 3 }
   0x4   : > { %p163_p2 = pnand %p4995_p0, %p162_p1 }
   0x6   : > { %166 = sbr.rel (%p163_p2) target bundleno = 1882 (0x75a), region = 36 }
   0xd   : > { %p188_p3 = scmp.lt.s32.totalorder %s4991_s16, 1  ;;  %v203_v0 = vlaneseq  ;;  %v5294_v1 = vmov 1983009808   ;;  %s5295_s21 = smov 110   ;;  %vm301_vm0 = vcmask 1043456   ;;  %vm379_vm1 = vcmask 900096  }
   0xe   : > { %v251_v2 = vunpack.c.l.s4 %v5294_v1  ;;  %s5296_s22 = smov 111   ;;  %s5297_s23 = smov 101   ;;  %vm303_vm2 = vcmask 908288   ;;  %vm454_vm3 = vcmask 891904   ;;  %vm530_vm4 = vcmask 826368  }
   0xf   : > { %s7141_s16 = smov (!%p188_p3, %s4991_s16), 1  ;;  %v5357_v3 = vshrl.u32 %v203_v0, 7  ;;  %s5298_s24 = smov 109   ;;  %vm605_vm5 = vcmask 818176   ;;  %vm681_vm6 = vcmask 809984   ;;  %vm756_vm7 = vcmask 744448  }
  0x10   : > { %v252_v4 = vunpack.c.0.s8 %v251_v2  ;;  %s5222_s17 = smul.u32 20, %s7141_s16  ;;  %s5299_s25 = smov 100   ;;  %vm6942_vm8 = vcmask 736256   ;;  %vm6945_vm9 = vcmask 728064   ;;  %vm6944_vm10 = vcmask 89088  }
  0x11   : > { %s5300_s26 = smov 99   ;;  %s5301_s27 = smov 91   ;;  %vm6919_vm11 = vcmask 80896   ;;  %vm6943_vm12 = vcmask 72704   ;;  %vm6916_vm13 = vcmask 7168   ;;  %vm6918_vm14 = vcmask 1039360  }
  0x12   : > { %v5361_v5 = vsub.s32 %v252_v4, %v5357_v3  ;;  %s5366_s20 = scalar_lea.vmem %s6905_s0, %s5222_s17  ;;  %s6948_s28 = smov 90   ;;  %vm6917_vm15 = vcmask 973824  }
  0x13   : > { %v319_v6 = vld [vmem:[%s5366_s20] sm:$0xff]  ;;  %v5386_v14 = vld [vmem:[%s5366_s20 + $0x8] sm:$0xff]  ;;  %s5303_s29 = smov 89   ;;  %s5304_s30 = smov 11  }
  0x14   : > { %v5370_v7 = vld [vmem:[%s5366_s20 + $0x2] sm:$0xff]  ;;  %v339_v8 = vrot.slane %v319_v6, %v5361_v5  ;;  %v325_v10 = vcombine.low %v319_v6, %v319_v6  ;;  %v249_v11 = vcombine.high %v319_v6, %v319_v6  ;;  %v340_v15 = vcombine.low %v5386_v14, %v5386_v14  ;;  %s6926_s5 = smov 10   ;;  %s6924_s6 = smov 9   ;;  %v5453_v22 = vld [vmem:[%s5366_s20 + $0xa] sm:$0xff] }
  0x15   : > { %5007 = vst.sshfl [vmem:[#allocation3 + $0xc8] sm:$0xf0 pattern:$0x76325410] %v5370_v7  ;;  %v5376_v9 = vcombine.low %v5370_v7, %v5370_v7  ;;  %v5397_v17 = vrot.slane %v5386_v14, %v5361_v5  ;;  %v1273_v18 = vcombine.high %v5370_v7, %v5370_v7  ;;  %s6921_s7 = smov 1   ;;  %v5442_v20 = vrot.slane %v5370_v7, %v5361_v5  ;;  %s5308_s8 = smov 127  }
  0x16   : > { %365 = vrot.lane.b32.xlu1 %v339_v8, %s5295_s21  ;;  %286 = vrot.lane.b32.xlu0 %v339_v8, %s5296_s22  ;;  %v332_v12 = vrot.slane %v325_v10, %v5361_v5  ;;  %v263_v13 = vrot.slane %v249_v11, %v5361_v5  ;;  %v347_v16 = vrot.slane %v340_v15, %v5361_v5  ;;  %s5309_s9 = smov 119   ;;  %s5310_s10 = smov 118  }
  0x17   : > { %5006 = vst.sshfl [vmem:[#allocation3 + $0xc0] sm:$0xf0 pattern:$0x76325410] %v5376_v9  ;;  %v5438_v19 = vrot.slane %v1273_v18, %v5361_v5  ;;  %v5450_v21 = vrot.slane %v5376_v9, %v5361_v5  ;;  %v5461_v23 = vrot.slane %v5453_v22, %v5361_v5  ;;  %v1363_v24 = vcombine.low %v5453_v22, %v5453_v22  ;;  %s5311_s11 = smov 117   ;;  %s5312_s12 = smov 39  }
  0x18   : > { %s6952_s13 = smov 38   ;;  %s6914_s14 = smov 37  }
  0x19   : > { %v5470_v25 = vrot.slane %v1363_v24, %v5361_v5  ;;  %s6951_s17 = smov 29   ;;  %s6910_s18 = smov 28  }
  0x1a   : > { %516 = vrot.lane.b32.xlu1 %v339_v8, %s5297_s23  ;;  %438 = vrot.lane.b32.xlu0 %v339_v8, %s5298_s24  ;;  %s6912_s19 = smov 27  }
  0x1e   : > { %363 = vrot.lane.b32.xlu1 %v332_v12, %s5295_s21  ;;  %288 = vrot.lane.b32.xlu0 %v263_v13, %s5296_s22 }
  0x22   : > { %440 = vrot.lane.b32.xlu1 %v263_v13, %s5298_s24  ;;  %514 = vrot.lane.b32.xlu0 %v332_v12, %s5297_s23 }
  0x26   : > { %367 = vrot.lane.b32.xlu1 %v347_v16, %s5295_s21  ;;  %290 = vrot.lane.b32.xlu0 %v5397_v17, %s5296_s22 }
  0x2a   : > { %518 = vrot.lane.b32.xlu1 %v347_v16, %s5297_s23  ;;  %442 = vrot.lane.b32.xlu0 %v5397_v17, %s5298_s24 }
  0x2e   : > { %591 = vrot.lane.b32.xlu1 %v263_v13, %s5299_s25  ;;  %589 = vrot.lane.b32.xlu0 %v339_v8, %s5299_s25 }
  0x32   : > { %667 = vrot.lane.b32.xlu1 %v339_v8, %s5300_s26  ;;  %665 = vrot.lane.b32.xlu0 %v332_v12, %s5300_s26 }
  0x36   : > { %742 = vrot.lane.b32.xlu1 %v263_v13, %s5301_s27  ;;  %740 = vrot.lane.b32.xlu0 %v339_v8, %s5301_s27 }
  0x3a   : > { %818 = vrot.lane.b32.xlu1 %v339_v8, %s6948_s28  ;;  %816 = vrot.lane.b32.xlu0 %v332_v12, %s6948_s28 }
  0x3e   : > { %669 = vrot.lane.b32.xlu1 %v347_v16, %s5300_s26  ;;  %593 = vrot.lane.b32.xlu0 %v5397_v17, %s5299_s25 }
  0x42   : > { %820 = vrot.lane.b32.xlu1 %v347_v16, %s6948_s28  ;;  %744 = vrot.lane.b32.xlu0 %v5397_v17, %s5301_s27 }
  0x46   : > { %893 = vrot.lane.b32.xlu1 %v263_v13, %s5303_s29  ;;  %891 = vrot.lane.b32.xlu0 %v339_v8, %s5303_s29 }
  0x4a   : > { %969 = vrot.lane.b32.xlu1 %v339_v8, %s5304_s30  ;;  %967 = vrot.lane.b32.xlu0 %v332_v12, %s5304_s30 }
  0x4e   : > { %1044 = vrot.lane.b32.xlu1 %v263_v13, %s6926_s5  ;;  %1042 = vrot.lane.b32.xlu0 %v339_v8, %s6926_s5 }
  0x52   : > { %1120 = vrot.lane.b32.xlu1 %v339_v8, %s6924_s6  ;;  %1118 = vrot.lane.b32.xlu0 %v332_v12, %s6924_s6  ;;  %v1171_v12 = vcombine.high %v5386_v14, %v5386_v14 }
  0x54   : > { %v5576_v14 = vrot.slane %v1171_v12, %v5361_v5 }
  0x56   : > { %971 = vrot.lane.b32.xlu1 %v347_v16, %s5304_s30  ;;  %895 = vrot.lane.b32.xlu0 %v5397_v17, %s5303_s29 }
  0x5a   : > { %1122 = vrot.lane.b32.xlu1 %v347_v16, %s6924_s6  ;;  %1046 = vrot.lane.b32.xlu0 %v5397_v17, %s6926_s5 }
  0x5e   : > { %1195 = vrot.lane.b32.xlu1 %v263_v13, %s6921_s7  ;;  %1193 = vrot.lane.b32.xlu0 %v339_v8, %s6921_s7 }
  0x62   : > { %1312 = vrot.lane.b32.xlu1 %v5438_v19, %s5308_s8  ;;  %1310 = vrot.lane.b32.xlu0 %v5442_v20, %s5308_s8 }
  0x66   : > { %1388 = vrot.lane.b32.xlu1 %v5442_v20, %s5309_s9  ;;  %1386 = vrot.lane.b32.xlu0 %v5450_v21, %s5309_s9 }
  0x6a   : > { %1314 = vrot.lane.b32.xlu1 %v5461_v23, %s5308_s8  ;;  %1197 = vrot.lane.b32.xlu0 %v5397_v17, %s6921_s7 }
  0x6e   : > { %1461 = vrot.lane.b32.xlu1 %v5442_v20, %s5310_s10  ;;  %1390 = vrot.lane.b32.xlu0 %v5470_v25, %s5309_s9 }
  0x72   : > { %1537 = vrot.lane.b32.xlu1 %v5450_v21, %s5311_s11  ;;  %1463 = vrot.lane.b32.xlu0 %v5438_v19, %s5310_s10 }
  0x76   : > { %1612 = vrot.lane.b32.xlu1 %v5442_v20, %s5312_s12  ;;  %1539 = vrot.lane.b32.xlu0 %v5442_v20, %s5311_s11 }
  0x7a   : > { %1688 = vrot.lane.b32.xlu1 %v5450_v21, %s6952_s13  ;;  %1614 = vrot.lane.b32.xlu0 %v5438_v19, %s5312_s12 }
  0x7e   : > { %1465 = vrot.lane.b32.xlu1 %v5461_v23, %s5310_s10  ;;  %1690 = vrot.lane.b32.xlu0 %v5442_v20, %s6952_s13 }
  0x82   : > { %1616 = vrot.lane.b32.xlu1 %v5461_v23, %s5312_s12  ;;  %1541 = vrot.lane.b32.xlu0 %v5470_v25, %s5311_s11 }
  0x86   : > { %1763 = vrot.lane.b32.xlu1 %v5442_v20, %s6914_s14  ;;  %1692 = vrot.lane.b32.xlu0 %v5470_v25, %s6952_s13 }
  0x88   : > { %v366_v26 = vpop.permute.xlu1 %365  ;;  %v287_v27 = vpop.permute.xlu0 %286 }
  0x89   : > { %v374_v32 = vrot.slane %v366_v26, 4  ;;  %v296_v33 = vrot.slane %v287_v27, 4 }
  0x8a   : > { %1839 = vrot.lane.b32.xlu1 %v5450_v21, %s6951_s17  ;;  %1765 = vrot.lane.b32.xlu0 %v5438_v19, %s6914_s14 }
  0x8c   : > { %v517_v28 = vpop.permute.xlu1 %516  ;;  %v439_v29 = vpop.permute.xlu0 %438 }
  0x8d   : > { %v525_v42 = vrot.slane %v517_v28, 4  ;;  %v448_v43 = vrot.slane %v439_v29, 4 }
  0x8e   : > { %1914 = vrot.lane.b32.xlu1 %v5442_v20, %s6910_s18  ;;  %1841 = vrot.lane.b32.xlu0 %v5442_v20, %s6951_s17 }
  0x90   : > { %v364_v30 = vpop.permute.xlu1 %363  ;;  %v289_v31 = vpop.permute.xlu0 %288 }
  0x91   : > { %v373_v34 = vrot.slane %v364_v30, 4  ;;  %v297_v35 = vrot.slane %v289_v31, 4 }
  0x92   : > { %1990 = vrot.lane.b32.xlu1 %v5450_v21, %s6912_s19  ;;  %1916 = vrot.lane.b32.xlu0 %v5438_v19, %s6910_s18 }
  0x93   : > { %v378_v36 = vsel %vm301_vm0, %v373_v34, %v374_v32  ;;  %v302_v37 = vsel %vm301_vm0, %v296_v33, %v297_v35 }
  0x94   : > { %v380_v38 = vsel %vm379_vm1, %v364_v30, %v378_v36  ;;  %v304_v39 = vsel %vm303_vm2, %v287_v27, %v302_v37  ;;  %v441_v40 = vpop.permute.xlu1 %440  ;;  %v515_v41 = vpop.permute.xlu0 %514 }
  0x95   : > { %391 = vst [vmem:[#allocation3] sm:$0xcc] %v380_v38  ;;  %315 = vst [vmem:[#allocation3] sm:$0x33] %v304_v39  ;;  %v449_v44 = vrot.slane %v441_v40, 4  ;;  %v524_v45 = vrot.slane %v515_v41, 4 }
  0x96   : > { %1767 = vrot.lane.b32.xlu1 %v5461_v23, %s6914_s14  ;;  %1992 = vrot.lane.b32.xlu0 %v5442_v20, %s6912_s19  ;;  %s6939_s14 = smov 17  }
  0x97   : > { %v453_v46 = vsel %vm301_vm0, %v448_v43, %v449_v44  ;;  %v529_v47 = vsel %vm301_vm0, %v524_v45, %v525_v42 }
  0x98   : > { %v455_v48 = vsel %vm454_vm3, %v439_v29, %v453_v46  ;;  %v531_v49 = vsel %vm530_vm4, %v515_v41, %v529_v47  ;;  %v5524_v50 = vpop.permute.xlu1 %367  ;;  %v5526_v51 = vpop.permute.xlu0 %290  ;;  %v5267_v46 = vld [vmem:[%s5366_s20 + $0x10] ss:$0 sps:$4 sm:$0x33]  }
  0x99   : > { %466 = vst [vmem:[#allocation3 + $0x20] sm:$0x33] %v455_v48  ;;  %542 = vst [vmem:[#allocation3 + $0x20] sm:$0xcc] %v531_v49  ;;  %v375_v52 = vrot.slane %v5524_v50, 4  ;;  %v298_v53 = vrot.slane %v5526_v51, 4 }
  0x9a   : > { %1918 = vrot.lane.b32.xlu1 %v5461_v23, %s6910_s18  ;;  %1843 = vrot.lane.b32.xlu0 %v5470_v25, %s6951_s17  ;;  %s6950_s18 = smov 19   ;;  %v5321_v49 = vmov 0  }
  0x9b   : > { %v381_v54 = vsel %vm301_vm0, %v374_v32, %v375_v52  ;;  %v305_v55 = vsel %vm301_vm0, %v297_v35, %v298_v53  ;;  %199 = vst [vmem:[#allocation2] sm:$0xf] %v5321_v49  ;;  %200 = vst [vmem:[#allocation2 + $0x24] sm:$0xf] %v5321_v49  ;;  %2638 = vmatprep.mubr.bf16.mxu0 %v5321_v49  ;;  %2679 = vmatprep.mubr.bf16.mxu1 %v5321_v49 }
  0x9c   : > { %v382_v56 = vsel %vm379_vm1, %v366_v26, %v381_v54  ;;  %v306_v57 = vsel %vm303_vm2, %v289_v31, %v305_v55  ;;  %v5542_v58 = vpop.permute.xlu1 %518  ;;  %v5544_v59 = vpop.permute.xlu0 %442  ;;  %v2249_v6 = vld [vmem:[#allocation3] sm:$0xff] }
  0x9d   : > { %392 = vst [vmem:[#allocation3 + $0x8] sm:$0xcc] %v382_v56  ;;  %316 = vst [vmem:[#allocation3 + $0x8] sm:$0x33] %v306_v57  ;;  %v526_v60 = vrot.slane %v5542_v58, 4  ;;  %v450_v61 = vrot.slane %v5544_v59, 4 }
  0x9e   : > { %2065 = vrot.lane.b32.xlu1 %v5442_v20, %s6950_s18  ;;  %1994 = vrot.lane.b32.xlu0 %v5470_v25, %s6912_s19  ;;  %s5319_s19 = smov 18  }
  0x9f   : > { %v532_v62 = vsel %vm301_vm0, %v525_v42, %v526_v60  ;;  %v456_v63 = vsel %vm301_vm0, %v449_v44, %v450_v61 }
  0xa0   : > { %v533_v0 = vsel %vm530_vm4, %v517_v28, %v532_v62  ;;  %v457_v1 = vsel %vm454_vm3, %v441_v40, %v456_v63  ;;  %v5560_v2 = vpop.permute.xlu1 %591  ;;  %v590_v4 = vpop.permute.xlu0 %589  ;;  %v2253_v7 = vld [vmem:[#allocation3 + $0x20] sm:$0xff] }
  0xa1   : > { %543 = vst [vmem:[#allocation3 + $0x28] sm:$0xcc] %v533_v0  ;;  %467 = vst [vmem:[#allocation3 + $0x28] sm:$0x33] %v457_v1  ;;  %v600_v8 = vrot.slane %v5560_v2, 4  ;;  %v599_v9 = vrot.slane %v590_v4, 4  ;;  %v5018_v10 = vcombine.high %v2249_v6, %v2253_v7  ;;  %v5017_v11 = vcombine.low %v2249_v6, %v2253_v7 }
  0xa2   : > { %2141 = vrot.lane.b32.xlu1 %v5450_v21, %s5319_s19  ;;  %2067 = vrot.lane.b32.xlu0 %v5438_v19, %s6950_s18  ;;  %v362_v0 = vrot.slane %v5267_v46, %v5361_v5  ;;  %v5268_v1 = vld [vmem:[%s5366_s20 + $0x10] ss:$0 sps:$4 sm:$0x33]  }
  0xa3   : > { %v604_v13 = vsel %vm301_vm0, %v599_v9, %v600_v8  ;;  %2606 = vmatprep.subr.bf16.mxu0 %v5018_v10  ;;  %v5635_v6 = vld.sshfl [vmem:[%s5366_s20 + $0x10] sm:$0x3 pattern:$0x76325410] }
  0xa4   : > { %v606_v15 = vsel %vm605_vm5, %v590_v4, %v604_v13  ;;  %v668_v16 = vpop.permute.xlu1 %667  ;;  %2607 = vmatpush1.bf16.msra.mxu0 %v5017_v11  ;;  %v666_v18 = vpop.permute.xlu0 %665  ;;  %v2250_v30 = vld [vmem:[#allocation3 + $0x8] sm:$0xff] }
  0xa5   : > { %617 = vst [vmem:[#allocation3 + $0x40] sm:$0x33] %v606_v15  ;;  %v676_v24 = vrot.slane %v668_v16, 4  ;;  %v675_v26 = vrot.slane %v666_v18, 4 }
  0xa6   : > { %2216 = vrot.lane.b32.xlu1 %v5442_v20, %s6939_s14  ;;  %2143 = vrot.lane.b32.xlu0 %v5442_v20, %s5319_s19 }
  0xa7   : > { %v680_v21 = vsel %vm301_vm0, %v675_v26, %v676_v24 }
  0xa8   : > { %v682_v27 = vsel %vm681_vm6, %v666_v18, %v680_v21  ;;  %v743_v28 = vpop.permute.xlu1 %742  ;;  %v741_v29 = vpop.permute.xlu0 %740  ;;  %v2254_v31 = vld [vmem:[#allocation3 + $0x28] sm:$0xff]  ;;  %v513_v18 = vrot.slane %v5268_v1, %v5361_v5 }
  0xa9   : > { %693 = vst [vmem:[#allocation3 + $0x40] sm:$0xcc] %v682_v27  ;;  %v751_v32 = vrot.slane %v743_v28, 4  ;;  %v750_v33 = vrot.slane %v741_v29, 4  ;;  %v5020_v34 = vcombine.high %v2250_v30, %v2254_v31  ;;  %v5019_v35 = vcombine.low %v2250_v30, %v2254_v31 }
  0xaa   : > { %292 = vrot.lane.b32.xlu1 %v5576_v14, %s5296_s22  ;;  %2218 = vrot.lane.b32.xlu0 %v5438_v19, %s6939_s14 }
  0xab   : > { %v755_v20 = vsel %vm301_vm0, %v750_v33, %v751_v32  ;;  %2647 = vmatprep.subr.bf16.mxu1 %v5020_v34 }
  0xac   : > { %v757_v36 = vsel %vm756_vm7, %v741_v29, %v755_v20  ;;  %v819_v37 = vpop.permute.xlu1 %818  ;;  %2648 = vmatpush1.bf16.msra.mxu1 %v5019_v35  ;;  %v817_v38 = vpop.permute.xlu0 %816 }
  0xad   : > { %768 = vst [vmem:[#allocation3 + $0x60] sm:$0x33] %v757_v36  ;;  %v827_v39 = vrot.slane %v819_v37, 4  ;;  %v826_v40 = vrot.slane %v817_v38, 4 }
  0xae   : > { %444 = vrot.lane.b32.xlu1 %v5576_v14, %s5298_s24  ;;  %369 = vrot.lane.b32.xlu0 %v5397_v17, %s5295_s21 }
  0xaf   : > { %v831_v19 = vsel %vm301_vm0, %v826_v40, %v827_v39 }
  0xb0   : > { %v833_v41 = vsel %vm6942_vm8, %v817_v38, %v831_v19  ;;  %v5592_v42 = vpop.permute.xlu1 %669  ;;  %v5594_v43 = vpop.permute.xlu0 %593  ;;  %v2257_v10 = vld [vmem:[#allocation3 + $0x40] sm:$0xff] }
  0xb1   : > { %844 = vst [vmem:[#allocation3 + $0x60] sm:$0xcc] %v833_v41  ;;  %v677_v44 = vrot.slane %v5592_v42, 4  ;;  %v601_v45 = vrot.slane %v5594_v43, 4 }
  0xb2   : > { %2069 = vrot.lane.b32.xlu1 %v5461_v23, %s6950_s18  ;;  %520 = vrot.lane.b32.xlu0 %v5397_v17, %s5297_s23 }
  0xb3   : > { %v683_v47 = vsel %vm301_vm0, %v676_v24, %v677_v44  ;;  %v607_v48 = vsel %vm301_vm0, %v600_v8, %v601_v45 }
  0xb4   : > { %v684_v54 = vsel %vm681_vm6, %v668_v16, %v683_v47  ;;  %v608_v55 = vsel %vm605_vm5, %v5560_v2, %v607_v48  ;;  %v5616_v56 = vpop.permute.xlu1 %820  ;;  %v5618_v57 = vpop.permute.xlu0 %744 }
  0xb5   : > { %694 = vst [vmem:[#allocation3 + $0x48] sm:$0xcc] %v684_v54  ;;  %618 = vst [vmem:[#allocation3 + $0x48] sm:$0x33] %v608_v55  ;;  %v828_v62 = vrot.slane %v5616_v56, 4  ;;  %v752_v63 = vrot.slane %v5618_v57, 4 }
  0xb6   : > { %2220 = vrot.lane.b32.xlu1 %v5461_v23, %s6939_s14  ;;  %2145 = vrot.lane.b32.xlu0 %v5470_v25, %s5319_s19  ;;  %v5270_v55 = vld [vmem:[%s5366_s20 + $0x10] ss:$0 sps:$4 sm:$0x33]  }
  0xb7   : > { %v834_v2 = vsel %vm301_vm0, %v827_v39, %v828_v62  ;;  %v758_v4 = vsel %vm301_vm0, %v751_v32, %v752_v63  ;;  %v5269_v39 = vld [vmem:[%s5366_s20 + $0x10] ss:$0 sps:$4 sm:$0x33]  }
  0xb8   : > { %v835_v7 = vsel %vm6942_vm8, %v819_v37, %v834_v2  ;;  %v759_v8 = vsel %vm756_vm7, %v743_v28, %v758_v4  ;;  %v5639_v9 = vpop.permute.xlu1 %893  ;;  %v892_v25 = vpop.permute.xlu0 %891  ;;  %v2261_v11 = vld [vmem:[#allocation3 + $0x60] sm:$0xff]  ;;  %v664_v54 = vrot.slane %v5269_v39, %v5361_v5 }
  0xb9   : > { %845 = vst [vmem:[#allocation3 + $0x68] sm:$0xcc] %v835_v7  ;;  %769 = vst [vmem:[#allocation3 + $0x68] sm:$0x33] %v759_v8  ;;  %v902_v12 = vrot.slane %v5639_v9, 4  ;;  %v901_v13 = vrot.slane %v892_v25, 4  ;;  %v5026_v15 = vcombine.high %v2257_v10, %v2261_v11  ;;  %v5025_v16 = vcombine.low %v2257_v10, %v2261_v11 }
  0xba   : > { %371 = vrot.lane.b32.xlu1 %v362_v0, %s5295_s21  ;;  %294 = vrot.lane.b32.xlu0 %v5635_v6, %s5296_s22 }
  0xbb   : > { %v906_v24 = vsel %vm301_vm0, %v901_v13, %v902_v12  ;;  %2608 = vmatprep.subr.bf16.mxu0 %v5026_v15 }
  0xbc   : > { %v908_v26 = vsel %vm6945_vm9, %v892_v25, %v906_v24  ;;  %v970_v21 = vpop.permute.xlu1 %969  ;;  %2609 = vmatpush1.bf16.msra.mxu0 %v5025_v16  ;;  %v968_v27 = vpop.permute.xlu0 %967  ;;  %v2258_v34 = vld [vmem:[#allocation3 + $0x48] sm:$0xff]  ;;  %v815_v25 = vrot.slane %v5270_v55, %v5361_v5 }
  0xbd   : > { %919 = vst [vmem:[#allocation3 + $0x80] sm:$0x33] %v908_v26  ;;  %v978_v28 = vrot.slane %v970_v21, 4  ;;  %v977_v29 = vrot.slane %v968_v27, 4 }
  0xbe   : > { %522 = vrot.lane.b32.xlu1 %v513_v18, %s5297_s23  ;;  %446 = vrot.lane.b32.xlu0 %v5635_v6, %s5298_s24 }
  0xbf   : > { %v982_v30 = vsel %vm301_vm0, %v977_v29, %v978_v28 }
  0xc0   : > { %v984_v31 = vsel %vm6944_vm10, %v968_v27, %v982_v30  ;;  %v1045_v32 = vpop.permute.xlu1 %1044  ;;  %v1043_v33 = vpop.permute.xlu0 %1042  ;;  %v2262_v35 = vld [vmem:[#allocation3 + $0x68] sm:$0xff] }
  0xc1   : > { %995 = vst [vmem:[#allocation3 + $0x80] sm:$0xcc] %v984_v31  ;;  %v1053_v20 = vrot.slane %v1045_v32, 4  ;;  %v1052_v36 = vrot.slane %v1043_v33, 4  ;;  %v5028_v37 = vcombine.high %v2258_v34, %v2262_v35  ;;  %v5027_v38 = vcombine.low %v2258_v34, %v2262_v35 }
  0xc2   : > { %671 = vrot.lane.b32.xlu1 %v5397_v17, %s5300_s26  ;;  %595 = vrot.lane.b32.xlu0 %v5576_v14, %s5299_s25 }
  0xc3   : > { %v1057_v40 = vsel %vm301_vm0, %v1052_v36, %v1053_v20  ;;  %2649 = vmatprep.subr.bf16.mxu1 %v5028_v37 }
  0xc4   : > { %v1059_v19 = vsel %vm6919_vm11, %v1043_v33, %v1057_v40  ;;  %v1121_v41 = vpop.permute.xlu1 %1120  ;;  %2650 = vmatpush1.bf16.msra.mxu1 %v5027_v38  ;;  %v1119_v46 = vpop.permute.xlu0 %1118 }
  0xc5   : > { %1070 = vst [vmem:[#allocation3 + $0xa0] sm:$0x33] %v1059_v19  ;;  %v1129_v47 = vrot.slane %v1121_v41, 4  ;;  %v1128_v48 = vrot.slane %v1119_v46, 4 }
  0xc6   : > { %822 = vrot.lane.b32.xlu1 %v5397_v17, %s6948_s28  ;;  %746 = vrot.lane.b32.xlu0 %v5576_v14, %s5301_s27 }
  0xc7   : > { %v1133_v0 = vsel %vm301_vm0, %v1128_v48, %v1129_v47 }
  0xc8   : > { %v1135_v1 = vsel %vm6943_vm12, %v1119_v46, %v1133_v0  ;;  %v5668_v2 = vpop.permute.xlu1 %971  ;;  %v5670_v4 = vpop.permute.xlu0 %895  ;;  %v2265_v30 = vld [vmem:[#allocation3 + $0x80] sm:$0xff]  ;;  %v5272_v46 = vld [vmem:[%s5366_s20 + $0x10] ss:$0 sps:$4 sm:$0x33]  }
  0xc9   : > { %1146 = vst [vmem:[#allocation3 + $0xa0] sm:$0xcc] %v1135_v1  ;;  %v979_v7 = vrot.slane %v5668_v2, 4  ;;  %v903_v8 = vrot.slane %v5670_v4, 4 }
  0xca   : > { %673 = vrot.lane.b32.xlu1 %v664_v54, %s5300_s26  ;;  %597 = vrot.lane.b32.xlu0 %v5635_v6, %s5299_s25 }
  0xcb   : > { %v985_v10 = vsel %vm301_vm0, %v978_v28, %v979_v7  ;;  %v909_v11 = vsel %vm301_vm0, %v902_v12, %v903_v8 }
  0xcc   : > { %v986_v13 = vsel %vm6944_vm10, %v970_v21, %v985_v10  ;;  %v910_v15 = vsel %vm6945_vm9, %v5639_v9, %v909_v11  ;;  %v5687_v16 = vpop.permute.xlu1 %1122  ;;  %v5689_v18 = vpop.permute.xlu0 %1046 }
  0xcd   : > { %996 = vst [vmem:[#allocation3 + $0x88] sm:$0xcc] %v986_v13  ;;  %920 = vst [vmem:[#allocation3 + $0x88] sm:$0x33] %v910_v15  ;;  %v1130_v24 = vrot.slane %v5687_v16, 4  ;;  %v1054_v26 = vrot.slane %v5689_v18, 4 }
  0xce   : > { %824 = vrot.lane.b32.xlu1 %v815_v25, %s6948_s28  ;;  %748 = vrot.lane.b32.xlu0 %v5635_v6, %s5301_s27 }
  0xcf   : > { %v1136_v12 = vsel %vm301_vm0, %v1129_v47, %v1130_v24  ;;  %v1060_v9 = vsel %vm301_vm0, %v1053_v20, %v1054_v26  ;;  %v1226_v47 = vld [vmem:[%s5366_s20 + $0xa] sm:$0xff] }
  0xd0   : > { %v1137_v21 = vsel %vm6943_vm12, %v1121_v41, %v1136_v12  ;;  %v1061_v27 = vsel %vm6919_vm11, %v1045_v32, %v1060_v9  ;;  %v5704_v28 = vpop.permute.xlu1 %1195  ;;  %v1194_v29 = vpop.permute.xlu0 %1193  ;;  %v2269_v31 = vld [vmem:[#allocation3 + $0xa0] sm:$0xff]  ;;  %v5271_v32 = vld [vmem:[%s5366_s20 + $0x10] ss:$0 sps:$4 sm:$0x33]   ;;  %v1244_v54 = vcombine.low %v1226_v47, %v1226_v47  ;;  %v1288_v12 = vcombine.high %v5453_v22, %v5453_v22 }
  0xd1   : > { %1147 = vst [vmem:[#allocation3 + $0xa8] sm:$0xcc] %v1137_v21  ;;  %1071 = vst [vmem:[#allocation3 + $0xa8] sm:$0x33] %v1061_v27  ;;  %v1204_v33 = vrot.slane %v5704_v28, 4  ;;  %v1203_v34 = vrot.slane %v1194_v29, 4  ;;  %v5034_v35 = vcombine.high %v2265_v30, %v2269_v31  ;;  %v5033_v36 = vcombine.low %v2265_v30, %v2269_v31 }
  0xd2   : > { %973 = vrot.lane.b32.xlu1 %v5397_v17, %s5304_s30  ;;  %897 = vrot.lane.b32.xlu0 %v5576_v14, %s5303_s29  ;;  %v966_v41 = vrot.slane %v5271_v32, %v5361_v5  ;;  %5009 = vst.sshfl [vmem:[#allocation3 + $0xd8] sm:$0xf0 pattern:$0x76325410] %v1226_v47  ;;  %v1117_v9 = vrot.slane %v5272_v46, %v5361_v5  ;;  %vm6923_vm11 = vcmask 310272  }
  0xd3   : > { %v1208_v20 = vsel %vm301_vm0, %v1203_v34, %v1204_v33  ;;  %2610 = vmatprep.subr.bf16.mxu0 %v5034_v35  ;;  %5008 = vst.sshfl [vmem:[#allocation3 + $0xd0] sm:$0xf0 pattern:$0x76325410] %v1244_v54  ;;  %v5741_v34 = vrot.slane %v1288_v12, %v5361_v5 }
  0xd4   : > { %v1210_v37 = vsel %vm6916_vm13, %v1194_v29, %v1208_v20  ;;  %v1313_v38 = vpop.permute.xlu1 %1312  ;;  %2611 = vmatpush1.bf16.msra.mxu0 %v5033_v36  ;;  %v1311_v39 = vpop.permute.xlu0 %1310  ;;  %v2266_v25 = vld [vmem:[#allocation3 + $0x88] sm:$0xff] }
  0xd5   : > { %1221 = vst [vmem:[#allocation3 + $0xc0] sm:$0x33] %v1210_v37  ;;  %v1321_v40 = vrot.slane %v1313_v38, 4  ;;  %v1320_v19 = vrot.slane %v1311_v39, 4 }
  0xd6   : > { %1124 = vrot.lane.b32.xlu1 %v5397_v17, %s6924_s6  ;;  %1048 = vrot.lane.b32.xlu0 %v5576_v14, %s6926_s5 }
  0xd7   : > { %v1325_v48 = vsel %vm301_vm0, %v1320_v19, %v1321_v40 }
  0xd8   : > { %v1327_v55 = vsel %vm6918_vm14, %v1311_v39, %v1325_v48  ;;  %v1389_v0 = vpop.permute.xlu1 %1388  ;;  %v1387_v1 = vpop.permute.xlu0 %1386  ;;  %v2270_v10 = vld [vmem:[#allocation3 + $0xa8] sm:$0xff] }
  0xd9   : > { %1338 = vst [vmem:[#allocation3 + $0xe0] sm:$0x33] %v1327_v55  ;;  %v1397_v17 = vrot.slane %v1389_v0, 4  ;;  %v1396_v11 = vrot.slane %v1387_v1, 4  ;;  %v5036_v13 = vcombine.high %v2266_v25, %v2270_v10  ;;  %v5035_v15 = vcombine.low %v2266_v25, %v2270_v10 }
  0xda   : > { %975 = vrot.lane.b32.xlu1 %v966_v41, %s5304_s30  ;;  %899 = vrot.lane.b32.xlu0 %v5635_v6, %s5303_s29  ;;  %v5771_v25 = vld.sshfl [vmem:[%s5366_s20 + $0x12] sm:$0x3 pattern:$0x76325410] }
  0xdb   : > { %v1401_v21 = vsel %vm301_vm0, %v1396_v11, %v1397_v17  ;;  %2651 = vmatprep.subr.bf16.mxu1 %v5036_v13 }
  0xdc   : > { %v1403_v27 = vsel %vm6917_vm15, %v1387_v1, %v1401_v21  ;;  %v5731_v29 = vpop.permute.xlu1 %1314  ;;  %2652 = vmatpush1.bf16.msra.mxu1 %v5035_v15  ;;  %v5733_v30 = vpop.permute.xlu0 %1197  ;;  %v2273_v46 = vld [vmem:[#allocation3 + $0xc0] sm:$0xff] }
  0xdd   : > { %1414 = vst [vmem:[#allocation3 + $0xe0] sm:$0xcc] %v1403_v27  ;;  %v1322_v22 = vrot.slane %v5731_v29, 4  ;;  %v1205_v31 = vrot.slane %v5733_v30, 4 }
  0xde   : > { %1126 = vrot.lane.b32.xlu1 %v1117_v9, %s6924_s6  ;;  %1050 = vrot.lane.b32.xlu0 %v5635_v6, %s6926_s5  ;;  %s6991_s6 = smov 27   ;;  %s6992_s5 = smov 28  }
  0xdf   : > { %v1328_v35 = vsel %vm301_vm0, %v1321_v40, %v1322_v22  ;;  %v1211_v36 = vsel %vm301_vm0, %v1204_v33, %v1205_v31  ;;  %v5273_v40 = vld [vmem:[%s5366_s20 + $0x12] ss:$0 sps:$4 sm:$0x33]  }
  0xe0   : > { %v1329_v32 = vsel %vm6918_vm14, %v1313_v38, %v1328_v35  ;;  %v1212_v20 = vsel %vm6916_vm13, %v5704_v28, %v1211_v36  ;;  %v1462_v37 = vpop.permute.xlu1 %1461  ;;  %v5752_v39 = vpop.permute.xlu0 %1390  ;;  %vm6928_vm13 = vcmask 965632   ;;  %vm6920_vm14 = vcmask 318464  }
  0xe1   : > { %1339 = vst [vmem:[#allocation3 + $0xe8] sm:$0x33] %v1329_v32  ;;  %1222 = vst [vmem:[#allocation3 + $0xc8] sm:$0x33] %v1212_v20  ;;  %v1398_v19 = vrot.slane %v5752_v39, 4  ;;  %v1471_v48 = vrot.slane %v1462_v37, 4 }
  0xe2   : > { %1316 = vrot.lane.b32.xlu1 %v5741_v34, %s5308_s8  ;;  %1199 = vrot.lane.b32.xlu0 %v5576_v14, %s6921_s7  ;;  %v1385_v14 = vrot.slane %v5273_v40, %v5361_v5  ;;  %v5274_v40 = vld [vmem:[%s5366_s20 + $0x12] ss:$0 sps:$4 sm:$0x33]  }
  0xe3   : > { %v1404_v33 = vsel %vm301_vm0, %v1397_v17, %v1398_v19 }
  0xe4   : > { %v1405_v28 = vsel %vm6917_vm15, %v1389_v0, %v1404_v33  ;;  %v1538_v38 = vpop.permute.xlu1 %1537  ;;  %v1464_v41 = vpop.permute.xlu0 %1463  ;;  %v2277_v47 = vld [vmem:[#allocation3 + $0xe0] sm:$0xff]  ;;  %vm6930_vm15 = vcmask 957440  }
  0xe5   : > { %1415 = vst [vmem:[#allocation3 + $0xe8] sm:$0xcc] %v1405_v28  ;;  %v1472_v54 = vrot.slane %v1464_v41, 4  ;;  %v5042_v55 = vcombine.high %v2273_v46, %v2277_v47  ;;  %v5041_v1 = vcombine.low %v2273_v46, %v2277_v47  ;;  %v1547_v13 = vrot.slane %v1538_v38, 4 }
  0xe6   : > { %1201 = vrot.lane.b32.xlu1 %v5635_v6, %s6921_s7  ;;  %1392 = vrot.lane.b32.xlu0 %v5461_v23, %s5309_s9  ;;  %s6990_s7 = smov 37  }
  0xe7   : > { %v1476_v0 = vsel %vm301_vm0, %v1471_v48, %v1472_v54  ;;  %2612 = vmatprep.subr.bf16.mxu0 %v5042_v55 }
  0xe8   : > { %v1478_v10 = vsel %vm6928_vm13, %v1462_v37, %v1476_v0  ;;  %v1613_v17 = vpop.permute.xlu1 %1612  ;;  %2613 = vmatpush1.bf16.msra.mxu0 %v5041_v1  ;;  %v1540_v11 = vpop.permute.xlu0 %1539  ;;  %v2274_v27 = vld [vmem:[#allocation3 + $0xc8] sm:$0xff]  ;;  %v1536_v1 = vrot.slane %v5274_v40, %v5361_v5 }
  0xe9   : > { %1489 = vst [vmem:[#allocation3 + $0x100] sm:$0x33] %v1478_v10  ;;  %v1548_v15 = vrot.slane %v1540_v11, 4  ;;  %v1622_v36 = vrot.slane %v1613_v17, 4 }
  0xea   : > { %1394 = vrot.lane.b32.xlu1 %v1385_v14, %s5309_s9  ;;  %1318 = vrot.lane.b32.xlu0 %v5771_v25, %s5308_s8  ;;  %v5275_v14 = vld [vmem:[%s5366_s20 + $0x12] ss:$0 sps:$4 sm:$0x33]  }
  0xeb   : > { %v1552_v6 = vsel %vm301_vm0, %v1547_v13, %v1548_v15 }
  0xec   : > { %v1554_v12 = vsel %vm6930_vm15, %v1538_v38, %v1552_v6  ;;  %v1689_v9 = vpop.permute.xlu1 %1688  ;;  %v1615_v21 = vpop.permute.xlu0 %1614  ;;  %v2278_v35 = vld [vmem:[#allocation3 + $0xe8] sm:$0xff] }
  0xed   : > { %1565 = vst [vmem:[#allocation3 + $0x100] sm:$0xcc] %v1554_v12  ;;  %v1623_v32 = vrot.slane %v1615_v21, 4  ;;  %v5044_v20 = vcombine.high %v2274_v27, %v2278_v35  ;;  %v5043_v37 = vcombine.low %v2274_v27, %v2278_v35  ;;  %v1698_v47 = vrot.slane %v1689_v9, 4 }
  0xee   : > { %1543 = vrot.lane.b32.xlu1 %v5461_v23, %s5311_s11  ;;  %1467 = vrot.lane.b32.xlu0 %v5741_v34, %s5310_s10 }
  0xef   : > { %v1627_v33 = vsel %vm301_vm0, %v1622_v36, %v1623_v32  ;;  %2653 = vmatprep.subr.bf16.mxu1 %v5044_v20 }
  0xf0   : > { %v1629_v28 = vsel %vm6920_vm14, %v1613_v17, %v1627_v33  ;;  %v5786_v38 = vpop.permute.xlu1 %1465  ;;  %2654 = vmatpush1.bf16.msra.mxu1 %v5043_v37  ;;  %v1691_v46 = vpop.permute.xlu0 %1690 }
  0xf1   : > { %1640 = vst [vmem:[#allocation3 + $0x120] sm:$0x33] %v1629_v28  ;;  %v1473_v48 = vrot.slane %v5786_v38, 4  ;;  %v1699_v55 = vrot.slane %v1691_v46, 4 }
  0xf2   : > { %1694 = vrot.lane.b32.xlu1 %v5461_v23, %s6952_s13  ;;  %1618 = vrot.lane.b32.xlu0 %v5741_v34, %s5312_s12 }
  0xf3   : > { %v1479_v0 = vsel %vm301_vm0, %v1472_v54, %v1473_v48  ;;  %v1703_v10 = vsel %vm301_vm0, %v1698_v47, %v1699_v55  ;;  %v1687_v54 = vrot.slane %v5275_v14, %v5361_v5 }
  0xf4   : > { %v1480_v17 = vsel %vm6928_vm13, %v1464_v41, %v1479_v0  ;;  %v1705_v13 = vsel %vm6923_vm11, %v1689_v9, %v1703_v10  ;;  %v5801_v6 = vpop.permute.xlu1 %1616  ;;  %v5803_v12 = vpop.permute.xlu0 %1541  ;;  %v2281_v28 = vld [vmem:[#allocation3 + $0x100] sm:$0xff]  ;;  %vm6931_vm13 = vcmask 228352  }
  0xf5   : > { %1490 = vst [vmem:[#allocation3 + $0x108] sm:$0x33] %v1480_v17  ;;  %1716 = vst [vmem:[#allocation3 + $0x120] sm:$0xcc] %v1705_v13  ;;  %v6929_v27 = vrot.slane %v5801_v6, 4  ;;  %v1549_v35 = vrot.slane %v5803_v12, 4 }
  0xf6   : > { %1545 = vrot.lane.b32.xlu1 %v1536_v1, %s5311_s11  ;;  %1469 = vrot.lane.b32.xlu0 %v5771_v25, %s5310_s10 }
  0xf7   : > { %v1630_v41 = vsel %vm301_vm0, %v1623_v32, %v6929_v27  ;;  %v1555_v9 = vsel %vm301_vm0, %v1548_v15, %v1549_v35 }
  0xf8   : > { %v1631_v36 = vsel %vm6920_vm14, %v1615_v21, %v1630_v41  ;;  %v1556_v20 = vsel %vm6930_vm15, %v1540_v11, %v1555_v9  ;;  %v1764_v37 = vpop.permute.xlu1 %1763  ;;  %v5819_v40 = vpop.permute.xlu0 %1692  ;;  %vm6934_vm14 = vcmask 302080   ;;  %vm6933_vm15 = vcmask 220160  }
  0xf9   : > { %1641 = vst [vmem:[#allocation3 + $0x128] sm:$0x33] %v1631_v36  ;;  %1566 = vst [vmem:[#allocation3 + $0x108] sm:$0xcc] %v1556_v20  ;;  %v1700_v33 = vrot.slane %v5819_v40, 4  ;;  %v1773_v1 = vrot.slane %v1764_v37, 4 }
  0xfa   : > { %1696 = vrot.lane.b32.xlu1 %v1687_v54, %s6952_s13  ;;  %1620 = vrot.lane.b32.xlu0 %v5771_v25, %s5312_s12  ;;  %v5277_v20 = vld [vmem:[%s5366_s20 + $0x12] ss:$0 sps:$4 sm:$0x33]  }
  0xfb   : > { %v1706_v15 = vsel %vm301_vm0, %v1699_v55, %v1700_v33  ;;  %v5276_v55 = vld [vmem:[%s5366_s20 + $0x12] ss:$0 sps:$4 sm:$0x33]  }
  0xfc   : > { %v1707_v21 = vsel %vm6923_vm11, %v1691_v46, %v1706_v15  ;;  %v1840_v11 = vpop.permute.xlu1 %1839  ;;  %v1766_v32 = vpop.permute.xlu0 %1765  ;;  %v2285_v47 = vld [vmem:[#allocation3 + $0x120] sm:$0xff]  ;;  %vm6937_vm11 = vcmask 236544   ;;  %v1838_v36 = vrot.slane %v5276_v55, %v5361_v5  ;;  %v1989_v55 = vrot.slane %v5277_v20, %v5361_v5 }
  0xfd   : > { %1717 = vst [vmem:[#allocation3 + $0x128] sm:$0xcc] %v1707_v21  ;;  %v1774_v14 = vrot.slane %v1766_v32, 4  ;;  %v5050_v0 = vcombine.high %v2281_v28, %v2285_v47  ;;  %v5049_v10 = vcombine.low %v2281_v28, %v2285_v47  ;;  %v1849_v41 = vrot.slane %v1840_v11, 4 }
  0xfe   : > { %1845 = vrot.lane.b32.xlu1 %v5461_v23, %s6951_s17  ;;  %1769 = vrot.lane.b32.xlu0 %v5741_v34, %s6990_s7 }
  0xff   : > { %v1778_v46 = vsel %vm301_vm0, %v1773_v1, %v1774_v14  ;;  %2614 = vmatprep.subr.bf16.mxu0 %v5050_v0 }
 0x100   : > { %v1780_v17 = vsel %vm6934_vm14, %v1764_v37, %v1778_v46  ;;  %v1915_v13 = vpop.permute.xlu1 %1914  ;;  %2615 = vmatpush1.bf16.msra.mxu0 %v5049_v10  ;;  %v1842_v54 = vpop.permute.xlu0 %1841  ;;  %v2282_v47 = vld [vmem:[#allocation3 + $0x108] sm:$0xff] }
 0x101   : > { %1791 = vst [vmem:[#allocation3 + $0x140] sm:$0x33] %v1780_v17  ;;  %v1850_v9 = vrot.slane %v1842_v54, 4  ;;  %v1924_v0 = vrot.slane %v1915_v13, 4 }
 0x102   : > { %1996 = vrot.lane.b32.xlu1 %v5461_v23, %s6991_s6  ;;  %1920 = vrot.lane.b32.xlu0 %v5741_v34, %s6992_s5 }
 0x103   : > { %v1854_v15 = vsel %vm301_vm0, %v1849_v41, %v1850_v9 }
 0x104   : > { %v1856_v37 = vsel %vm6937_vm11, %v1840_v11, %v1854_v15  ;;  %v1991_v21 = vpop.permute.xlu1 %1990  ;;  %v1917_v28 = vpop.permute.xlu0 %1916  ;;  %v2286_v1 = vld [vmem:[#allocation3 + $0x128] sm:$0xff] }
 0x105   : > { %1867 = vst [vmem:[#allocation3 + $0x140] sm:$0xcc] %v1856_v37  ;;  %v1925_v10 = vrot.slane %v1917_v28, 4  ;;  %v5052_v46 = vcombine.high %v2282_v47, %v2286_v1  ;;  %v5051_v17 = vcombine.low %v2282_v47, %v2286_v1  ;;  %v2000_v37 = vrot.slane %v1991_v21, 4 }
 0x106   : > { %1847 = vrot.lane.b32.xlu1 %v1838_v36, %s6951_s17  ;;  %1771 = vrot.lane.b32.xlu0 %v5771_v25, %s6990_s7 }
 0x107   : > { %v1929_v41 = vsel %vm301_vm0, %v1924_v0, %v1925_v10  ;;  %2655 = vmatprep.subr.bf16.mxu1 %v5052_v46 }
 0x108   : > { %v1931_v11 = vsel %vm6931_vm13, %v1915_v13, %v1929_v41  ;;  %v5850_v15 = vpop.permute.xlu1 %1767  ;;  %2656 = vmatpush1.bf16.msra.mxu1 %v5051_v17  ;;  %v1993_v27 = vpop.permute.xlu0 %1992 }
 0x109   : > { %1942 = vst [vmem:[#allocation3 + $0x160] sm:$0x33] %v1931_v11  ;;  %v6936_v47 = vrot.slane %v5850_v15, 4  ;;  %v2001_v36 = vrot.slane %v1993_v27, 4 }
 0x10a   : > { %1998 = vrot.lane.b32.xlu1 %v1989_v55, %s6991_s6  ;;  %1922 = vrot.lane.b32.xlu0 %v5771_v25, %s6992_s5 }
 0x10b   : > { %v1781_v13 = vsel %vm301_vm0, %v1774_v14, %v6936_v47  ;;  %v2005_v20 = vsel %vm301_vm0, %v2000_v37, %v2001_v36  ;;  %v5278_v14 = vld [vmem:[%s5366_s20 + $0x12] ss:$0 sps:$4 sm:$0x33]   ;;  %s7026_s20 = smov 9  }
 0x10c   : > { %v1782_v1 = vsel %vm6934_vm14, %v1766_v32, %v1781_v13  ;;  %v2007_v0 = vsel %vm6933_vm15, %v1991_v21, %v2005_v20  ;;  %v5862_v46 = vpop.permute.xlu1 %1918  ;;  %v5864_v17 = vpop.permute.xlu0 %1843  ;;  %vm6946_vm14 = vcmask 138240  }
 0x10d   : > { %1792 = vst [vmem:[#allocation3 + $0x148] sm:$0x33] %v1782_v1  ;;  %2018 = vst [vmem:[#allocation3 + $0x160] sm:$0xcc] %v2007_v0  ;;  %v6932_v55 = vrot.slane %v5862_v46, 4  ;;  %v1851_v41 = vrot.slane %v5864_v17, 4 }
 0x10e   : > { %2147 = vrot.lane.b32.xlu1 %v5461_v23, %s5319_s19  ;;  %2071 = vrot.lane.b32.xlu0 %v5741_v34, %s6950_s18  ;;  %v2289_v0 = vld [vmem:[#allocation3 + $0x140] sm:$0xff] }
 0x10f   : > { %v1932_v32 = vsel %vm301_vm0, %v1925_v10, %v6932_v55  ;;  %v1857_v21 = vsel %vm301_vm0, %v1850_v9, %v1851_v41  ;;  %v2140_v10 = vrot.slane %v5278_v14, %v5361_v5 }
 0x110   : > { %v1933_v11 = vsel %vm6931_vm13, %v1917_v28, %v1932_v32  ;;  %v1858_v37 = vsel %vm6937_vm11, %v1842_v54, %v1857_v21  ;;  %v2066_v13 = vpop.permute.xlu1 %2065  ;;  %v5881_v20 = vpop.permute.xlu0 %1994  ;;  %vm6941_vm13 = vcmask 154624   ;;  %vm2581_vm11 = vcmask 1045504  }
 0x111   : > { %1943 = vst [vmem:[#allocation3 + $0x168] sm:$0x33] %v1933_v11  ;;  %1868 = vst [vmem:[#allocation3 + $0x148] sm:$0xcc] %v1858_v37  ;;  %v6935_v23 = vrot.slane %v5881_v20, 4  ;;  %v2075_v21 = vrot.slane %v2066_v13, 4 }
 0x112   : > { %2073 = vrot.lane.b32.xlu1 %v5771_v25, %s6950_s18  ;;  %2222 = vrot.lane.b32.xlu0 %v5741_v34, %s6939_s14 }
 0x113   : > { %v2008_v9 = vsel %vm301_vm0, %v2001_v36, %v6935_v23 }
 0x114   : > { %v2009_v54 = vsel %vm6933_vm15, %v1993_v27, %v2008_v9  ;;  %v2142_v28 = vpop.permute.xlu1 %2141  ;;  %v2068_v1 = vpop.permute.xlu0 %2067  ;;  %v2293_v32 = vld [vmem:[#allocation3 + $0x160] sm:$0xff]  ;;  %vm6947_vm15 = vcmask 146432  }
 0x115   : > { %2019 = vst [vmem:[#allocation3 + $0x168] sm:$0xcc] %v2009_v54  ;;  %v2076_v11 = vrot.slane %v2068_v1, 4  ;;  %v5058_v37 = vcombine.high %v2289_v0, %v2293_v32  ;;  %v5057_v55 = vcombine.low %v2289_v0, %v2293_v32  ;;  %v2151_v14 = vrot.slane %v2142_v28, 4 }
 0x116   : > { %2224 = vrot.lane.b32.xlu1 %v5771_v25, %s6939_s14  ;;  %2149 = vrot.lane.b32.xlu0 %v2140_v10, %s5319_s19  ;;  %s7025_s14 = smov 10  }
 0x117   : > { %v2080_v5 = vsel %vm301_vm0, %v2075_v21, %v2076_v11  ;;  %2616 = vmatprep.subr.bf16.mxu0 %v5058_v37 }
 0x118   : > { %v2082_v34 = vsel %vm6941_vm13, %v2066_v13, %v2080_v5  ;;  %v2217_v27 = vpop.permute.xlu1 %2216  ;;  %2617 = vmatpush1.bf16.msra.mxu0 %v5057_v55  ;;  %v2144_v36 = vpop.permute.xlu0 %2143  ;;  %v2290_v21 = vld [vmem:[#allocation3 + $0x148] sm:$0xff] }
 0x119   : > { %2093 = vst [vmem:[#allocation3 + $0x180] sm:$0x33] %v2082_v34  ;;  %v2152_v9 = vrot.slane %v2144_v36, 4  ;;  %v2226_v0 = vrot.slane %v2217_v27, 4 }
 0x11b   : > { %v2156_v54 = vsel %vm301_vm0, %v2151_v14, %v2152_v9 }
 0x11c   : > { %v2158_v32 = vsel %vm6947_vm15, %v2142_v28, %v2156_v54  ;;  %v5900_v25 = vpop.permute.xlu1 %292  ;;  %v2219_v10 = vpop.permute.xlu0 %2218  ;;  %v2294_v37 = vld [vmem:[#allocation3 + $0x168] sm:$0xff] }
 0x11d   : > { %2169 = vst [vmem:[#allocation3 + $0x180] sm:$0xcc] %v2158_v32  ;;  %v299_v13 = vrot.slane %v5900_v25, 4  ;;  %v2227_v55 = vrot.slane %v2219_v10, 4  ;;  %v5060_v5 = vcombine.high %v2290_v21, %v2294_v37  ;;  %v5059_v23 = vcombine.low %v2290_v21, %v2294_v37 }
 0x11f   : > { %v307_v34 = vsel %vm301_vm0, %v298_v53, %v299_v13  ;;  %v2231_v14 = vsel %vm301_vm0, %v2226_v0, %v2227_v55  ;;  %2657 = vmatprep.subr.bf16.mxu1 %v5060_v5 }
 0x120   : > { %v308_v28 = vsel %vm303_vm2, %v5526_v51, %v307_v34  ;;  %v2233_v54 = vsel %vm6946_vm14, %v2217_v27, %v2231_v14  ;;  %v5910_v47 = vpop.permute.xlu1 %444  ;;  %2658 = vmatpush1.bf16.msra.mxu1 %v5059_v23  ;;  %v370_v32 = vpop.permute.xlu0 %369 }
 0x121   : > { %317 = vst [vmem:[#allocation3 + $0x10] sm:$0x33] %v308_v28  ;;  %2244 = vst [vmem:[#allocation3 + $0x1a0] sm:$0x33] %v2233_v54  ;;  %v451_v21 = vrot.slane %v5910_v47, 4  ;;  %v376_v37 = vrot.slane %v370_v32, 4 }
 0x123   : > { %v458_v53 = vsel %vm301_vm0, %v450_v61, %v451_v21  ;;  %v383_v0 = vsel %vm301_vm0, %v375_v52, %v376_v37 }
 0x124   : > { %v459_v51 = vsel %vm454_vm3, %v5544_v59, %v458_v53  ;;  %v384_v23 = vsel %vm379_vm1, %v5524_v50, %v383_v0  ;;  %v5923_v27 = vpop.permute.xlu1 %2069  ;;  %v521_v5 = vpop.permute.xlu0 %520  ;;  %v2297_v53 = vld [vmem:[#allocation3 + $0x180] sm:$0xff] }
 0x125   : > { %468 = vst [vmem:[#allocation3 + $0x30] sm:$0x33] %v459_v51  ;;  %393 = vst [vmem:[#allocation3 + $0x10] sm:$0xcc] %v384_v23  ;;  %v6938_v34 = vrot.slane %v5923_v27, 4  ;;  %v527_v14 = vrot.slane %v521_v5, 4 }
 0x127   : > { %v2083_v61 = vsel %vm301_vm0, %v2076_v11, %v6938_v34  ;;  %v534_v52 = vsel %vm301_vm0, %v526_v60, %v527_v14 }
 0x128   : > { %v2084_v59 = vsel %vm6941_vm13, %v2068_v1, %v2083_v61  ;;  %v535_v50 = vsel %vm530_vm4, %v5542_v58, %v534_v52  ;;  %v5935_v28 = vpop.permute.xlu1 %2220  ;;  %v5937_v54 = vpop.permute.xlu0 %2145  ;;  %v2301_v0 = vld [vmem:[#allocation3 + $0x1a0] sm:$0x33]  ;;  %vm2577_vm13 = vcmask 883712  }
 0x129   : > { %2094 = vst [vmem:[#allocation3 + $0x188] sm:$0x33] %v2084_v59  ;;  %544 = vst [vmem:[#allocation3 + $0x30] sm:$0xcc] %v535_v50  ;;  %v2228_v11 = vrot.slane %v5935_v28, 4  ;;  %v2153_v51 = vrot.slane %v5937_v54, 4  ;;  %v5066_v23 = vcombine.high %v2297_v53, %v2301_v0  ;;  %v5065_v60 = vcombine.low %v2297_v53, %v2301_v0 }
 0x12a   : > { %v5954_v53 = vld [vmem:[%s6906_s1] sm:$0xf] }
 0x12b   : > { %v2234_v1 = vsel %vm301_vm0, %v2227_v55, %v2228_v11  ;;  %v2159_v58 = vsel %vm301_vm0, %v2152_v9, %v2153_v51  ;;  %5073 = vmatprep.subr.msk.bf16.mxu0 %vm2581_vm11, %v5066_v23  ;;  %v2583_v61 = vsel %vm2581_vm11, %v5065_v60, 0 }
 0x12c   : > { %v2235_v52 = vsel %vm6946_vm14, %v2219_v10, %v2234_v1  ;;  %v2160_v59 = vsel %vm6947_vm15, %v2144_v36, %v2159_v58  ;;  %v372_v50 = vpop.permute.xlu1 %371  ;;  %2619 = vmatpush1.bf16.msra.mxu0 %v2583_v61  ;;  %v295_v34 = vpop.permute.xlu0 %294  ;;  %v2251_v58 = vld [vmem:[#allocation3 + $0x10] sm:$0xff] }
 0x12d   : > { %2245 = vst [vmem:[#allocation3 + $0x1a8] sm:$0x33] %v2235_v52  ;;  %2170 = vst [vmem:[#allocation3 + $0x188] sm:$0xcc] %v2160_v59  ;;  %v377_v9 = vrot.slane %v372_v50, 4  ;;  %v300_v55 = vrot.slane %v295_v34, 4 }
 0x12f   : > { %v385_v0 = vsel %vm301_vm0, %v376_v37, %v377_v9  ;;  %v309_v23 = vsel %vm301_vm0, %v299_v13, %v300_v55  ;;  %5074 = vmatmul.mubr.msk.bf16.vlgmr.msra.gmra.mrb[0].mxu0 %vm2577_vm13, %v5954_v53 }
 0x130   : > { %v386_v36 = vsel %vm379_vm1, %v370_v32, %v385_v0  ;;  %v310_v10 = vsel %vm303_vm2, %v5900_v25, %v309_v23  ;;  %v523_v60 = vpop.permute.xlu1 %522  ;;  %v447_v1 = vpop.permute.xlu0 %446  ;;  %v2255_v61 = vld [vmem:[#allocation3 + $0x30] sm:$0xff]  ;;  %2720 = vmatprep.mubr.bf16.mxu0 %v5321_v49 }
 0x131   : > { %394 = vst [vmem:[#allocation3 + $0x18] sm:$0xcc] %v386_v36  ;;  %318 = vst [vmem:[#allocation3 + $0x18] sm:$0x33] %v310_v10  ;;  %v528_v34 = vrot.slane %v523_v60, 4  ;;  %v452_v37 = vrot.slane %v447_v1, 4  ;;  %v5021_v52 = vcombine.low %v2251_v58, %v2255_v61  ;;  %v5022_v13 = vcombine.high %v2251_v58, %v2255_v61 }
 0x133   : > { %v536_v59 = vsel %vm301_vm0, %v527_v14, %v528_v34  ;;  %v460_v50 = vsel %vm301_vm0, %v451_v21, %v452_v37  ;;  %2688 = vmatprep.subr.bf16.mxu0 %v5022_v13 }
 0x134   : > { %v537_v32 = vsel %vm530_vm4, %v521_v5, %v536_v59  ;;  %v461_v25 = vsel %vm454_vm3, %v5910_v47, %v460_v50  ;;  %v672_v9 = vpop.permute.xlu1 %671  ;;  %2689 = vmatpush1.bf16.msra.mxu0 %v5021_v52  ;;  %v596_v55 = vpop.permute.xlu0 %595  ;;  %v2298_v0 = vld [vmem:[#allocation3 + $0x188] sm:$0xff] }
 0x135   : > { %v2302_v23 = vld [vmem:[#allocation3 + $0x1a8] sm:$0x33]  ;;  %545 = vst [vmem:[#allocation3 + $0x38] sm:$0xcc] %v537_v32  ;;  %469 = vst [vmem:[#allocation3 + $0x38] sm:$0x33] %v461_v25 }
 0x136   : > { %v678_v36 = vrot.slane %v672_v9, 4  ;;  %v602_v10 = vrot.slane %v596_v55, 4  ;;  %v5068_v60 = vcombine.high %v2298_v0, %v2302_v23  ;;  %v5067_v1 = vcombine.low %v2298_v0, %v2302_v23 }
 0x138   : > { %v685_v21 = vsel %vm301_vm0, %v677_v44, %v678_v36  ;;  %v609_v5 = vsel %vm301_vm0, %v601_v45, %v602_v10  ;;  %5075 = vmatprep.subr.msk.bf16.mxu1 %vm2581_vm11, %v5068_v60  ;;  %v2589_v47 = vsel %vm2581_vm11, %v5067_v1, 0  ;;  %v823_v61 = vpop.permute.xlu1 %822  ;;  %v747_v34 = vpop.permute.xlu0 %746  ;;  %v2252_v50 = vld [vmem:[#allocation3 + $0x18] sm:$0xff] }
 0x139   : > { %v686_v14 = vsel %vm681_vm6, %v5592_v42, %v685_v21  ;;  %v610_v58 = vsel %vm605_vm5, %v5594_v43, %v609_v5  ;;  %2660 = vmatpush1.bf16.msra.mxu1 %v2589_v47  ;;  %v829_v44 = vrot.slane %v823_v61, 4  ;;  %v753_v37 = vrot.slane %v747_v34, 4 }
 0x13a   : > { %695 = vst [vmem:[#allocation3 + $0x50] sm:$0xcc] %v686_v14  ;;  %619 = vst [vmem:[#allocation3 + $0x50] sm:$0x33] %v610_v58 }
 0x13b   : > { %v836_v45 = vsel %vm301_vm0, %v828_v62, %v829_v44  ;;  %v760_v52 = vsel %vm301_vm0, %v752_v63, %v753_v37 }
 0x13c   : > { %5076 = vmatmul.mubr.msk.bf16.vlgmr.msra.gmra.mrb[0].mxu1 %vm2577_vm13, %v5954_v53  ;;  %v837_v42 = vsel %vm6942_vm8, %v5616_v56, %v836_v45  ;;  %v761_v43 = vsel %vm756_vm7, %v5618_v57, %v760_v52  ;;  %v674_v13 = vpop.permute.xlu1 %673  ;;  %v598_v59 = vpop.permute.xlu0 %597  ;;  %v2256_v32 = vld [vmem:[#allocation3 + $0x38] sm:$0xff] }
 0x13d   : > { %2761 = vmatprep.mubr.bf16.mxu1 %v5321_v49  ;;  %846 = vst [vmem:[#allocation3 + $0x70] sm:$0xcc] %v837_v42  ;;  %770 = vst [vmem:[#allocation3 + $0x70] sm:$0x33] %v761_v43  ;;  %v679_v62 = vrot.slane %v674_v13, 4  ;;  %v603_v25 = vrot.slane %v598_v59, 4  ;;  %v5023_v63 = vcombine.low %v2252_v50, %v2256_v32  ;;  %v5024_v0 = vcombine.high %v2252_v50, %v2256_v32 }
 0x13f   : > { %v687_v23 = vsel %vm301_vm0, %v678_v36, %v679_v62  ;;  %v611_v60 = vsel %vm301_vm0, %v602_v10, %v603_v25  ;;  %2729 = vmatprep.subr.bf16.mxu1 %v5024_v0 }
 0x140   : > { %v688_v56 = vsel %vm681_vm6, %v672_v9, %v687_v23  ;;  %v612_v57 = vsel %vm605_vm5, %v596_v55, %v611_v60  ;;  %v825_v1 = vpop.permute.xlu1 %824  ;;  %2730 = vmatpush1.bf16.msra.mxu1 %v5023_v63  ;;  %v749_v21 = vpop.permute.xlu0 %748 }
 0x141   : > { %696 = vst [vmem:[#allocation3 + $0x58] sm:$0xcc] %v688_v56  ;;  %620 = vst [vmem:[#allocation3 + $0x58] sm:$0x33] %v612_v57  ;;  %v830_v49 = vrot.slane %v825_v1, 4  ;;  %v754_v5 = vrot.slane %v749_v21, 4 }
 0x142   : > { %v2259_v9 = vld [vmem:[#allocation3 + $0x50] sm:$0xff] }
 0x143   : > { %v838_v47 = vsel %vm301_vm0, %v829_v44, %v830_v49  ;;  %v762_v14 = vsel %vm301_vm0, %v753_v37, %v754_v5 }
 0x144   : > { %v839_v36 = vsel %vm6942_vm8, %v823_v61, %v838_v47  ;;  %v763_v10 = vsel %vm756_vm7, %v747_v34, %v762_v14  ;;  %v974_v58 = vpop.permute.xlu1 %973  ;;  %v898_v45 = vpop.permute.xlu0 %897  ;;  %v2263_v52 = vld [vmem:[#allocation3 + $0x70] sm:$0xff]  ;;  %vm6993_vm8 = vcmask 80896  }
 0x145   : > { %847 = vst [vmem:[#allocation3 + $0x78] sm:$0xcc] %v839_v36  ;;  %771 = vst [vmem:[#allocation3 + $0x78] sm:$0x33] %v763_v10  ;;  %v980_v55 = vrot.slane %v974_v58, 4  ;;  %v904_v42 = vrot.slane %v898_v45, 4  ;;  %v5029_v43 = vcombine.low %v2259_v9, %v2263_v52  ;;  %v5030_v13 = vcombine.high %v2259_v9, %v2263_v52 }
 0x147   : > { %v987_v44 = vsel %vm301_vm0, %v979_v7, %v980_v55  ;;  %v911_v61 = vsel %vm301_vm0, %v903_v8, %v904_v42  ;;  %2690 = vmatprep.subr.bf16.mxu0 %v5030_v13 }
 0x148   : > { %v988_v34 = vsel %vm6944_vm10, %v5668_v2, %v987_v44  ;;  %v912_v37 = vsel %vm6945_vm9, %v5670_v4, %v911_v61  ;;  %v1125_v59 = vpop.permute.xlu1 %1124  ;;  %2691 = vmatpush1.bf16.msra.mxu0 %v5029_v43  ;;  %v1049_v50 = vpop.permute.xlu0 %1048  ;;  %v2260_v0 = vld [vmem:[#allocation3 + $0x58] sm:$0xff] }
 0x149   : > { %997 = vst [vmem:[#allocation3 + $0x90] sm:$0xcc] %v988_v34  ;;  %921 = vst [vmem:[#allocation3 + $0x90] sm:$0x33] %v912_v37  ;;  %v1131_v32 = vrot.slane %v1125_v59, 4  ;;  %v1055_v62 = vrot.slane %v1049_v50, 4 }
 0x14b   : > { %v1138_v7 = vsel %vm301_vm0, %v1130_v24, %v1131_v32  ;;  %v1062_v8 = vsel %vm301_vm0, %v1054_v26, %v1055_v62 }
 0x14c   : > { %v1139_v2 = vsel %vm6943_vm12, %v5687_v16, %v1138_v7  ;;  %v1063_v4 = vsel %vm6993_vm8, %v5689_v18, %v1062_v8  ;;  %v976_v25 = vpop.permute.xlu1 %975  ;;  %v900_v63 = vpop.permute.xlu0 %899  ;;  %v2264_v23 = vld [vmem:[#allocation3 + $0x78] sm:$0xff] }
 0x14d   : > { %1148 = vst [vmem:[#allocation3 + $0xb0] sm:$0xcc] %v1139_v2  ;;  %1072 = vst [vmem:[#allocation3 + $0xb0] sm:$0x33] %v1063_v4  ;;  %v981_v60 = vrot.slane %v976_v25, 4  ;;  %v905_v56 = vrot.slane %v900_v63, 4  ;;  %v5031_v57 = vcombine.low %v2260_v0, %v2264_v23  ;;  %v5032_v24 = vcombine.high %v2260_v0, %v2264_v23 }
 0x14f   : > { %v989_v1 = vsel %vm301_vm0, %v980_v55, %v981_v60  ;;  %v913_v26 = vsel %vm301_vm0, %v904_v42, %v905_v56  ;;  %2731 = vmatprep.subr.bf16.mxu1 %v5032_v24 }
 0x150   : > { %v990_v16 = vsel %vm6944_vm10, %v974_v58, %v989_v1  ;;  %v914_v21 = vsel %vm6945_vm9, %v898_v45, %v913_v26  ;;  %v1127_v18 = vpop.permute.xlu1 %1126  ;;  %2732 = vmatpush1.bf16.msra.mxu1 %v5031_v57  ;;  %v1051_v49 = vpop.permute.xlu0 %1050  ;;  %v2267_v58 = vld [vmem:[#allocation3 + $0x90] sm:$0xff]  ;;  %vm7008_vm9 = vcmask 318464  }
 0x151   : > { %998 = vst [vmem:[#allocation3 + $0x98] sm:$0xcc] %v990_v16  ;;  %922 = vst [vmem:[#allocation3 + $0x98] sm:$0x33] %v914_v21  ;;  %v1132_v5 = vrot.slane %v1127_v18, 4  ;;  %v1056_v47 = vrot.slane %v1051_v49, 4 }
 0x153   : > { %v1140_v14 = vsel %vm301_vm0, %v1131_v32, %v1132_v5  ;;  %v1064_v36 = vsel %vm301_vm0, %v1055_v62, %v1056_v47 }
 0x154   : > { %v1141_v10 = vsel %vm6943_vm12, %v1125_v59, %v1140_v14  ;;  %v1065_v9 = vsel %vm6993_vm8, %v1049_v50, %v1064_v36  ;;  %v1317_v52 = vpop.permute.xlu1 %1316  ;;  %v1200_v55 = vpop.permute.xlu0 %1199  ;;  %v2271_v42 = vld [vmem:[#allocation3 + $0xb0] sm:$0xff]  ;;  %vm6994_vm8 = vcmask 1039360   ;;  %vm6995_vm12 = vcmask 7168  }
 0x155   : > { %1149 = vst [vmem:[#allocation3 + $0xb8] sm:$0xcc] %v1141_v10  ;;  %1073 = vst [vmem:[#allocation3 + $0xb8] sm:$0x33] %v1065_v9  ;;  %v1323_v45 = vrot.slane %v1317_v52, 4  ;;  %v1206_v43 = vrot.slane %v1200_v55, 4  ;;  %v5037_v13 = vcombine.low %v2267_v58, %v2271_v42  ;;  %v5038_v44 = vcombine.high %v2267_v58, %v2271_v42 }
 0x156   : > { %vm6996_vm10 = vmmov %vm6995_vm12  ;;  %v7002_v58 = vrot.slane %v5801_v6, 4 }
 0x157   : > { %v1330_v61 = vsel %vm301_vm0, %v1322_v22, %v1323_v45  ;;  %v1213_v34 = vsel %vm301_vm0, %v1205_v31, %v1206_v43  ;;  %2692 = vmatprep.subr.bf16.mxu0 %v5038_v44 }
 0x158   : > { %v1331_v37 = vsel %vm6994_vm8, %v5731_v29, %v1330_v61  ;;  %v1214_v59 = vsel %vm6995_vm12, %v5733_v30, %v1213_v34  ;;  %v1202_v50 = vpop.permute.xlu1 %1201  ;;  %2693 = vmatpush1.bf16.msra.mxu0 %v5037_v13  ;;  %v1393_v32 = vpop.permute.xlu0 %1392  ;;  %vm6997_vm8 = vcmask 973824   ;;  %v2268_v4 = vld [vmem:[#allocation3 + $0x98] sm:$0xff] }
 0x159   : > { %1340 = vst [vmem:[#allocation3 + $0xf0] sm:$0x33] %v1331_v37  ;;  %1223 = vst [vmem:[#allocation3 + $0xd0] sm:$0x33] %v1214_v59  ;;  %v1207_v62 = vrot.slane %v1202_v50, 4  ;;  %v1399_v7 = vrot.slane %v1393_v32, 4 }
 0x15a   : > { %vm6998_vm12 = vmmov %vm6997_vm8 }
 0x15b   : > { %v1215_v22 = vsel %vm301_vm0, %v1206_v43, %v1207_v62  ;;  %v1406_v31 = vsel %vm301_vm0, %v1398_v19, %v1399_v7 }
 0x15c   : > { %v1216_v8 = vsel %vm6996_vm10, %v1200_v55, %v1215_v22  ;;  %v1407_v29 = vsel %vm6997_vm8, %v5752_v39, %v1406_v31  ;;  %v1395_v2 = vpop.permute.xlu1 %1394  ;;  %v1319_v30 = vpop.permute.xlu0 %1318  ;;  %v2272_v25 = vld [vmem:[#allocation3 + $0xb8] sm:$0xff]  ;;  %vm6999_vm10 = vcmask 1039360   ;;  %vm7000_vm8 = vcmask 957440  }
 0x15d   : > { %1224 = vst [vmem:[#allocation3 + $0xd8] sm:$0x33] %v1216_v8  ;;  %1416 = vst [vmem:[#allocation3 + $0xf0] sm:$0xcc] %v1407_v29  ;;  %v1400_v63 = vrot.slane %v1395_v2, 4  ;;  %v1324_v0 = vrot.slane %v1319_v30, 4  ;;  %v5039_v23 = vcombine.low %v2268_v4, %v2272_v25  ;;  %v5040_v60 = vcombine.high %v2268_v4, %v2272_v25 }
 0x15f   : > { %v1408_v56 = vsel %vm301_vm0, %v1399_v7, %v1400_v63  ;;  %v1332_v57 = vsel %vm301_vm0, %v1323_v45, %v1324_v0  ;;  %2733 = vmatprep.subr.bf16.mxu1 %v5040_v60 }
 0x160   : > { %v1409_v19 = vsel %vm6998_vm12, %v1393_v32, %v1408_v56  ;;  %v1333_v24 = vsel %vm6999_vm10, %v1317_v52, %v1332_v57  ;;  %v1544_v39 = vpop.permute.xlu1 %1543  ;;  %2734 = vmatpush1.bf16.msra.mxu1 %v5039_v23  ;;  %v1468_v1 = vpop.permute.xlu0 %1467  ;;  %vm7001_vm12 = vcmask 965632   ;;  %v2275_v36 = vld [vmem:[#allocation3 + $0xd0] sm:$0xff]  ;;  %vm7003_vm10 = vcmask 310272  }
 0x161   : > { %1417 = vst [vmem:[#allocation3 + $0xf8] sm:$0xcc] %v1409_v19  ;;  %1341 = vst [vmem:[#allocation3 + $0xf8] sm:$0x33] %v1333_v24  ;;  %v1550_v26 = vrot.slane %v1544_v39, 4  ;;  %v1474_v16 = vrot.slane %v1468_v1, 4 }
 0x162   : > { %v7009_v19 = vrot.slane %v5850_v15, 4 }
 0x163   : > { %v1557_v21 = vsel %vm301_vm0, %v1549_v35, %v1550_v26  ;;  %v1481_v18 = vsel %vm301_vm0, %v1473_v48, %v1474_v16 }
 0x164   : > { %v1558_v49 = vsel %vm7000_vm8, %v5803_v12, %v1557_v21  ;;  %v1482_v5 = vsel %vm7001_vm12, %v5786_v38, %v1481_v18  ;;  %v1695_v47 = vpop.permute.xlu1 %1694  ;;  %v1619_v14 = vpop.permute.xlu0 %1618  ;;  %v2279_v10 = vld [vmem:[#allocation3 + $0xf0] sm:$0xff]  ;;  %vm7004_vm8 = vcmask 318464   ;;  %v2276_v13 = vld [vmem:[#allocation3 + $0xd8] sm:$0xff]  ;;  %vm7005_vm12 = vcmask 957440  }
 0x165   : > { %1567 = vst [vmem:[#allocation3 + $0x110] sm:$0xcc] %v1558_v49  ;;  %1491 = vst [vmem:[#allocation3 + $0x110] sm:$0x33] %v1482_v5  ;;  %v1701_v9 = vrot.slane %v1695_v47, 4  ;;  %v1625_v52 = vrot.slane %v1619_v14, 4  ;;  %v5045_v55 = vcombine.low %v2275_v36, %v2279_v10  ;;  %v5046_v35 = vcombine.high %v2275_v36, %v2279_v10 }
 0x166   : > { %v7013_v5 = vrot.slane %v5862_v46, 4 }
 0x167   : > { %v1708_v48 = vsel %vm301_vm0, %v1700_v33, %v1701_v9  ;;  %v1632_v12 = vsel %vm301_vm0, %v7002_v58, %v1625_v52  ;;  %2694 = vmatprep.subr.bf16.mxu0 %v5046_v35 }
 0x168   : > { %v1709_v38 = vsel %vm7003_vm10, %v5819_v40, %v1708_v48  ;;  %v1633_v42 = vsel %vm7004_vm8, %v5801_v6, %v1632_v12  ;;  %v1546_v45 = vpop.permute.xlu1 %1545  ;;  %2695 = vmatpush1.bf16.msra.mxu0 %v5045_v55  ;;  %v1470_v43 = vpop.permute.xlu0 %1469  ;;  %v2280_v44 = vld [vmem:[#allocation3 + $0xf8] sm:$0xff]  ;;  %vm7006_vm10 = vcmask 965632   ;;  %vm7007_vm8 = vcmask 310272  }
 0x169   : > { %1718 = vst [vmem:[#allocation3 + $0x130] sm:$0xcc] %v1709_v38  ;;  %1642 = vst [vmem:[#allocation3 + $0x130] sm:$0x33] %v1633_v42  ;;  %v1551_v61 = vrot.slane %v1546_v45, 4  ;;  %v1475_v33 = vrot.slane %v1470_v43, 4  ;;  %v5047_v34 = vcombine.low %v2276_v13, %v2280_v44  ;;  %v5048_v37 = vcombine.high %v2276_v13, %v2280_v44 }
 0x16b   : > { %v1559_v59 = vsel %vm301_vm0, %v1550_v26, %v1551_v61  ;;  %v1483_v50 = vsel %vm301_vm0, %v1474_v16, %v1475_v33  ;;  %2735 = vmatprep.subr.bf16.mxu1 %v5048_v37 }
 0x16c   : > { %v1560_v40 = vsel %vm7005_vm12, %v1544_v39, %v1559_v59  ;;  %v1484_v6 = vsel %vm7006_vm10, %v1468_v1, %v1483_v50  ;;  %v1697_v32 = vpop.permute.xlu1 %1696  ;;  %2736 = vmatpush1.bf16.msra.mxu1 %v5047_v34  ;;  %v1621_v62 = vpop.permute.xlu0 %1620  ;;  %v2283_v25 = vld [vmem:[#allocation3 + $0x110] sm:$0xff]  ;;  %vm7011_vm12 = vcmask 302080   ;;  %vm7014_vm10 = vcmask 220160  }
 0x16d   : > { %1568 = vst [vmem:[#allocation3 + $0x118] sm:$0xcc] %v1560_v40  ;;  %1492 = vst [vmem:[#allocation3 + $0x118] sm:$0x33] %v1484_v6  ;;  %v1702_v7 = vrot.slane %v1697_v32, 4  ;;  %v1626_v22 = vrot.slane %v1621_v62, 4 }
 0x16f   : > { %v1710_v31 = vsel %vm301_vm0, %v1701_v9, %v1702_v7  ;;  %v1634_v8 = vsel %vm301_vm0, %v1625_v52, %v1626_v22  ;;  %v7016_v22 = vrot.slane %v5923_v27, 4 }
 0x170   : > { %v1711_v29 = vsel %vm7007_vm8, %v1695_v47, %v1710_v31  ;;  %v1635_v2 = vsel %vm7008_vm9, %v1619_v14, %v1634_v8  ;;  %v1846_v30 = vpop.permute.xlu1 %1845  ;;  %v1770_v4 = vpop.permute.xlu0 %1769  ;;  %v2287_v63 = vld [vmem:[#allocation3 + $0x130] sm:$0xff]  ;;  %vm7010_vm9 = vcmask 236544   ;;  %vm7015_vm8 = vcmask 228352  }
 0x171   : > { %1719 = vst [vmem:[#allocation3 + $0x138] sm:$0xcc] %v1711_v29  ;;  %1643 = vst [vmem:[#allocation3 + $0x138] sm:$0x33] %v1635_v2  ;;  %v1852_v0 = vrot.slane %v1846_v30, 4  ;;  %v1776_v23 = vrot.slane %v1770_v4, 4  ;;  %v5053_v60 = vcombine.low %v2283_v25, %v2287_v63  ;;  %v5054_v56 = vcombine.high %v2283_v25, %v2287_v63 }
 0x173   : > { %v1859_v57 = vsel %vm301_vm0, %v1851_v41, %v1852_v0  ;;  %v1783_v24 = vsel %vm301_vm0, %v7009_v19, %v1776_v23  ;;  %2696 = vmatprep.subr.bf16.mxu0 %v5054_v56  ;;  %v7012_v41 = vrot.slane %v5881_v20, 4 }
 0x174   : > { %v1860_v39 = vsel %vm7010_vm9, %v5864_v17, %v1859_v57  ;;  %v1784_v1 = vsel %vm7011_vm12, %v5850_v15, %v1783_v24  ;;  %v1997_v26 = vpop.permute.xlu1 %1996  ;;  %2697 = vmatpush1.bf16.msra.mxu0 %v5053_v60  ;;  %v1921_v16 = vpop.permute.xlu0 %1920  ;;  %v2284_v10 = vld [vmem:[#allocation3 + $0x118] sm:$0xff] }
 0x175   : > { %1869 = vst [vmem:[#allocation3 + $0x150] sm:$0xcc] %v1860_v39  ;;  %1793 = vst [vmem:[#allocation3 + $0x150] sm:$0x33] %v1784_v1  ;;  %v2003_v21 = vrot.slane %v1997_v26, 4  ;;  %v1927_v18 = vrot.slane %v1921_v16, 4 }
 0x177   : > { %v2010_v49 = vsel %vm301_vm0, %v7012_v41, %v2003_v21  ;;  %v1934_v47 = vsel %vm301_vm0, %v7013_v5, %v1927_v18 }
 0x178   : > { %v2011_v17 = vsel %vm7014_vm10, %v5881_v20, %v2010_v49  ;;  %v1935_v15 = vsel %vm7015_vm8, %v5862_v46, %v1934_v47  ;;  %v1848_v14 = vpop.permute.xlu1 %1847  ;;  %v1772_v36 = vpop.permute.xlu0 %1771  ;;  %v2288_v9 = vld [vmem:[#allocation3 + $0x138] sm:$0xff] }
 0x179   : > { %2020 = vst [vmem:[#allocation3 + $0x170] sm:$0xcc] %v2011_v17  ;;  %1944 = vst [vmem:[#allocation3 + $0x170] sm:$0x33] %v1935_v15  ;;  %v1853_v52 = vrot.slane %v1848_v14, 4  ;;  %v1777_v55 = vrot.slane %v1772_v36, 4  ;;  %v5055_v35 = vcombine.low %v2284_v10, %v2288_v9  ;;  %v5056_v48 = vcombine.high %v2284_v10, %v2288_v9 }
 0x17a   : > { %v3478_v36 = vld [vmem:[#allocation2 + $0x24] sm:$0xf]  ;;  %v205_v9 = vsub.s32 0, %v5357_v3 }
 0x17b   : > { %v1861_v58 = vsel %vm301_vm0, %v1852_v0, %v1853_v52  ;;  %v1785_v12 = vsel %vm301_vm0, %v1776_v23, %v1777_v55  ;;  %2737 = vmatprep.subr.bf16.mxu1 %v5056_v48  ;;  %3492 = vrot.lane.b32.xlu1 %v3478_v36, %s5309_s9  ;;  %v3560_v10 = vld [vmem:[#allocation2 + $0x24] sm:$0xf] }
 0x17c   : > { %v1862_v20 = vsel %vm7010_vm9, %v1846_v30, %v1861_v58  ;;  %v1786_v38 = vsel %vm7011_vm12, %v1770_v4, %v1785_v12  ;;  %v1999_v46 = vpop.permute.xlu1 %1998  ;;  %2738 = vmatpush1.bf16.msra.mxu1 %v5055_v35  ;;  %v1923_v42 = vpop.permute.xlu0 %1922  ;;  %v2291_v59 = vld [vmem:[#allocation3 + $0x150] sm:$0xff]  ;;  %vm7017_vm9 = vcmask 154624   ;;  %v3642_v52 = vld [vmem:[#allocation2 + $0x24] sm:$0xf]  ;;  %v209_v35 = vsub.s32 1, %v5357_v3 }
 0x17d   : > { %1870 = vst [vmem:[#allocation3 + $0x158] sm:$0xcc] %v1862_v20  ;;  %1794 = vst [vmem:[#allocation3 + $0x158] sm:$0x33] %v1786_v38  ;;  %v2004_v45 = vrot.slane %v1999_v46, 4  ;;  %v1928_v43 = vrot.slane %v1923_v42, 4 }
 0x17e   : > { %vm7018_vm12 = vmmov %vm7017_vm9  ;;  %v201_v55 = vld [vmem:[%s6908_s3] sm:$0xff] }
 0x17f   : > { %v2012_v13 = vsel %vm301_vm0, %v2003_v21, %v2004_v45  ;;  %v1936_v44 = vsel %vm301_vm0, %v1927_v18, %v1928_v43  ;;  %3574 = vrot.lane.b32.xlu1 %v3560_v10, %s5311_s11  ;;  %v6144_v48 = vrot.slane %v201_v55, %v205_v9  ;;  %v6146_v58 = vrot.slane %v201_v55, %v209_v35  ;;  %v3806_v46 = vld [vmem:[#allocation2 + $0x24] sm:$0xf] }
 0x180   : > { %v2013_v61 = vsel %vm7014_vm10, %v1997_v26, %v2012_v13  ;;  %v1937_v33 = vsel %vm7015_vm8, %v1921_v16, %v1936_v44  ;;  %v2148_v34 = vpop.permute.xlu1 %2147  ;;  %v2072_v37 = vpop.permute.xlu0 %2071  ;;  %v2295_v50 = vld [vmem:[#allocation3 + $0x170] sm:$0xff]  ;;  %v213_v44 = vsub.s32 2, %v5357_v3 }
 0x181   : > { %2021 = vst [vmem:[#allocation3 + $0x178] sm:$0xcc] %v2013_v61  ;;  %1945 = vst [vmem:[#allocation3 + $0x178] sm:$0x33] %v1937_v33  ;;  %v2154_v40 = vrot.slane %v2148_v34, 4  ;;  %v2078_v6 = vrot.slane %v2072_v37, 4  ;;  %v5061_v32 = vcombine.low %v2291_v59, %v2295_v50  ;;  %v5062_v62 = vcombine.high %v2291_v59, %v2295_v50 }
 0x182   : > { %v217_v61 = vsub.s32 3, %v5357_v3  ;;  %v6154_v33 = vrot.slane %v201_v55, %v213_v44 }
 0x183   : > { %v2161_v7 = vsel %vm301_vm0, %v2153_v51, %v2154_v40  ;;  %v2085_v31 = vsel %vm301_vm0, %v7016_v22, %v2078_v6  ;;  %2698 = vmatprep.subr.bf16.mxu0 %v5062_v62  ;;  %3656 = vrot.lane.b32.xlu1 %v3642_v52, %s6952_s13  ;;  %v221_v22 = vsub.s32 4, %v5357_v3 }
 0x184   : > { %v2162_v8 = vsel %vm6947_vm15, %v5937_v54, %v2161_v7  ;;  %v2086_v29 = vsel %vm7017_vm9, %v5923_v27, %v2085_v31  ;;  %v2074_v2 = vpop.permute.xlu1 %2073  ;;  %2699 = vmatpush1.bf16.msra.mxu0 %v5061_v32  ;;  %v2223_v30 = vpop.permute.xlu0 %2222  ;;  %v2292_v60 = vld [vmem:[#allocation3 + $0x158] sm:$0xff]  ;;  %7019 = vst [vmem:[#allocation5_spill] sm:$0xff] %v6154_v33  ;;  %v225_v31 = vsub.s32 5, %v5357_v3 }
 0x185   : > { %2171 = vst [vmem:[#allocation3 + $0x190] sm:$0xcc] %v2162_v8  ;;  %2095 = vst [vmem:[#allocation3 + $0x190] sm:$0x33] %v2086_v29  ;;  %v2079_v4 = vrot.slane %v2074_v2, 4  ;;  %v2229_v25 = vrot.slane %v2223_v30, 4  ;;  %v6162_v8 = vrot.slane %v201_v55, %v221_v22 }
 0x186   : > { %v229_v29 = vsub.s32 6, %v5357_v3  ;;  %v6165_v2 = vrot.slane %v201_v55, %v225_v31  ;;  %v3683_v22 = vld [vmem:[#allocation2 + $0x24] sm:$0xf] }
 0x187   : > { %v2087_v51 = vsel %vm301_vm0, %v2078_v6, %v2079_v4  ;;  %v2236_v63 = vsel %vm301_vm0, %v2228_v11, %v2229_v25  ;;  %7021 = vst [vmem:[#allocation7_spill] sm:$0xff] %v6162_v8  ;;  %v3765_v31 = vld [vmem:[#allocation2 + $0x24] sm:$0xf] }
 0x188   : > { %v2088_v0 = vsel %vm7018_vm12, %v2072_v37, %v2087_v51  ;;  %v2237_v54 = vsel %vm6946_vm14, %v5935_v28, %v2236_v63  ;;  %v2225_v23 = vpop.permute.xlu1 %2224  ;;  %v2150_v27 = vpop.permute.xlu0 %2149  ;;  %v2296_v56 = vld [vmem:[#allocation3 + $0x178] sm:$0xff]  ;;  %7022 = vst [vmem:[#allocation8_spill] sm:$0xff] %v6165_v2  ;;  %v6169_v63 = vrot.slane %v201_v55, %v229_v29 }
 0x189   : > { %2096 = vst [vmem:[#allocation3 + $0x198] sm:$0x33] %v2088_v0  ;;  %2246 = vst [vmem:[#allocation3 + $0x1b0] sm:$0x33] %v2237_v54  ;;  %v2230_v57 = vrot.slane %v2225_v23, 4  ;;  %v2155_v19 = vrot.slane %v2150_v27, 4  ;;  %v5063_v24 = vcombine.low %v2292_v60, %v2296_v56  ;;  %v5064_v39 = vcombine.high %v2292_v60, %v2296_v56 }
 0x18a   : > { %7023 = vst [vmem:[#allocation9_spill] sm:$0xff] %v6169_v63  ;;  %v3847_v29 = vld [vmem:[#allocation2 + $0x24] sm:$0xf] }
 0x18b   : > { %v2238_v1 = vsel %vm301_vm0, %v2229_v25, %v2230_v57  ;;  %v2163_v26 = vsel %vm301_vm0, %v2154_v40, %v2155_v19  ;;  %2739 = vmatprep.subr.bf16.mxu1 %v5064_v39 }
 0x18c   : > { %v2239_v11 = vsel %vm6946_vm14, %v2223_v30, %v2238_v1  ;;  %v2164_v16 = vsel %vm6947_vm15, %v2148_v34, %v2163_v26  ;;  %2740 = vmatpush1.bf16.msra.mxu1 %v5063_v24  ;;  %v2299_v28 = vld [vmem:[#allocation3 + $0x190] sm:$0xff]  ;;  %v6156_v34 = vrot.slane %v201_v55, %v217_v61  ;;  %v233_v30 = vsub.s32 7, %v5357_v3 }
 0x18d   : > { %2247 = vst [vmem:[#allocation3 + $0x1b8] sm:$0x33] %v2239_v11  ;;  %2172 = vst [vmem:[#allocation3 + $0x198] sm:$0xcc] %v2164_v16 }
 0x18e   : > { %7020 = vst [vmem:[#allocation6_spill] sm:$0xff] %v6156_v34  ;;  %v6172_v23 = vrot.slane %v201_v55, %v233_v30 }
 0x190   : > { %v2303_v21 = vld [vmem:[#allocation3 + $0x1b0] sm:$0x33]  ;;  %7024 = vst [vmem:[#allocation10_spill] sm:$0xff] %v6172_v23 }
 0x191   : > { %v5070_v18 = vcombine.high %v2299_v28, %v2303_v21  ;;  %v5069_v41 = vcombine.low %v2299_v28, %v2303_v21 }
 0x193   : > { %5077 = vmatprep.subr.msk.bf16.mxu0 %vm2581_vm11, %v5070_v18  ;;  %v2595_v49 = vsel %vm2581_vm11, %v5069_v41, 0 }
 0x194   : > { %2701 = vmatpush1.bf16.msra.mxu0 %v2595_v49  ;;  %v2300_v5 = vld [vmem:[#allocation3 + $0x198] sm:$0xff] }
 0x195   : > { %v2304_v47 = vld [vmem:[#allocation3 + $0x1b8] sm:$0x33] }
 0x196   : > { %v5072_v17 = vcombine.high %v2300_v5, %v2304_v47  ;;  %v5071_v15 = vcombine.low %v2300_v5, %v2304_v47 }
 0x197   : > { %5078 = vmatmul.mubr.msk.bf16.vlgmr.msra.gmra.mrb[4].mxu0 %vm2577_vm13, %v5954_v53 }
 0x198   : > { %5079 = vmatprep.subr.msk.bf16.mxu1 %vm2581_vm11, %v5072_v17  ;;  %v2601_v14 = vsel %vm2581_vm11, %v5071_v15, 0 }
 0x199   : > { %2742 = vmatpush1.bf16.msra.mxu1 %v2601_v14 }
 0x19c   : > { %5080 = vmatmul.mubr.msk.bf16.vlgmr.msra.gmra.mrb[4].mxu1 %vm2577_vm13, %v5954_v53  ;;  %v3724_v53 = vld [vmem:[#allocation2 + $0x24] sm:$0xf] }
 0x19d   : > { %3738 = vrot.lane.b32.xlu1 %v3724_v53, %s6951_s17 }
 0x1a1   : > { %3820 = vrot.lane.b32.xlu1 %v3806_v46, %s6991_s6 }
 0x1ed   : > { %v6190_v30 = vpop.permute.xlu1 %3492 }
 0x202   : > { %v2640_v12 = vpop.f32.mrb[0].mxu0 }
 0x203   : > { %v2770_v20 = vmul.f32 %v2640_v12, %v6144_v48  ;;  %v2642_v38 = vpop.f32.mrb[1].mxu0 }
 0x204   : > { %v2771_v42 = vmul.f32 %v2642_v38, %v6146_v58  ;;  %v2644_v45 = vpop.f32.mrb[2].mxu0 }
 0x205   : > { %v2645_v43 = vpop.f32.mrb[3].mxu0 }
 0x206   : > { %v2778_v13 = vadd.f32 %v2771_v42, %v2770_v20 }
 0x20f   : > { %v2681_v37 = vpop.f32.mrb[0].mxu1 }
 0x210   : > { %v2772_v59 = vmul.f32 %v2681_v37, %v6154_v33  ;;  %v2683_v50 = vpop.f32.mrb[1].mxu1 }
 0x211   : > { %v2773_v40 = vmul.f32 %v2683_v50, %v6156_v34  ;;  %v2685_v6 = vpop.f32.mrb[2].mxu1 }
 0x212   : > { %v2779_v32 = vadd.f32 %v2778_v13, %v2772_v59  ;;  %v2686_v62 = vpop.f32.mrb[3].mxu1 }
 0x213   : > { %v3519_v62 = vld [vmem:[#allocation2 + $0x24] sm:$0xf] }
 0x214   : > { %v2780_v7 = vadd.f32 %v2779_v32, %v2773_v40  ;;  %v3437_v32 = vld [vmem:[#allocation2 + $0x24] sm:$0xf] }
 0x26a   : > { %v2722_v4 = vpop.f32.mrb[4].mxu0 }
 0x26b   : > { %v2774_v25 = vmul.f32 %v2722_v4, %v6162_v8  ;;  %v2724_v51 = vpop.f32.mrb[5].mxu0 }
 0x26c   : > { %v2775_v0 = vmul.f32 %v2724_v51, %v6165_v2  ;;  %v2726_v54 = vpop.f32.mrb[6].mxu0 }
 0x26d   : > { %v2781_v27 = vadd.f32 %v2780_v7, %v2774_v25  ;;  %v2727_v60 = vpop.f32.mrb[7].mxu0  ;;  %v3601_v7 = vld [vmem:[#allocation2 + $0x24] sm:$0xf] }
 0x26f   : > { %v2763_v56 = vpop.f32.mrb[4].mxu1  ;;  %v2782_v57 = vadd.f32 %v2781_v27, %v2775_v0 }
 0x270   : > { %v2776_v19 = vmul.f32 %v2763_v56, %v6169_v63  ;;  %v2765_v24 = vpop.f32.mrb[5].mxu1 }
 0x271   : > { %v2777_v3 = vmul.f32 %v2765_v24, %v6172_v23  ;;  %v2767_v39 = vpop.f32.mrb[6].mxu1 }
 0x272   : > { %v2783_v1 = vadd.f32 %v2782_v57, %v2776_v19  ;;  %v2768_v26 = vpop.f32.mrb[7].mxu1 }
 0x274   : > { %v2784_v11 = vadd.f32 %v2783_v1, %v2777_v3 }
 0x276   : > { %2785 = vadd.xlane.f32.xlu0 %v2784_v11 }
 0x28c   : > { %3451 = vrot.lane.b32.xlu0 %v3437_v32, %s5308_s8 }
 0x290   : > { %3533 = vrot.lane.b32.xlu0 %v3519_v62, %s5310_s10 }
 0x294   : > { %3615 = vrot.lane.b32.xlu0 %v3601_v7, %s5312_s12 }
 0x298   : > { %3697 = vrot.lane.b32.xlu0 %v3683_v22, %s6990_s7 }
 0x29c   : > { %3779 = vrot.lane.b32.xlu0 %v3765_v31, %s6992_s5 }
 0x2a0   : > { %3861 = vrot.lane.b32.xlu0 %v3847_v29, %s6950_s18 }
 0x303   : > { %v2786_v16 = vpop.xlane.xlu0 %2785 }
 0x304   : > { %v2787_v28 = vmul.f32 0.001953125, %v2786_v16 }
 0x306   : > { %v2788_v21 = vsub.f32 %v2640_v12, %v2787_v28  ;;  %v2789_v18 = vsub.f32 %v2642_v38, %v2787_v28  ;;  %v2790_v41 = vsub.f32 %v2681_v37, %v2787_v28  ;;  %v2791_v49 = vsub.f32 %v2683_v50, %v2787_v28 }
 0x307   : > { %v2792_v5 = vsub.f32 %v2722_v4, %v2787_v28  ;;  %v2793_v14 = vsub.f32 %v2724_v51, %v2787_v28  ;;  %v2794_v52 = vsub.f32 %v2763_v56, %v2787_v28  ;;  %v2795_v12 = vsub.f32 %v2765_v24, %v2787_v28  ;;  %v6192_v4 = vpop.permute.xlu1 %3574 }
 0x308   : > { %v2796_v47 = vmul.f32 %v2788_v21, %v6144_v48  ;;  %v2797_v17 = vmul.f32 %v2789_v18, %v6146_v58  ;;  %v2798_v15 = vmul.f32 %v2790_v41, %v6154_v33  ;;  %v2799_v36 = vmul.f32 %v2791_v49, %v6156_v34 }
 0x309   : > { %v2800_v55 = vmul.f32 %v2792_v5, %v6162_v8  ;;  %v2801_v20 = vmul.f32 %v2793_v14, %v6165_v2  ;;  %v2802_v42 = vmul.f32 %v2794_v52, %v6169_v63  ;;  %v2803_v13 = vmul.f32 %v2795_v12, %v6172_v23 }
 0x30a   : > { %v2804_v10 = vmul.f32 %v2796_v47, %v2796_v47  ;;  %v2805_v9 = vmul.f32 %v2797_v17, %v2797_v17  ;;  %v2806_v35 = vmul.f32 %v2798_v15, %v2798_v15  ;;  %v2807_v38 = vmul.f32 %v2799_v36, %v2799_v36 }
 0x30b   : > { %v2808_v45 = vmul.f32 %v2800_v55, %v2800_v55  ;;  %v2809_v44 = vmul.f32 %v2801_v20, %v2801_v20  ;;  %v2810_v37 = vmul.f32 %v2802_v42, %v2802_v42  ;;  %v2811_v50 = vmul.f32 %v2803_v13, %v2803_v13  ;;  %v6194_v25 = vpop.permute.xlu1 %3656 }
 0x30c   : > { %v2812_v53 = vadd.f32 %v2805_v9, %v2804_v10 }
 0x30e   : > { %v2813_v46 = vadd.f32 %v2812_v53, %v2806_v35 }
 0x30f   : > { %v6196_v51 = vpop.permute.xlu1 %3738 }
 0x310   : > { %v2814_v43 = vadd.f32 %v2813_v46, %v2807_v38 }
 0x312   : > { %v2815_v61 = vadd.f32 %v2814_v43, %v2808_v45  ;;  %v6253_v45 = vpop.permute.xlu0 %3451 }
 0x313   : > { %v6198_v0 = vpop.permute.xlu1 %3820 }
 0x314   : > { %v2816_v59 = vadd.f32 %v2815_v61, %v2809_v44 }
 0x316   : > { %v2817_v40 = vadd.f32 %v2816_v59, %v2810_v37  ;;  %v6261_v43 = vpop.permute.xlu0 %3533 }
 0x318   : > { %v2818_v6 = vadd.f32 %v2817_v40, %v2811_v50 }
 0x31a   : > { %2819 = vadd.xlane.f32.xlu1 %v2818_v6 }
 0x3a7   : > { %v2820_v54 = vpop.xlane.xlu1 %2819 }
 0x3a8   : > { %v2821_v27 = vmul.f32 0.001953125, %v2820_v54 }
 0x3aa   : > { %v2822_v60 = vadd.f32 1e-05, %v2821_v27 }
 0x3ac   : > { %5282 = vrsqrt.f32 %v2822_v60 }
 0x3b6   : > { %v5283_v56 = vpop.eup %5282 }
 0x3b7   : > { %v2824_v57 = vmul.f32 %v5283_v56, %v2796_v47  ;;  %v2825_v19 = vmul.f32 %v5283_v56, %v2797_v17  ;;  %v2826_v24 = vmul.f32 %v5283_v56, %v2798_v15  ;;  %v2827_v3 = vmul.f32 %v5283_v56, %v2799_v36 }
 0x3b8   : > { %v2828_v39 = vmul.f32 %v5283_v56, %v2800_v55  ;;  %v2829_v1 = vmul.f32 %v5283_v56, %v2801_v20  ;;  %v2830_v26 = vmul.f32 %v5283_v56, %v2802_v42  ;;  %v2831_v21 = vmul.f32 %v5283_v56, %v2803_v13  ;;  %v6269_v13 = vpop.permute.xlu0 %3615 }
 0x3b9   : > { %vm2832_vm11 = vcmp.ge.f32.partialorder %v2824_v57, 0.0  ;;  %vm2833_vm13 = vcmp.ge.f32.partialorder %v2825_v19, 0.0  ;;  %vm2834_vm10 = vcmp.ge.f32.partialorder %v2826_v24, 0.0  ;;  %vm2835_vm8 = vcmp.ge.f32.partialorder %v2827_v3, 0.0 }
 0x3ba   : > { %v2840_v11 = vmul.f32 0.2, %v2824_v57  ;;  %v2841_v16 = vmul.f32 0.2, %v2825_v19  ;;  %v2842_v28 = vmul.f32 0.2, %v2826_v24 }
 0x3bb   : > { %v2843_v18 = vmul.f32 0.2, %v2827_v3  ;;  %vm2836_vm9 = vcmp.ge.f32.partialorder %v2828_v39, 0.0  ;;  %vm2837_vm12 = vcmp.ge.f32.partialorder %v2829_v1, 0.0  ;;  %v2844_v41 = vmul.f32 0.2, %v2828_v39 }
 0x3bc   : > { %v2848_v49 = vsel %vm2832_vm11, %v2824_v57, %v2840_v11  ;;  %v2849_v5 = vsel %vm2833_vm13, %v2825_v19, %v2841_v16  ;;  %v2850_v47 = vsel %vm2834_vm10, %v2826_v24, %v2842_v28  ;;  %v2845_v17 = vmul.f32 0.2, %v2829_v1  ;;  %v6277_v44 = vpop.permute.xlu0 %3697 }
 0x3bd   : > { %v2851_v15 = vsel %vm2835_vm8, %v2827_v3, %v2843_v18  ;;  %v6200_v14 = vpack.c.bf16 %v2849_v5, %v2848_v49  ;;  %v2852_v36 = vsel %vm2836_vm9, %v2828_v39, %v2844_v41  ;;  %vm2838_vm14 = vcmp.ge.f32.partialorder %v2830_v26, 0.0 }
 0x3be   : > { %v6202_v10 = vpack.c.bf16 %v2851_v15, %v2850_v47  ;;  %v2853_v9 = vsel %vm2837_vm12, %v2829_v1, %v2845_v17  ;;  %vm2839_vm15 = vcmp.ge.f32.partialorder %v2831_v21, 0.0  ;;  %v2846_v52 = vmul.f32 0.2, %v2830_v26 }
 0x3bf   : > { %2888 = vst [vmem:[#allocation2 + $0x4] sm:$0xff] %v6200_v14  ;;  %v6205_v55 = vpack.c.bf16 %v2853_v9, %v2852_v36  ;;  %v2847_v35 = vmul.f32 0.2, %v2831_v21  ;;  %vm7031_vm13 = vcmask 728064   ;;  %vm7032_vm10 = vcmask 89088  }
 0x3c0   : > { %2889 = vst [vmem:[#allocation2 + $0xc] sm:$0xff] %v6202_v10  ;;  %v2854_v53 = vsel %vm2838_vm14, %v2830_v26, %v2846_v52  ;;  %v6285_v61 = vpop.permute.xlu0 %3779  ;;  %vm4621_vm14 = vcmask 719872   ;;  %vm7033_vm8 = vmmov %vm7031_vm13  ;;  %vm7036_vm12 = vcmask 80896  }
 0x3c1   : > { %2890 = vst [vmem:[#allocation2 + $0x14] sm:$0xff] %v6205_v55  ;;  %v2855_v12 = vsel %vm2839_vm15, %v2831_v21, %v2847_v35  ;;  %vm7029_vm15 = vcmask 736256   ;;  %vm7034_vm9 = vmmov %vm7032_vm10 }
 0x3c2   : > { %v6209_v20 = vpack.c.bf16 %v2855_v12, %v2854_v53  ;;  %vm7030_vm11 = vmmov %vm7029_vm15 }
 0x3c4   : > { %2891 = vst [vmem:[#allocation2 + $0x1c] sm:$0xff] %v6209_v20  ;;  %v6293_v37 = vpop.permute.xlu0 %3861 }
 0x3c6   : > { %v2892_v38 = vld [vmem:[#allocation2] sm:$0xff] }
 0x3c7   : > { %v2893_v46 = vld [vmem:[#allocation2 + $0x8] sm:$0xff]  ;;  %2902 = vrot.lane.b32.xlu0 %v2892_v38, %s5296_s22 }
 0x3c8   : > { %2904 = vrot.lane.b32.xlu1 %v2893_v46, %s5296_s22  ;;  %v2935_v42 = vld [vmem:[#allocation2 + $0x10] sm:$0xff] }
 0x3cb   : > { %2943 = vrot.lane.b32.xlu0 %v2892_v38, %s5295_s21 }
 0x3cc   : > { %2945 = vrot.lane.b32.xlu1 %v2893_v46, %s5295_s21 }
 0x3cf   : > { %2906 = vrot.lane.b32.xlu0 %v2935_v42, %s5296_s22 }
 0x3d0   : > { %2947 = vrot.lane.b32.xlu1 %v2935_v42, %s5295_s21 }
 0x3d3   : > { %2984 = vrot.lane.b32.xlu0 %v2892_v38, %s5298_s24 }
 0x3d4   : > { %2986 = vrot.lane.b32.xlu1 %v2893_v46, %s5298_s24 }
 0x3d7   : > { %3025 = vrot.lane.b32.xlu0 %v2892_v38, %s5297_s23 }
 0x3d8   : > { %3027 = vrot.lane.b32.xlu1 %v2893_v46, %s5297_s23 }
 0x3db   : > { %2988 = vrot.lane.b32.xlu0 %v2935_v42, %s5298_s24 }
 0x3dc   : > { %3029 = vrot.lane.b32.xlu1 %v2935_v42, %s5297_s23 }
 0x3df   : > { %3066 = vrot.lane.b32.xlu0 %v2892_v38, %s5299_s25 }
 0x3e0   : > { %3068 = vrot.lane.b32.xlu1 %v2893_v46, %s5299_s25 }
 0x3e3   : > { %3107 = vrot.lane.b32.xlu0 %v2892_v38, %s5300_s26 }
 0x3e4   : > { %3109 = vrot.lane.b32.xlu1 %v2893_v46, %s5300_s26 }
 0x3e7   : > { %3070 = vrot.lane.b32.xlu0 %v2935_v42, %s5299_s25 }
 0x3e8   : > { %3111 = vrot.lane.b32.xlu1 %v2935_v42, %s5300_s26 }
 0x3eb   : > { %3148 = vrot.lane.b32.xlu0 %v2892_v38, %s5301_s27 }
 0x3ec   : > { %3150 = vrot.lane.b32.xlu1 %v2893_v46, %s5301_s27 }
 0x3ef   : > { %3189 = vrot.lane.b32.xlu0 %v2892_v38, %s6948_s28 }
 0x3f0   : > { %3191 = vrot.lane.b32.xlu1 %v2893_v46, %s6948_s28 }
 0x3f3   : > { %3152 = vrot.lane.b32.xlu0 %v2935_v42, %s5301_s27 }
 0x3f4   : > { %3193 = vrot.lane.b32.xlu1 %v2935_v42, %s6948_s28  ;;  %s7027_s28 = smov 1  }
 0x3f7   : > { %3230 = vrot.lane.b32.xlu0 %v2892_v38, %s5303_s29 }
 0x3f8   : > { %3232 = vrot.lane.b32.xlu1 %v2893_v46, %s5303_s29 }
 0x3fb   : > { %3271 = vrot.lane.b32.xlu0 %v2892_v38, %s5304_s30 }
 0x3fc   : > { %3273 = vrot.lane.b32.xlu1 %v2893_v46, %s5304_s30 }
 0x3ff   : > { %3234 = vrot.lane.b32.xlu0 %v2935_v42, %s5303_s29 }
 0x400   : > { %3275 = vrot.lane.b32.xlu1 %v2935_v42, %s5304_s30 }
 0x403   : > { %3312 = vrot.lane.b32.xlu0 %v2892_v38, %s7025_s14 }
 0x404   : > { %3314 = vrot.lane.b32.xlu1 %v2893_v46, %s7025_s14 }
 0x407   : > { %3353 = vrot.lane.b32.xlu0 %v2892_v38, %s7026_s20 }
 0x408   : > { %3355 = vrot.lane.b32.xlu1 %v2893_v46, %s7026_s20 }
 0x40b   : > { %3316 = vrot.lane.b32.xlu0 %v2935_v42, %s7025_s14 }
 0x40c   : > { %3357 = vrot.lane.b32.xlu1 %v2935_v42, %s7026_s20 }
 0x40f   : > { %3394 = vrot.lane.b32.xlu0 %v2892_v38, %s7027_s28 }
 0x410   : > { %3396 = vrot.lane.b32.xlu1 %v2893_v46, %s7027_s28 }
 0x413   : > { %3398 = vrot.lane.b32.xlu0 %v2935_v42, %s7027_s28 }
 0x414   : > { %3443 = vrot.lane.b32.xlu1 %v6200_v14, %s5308_s8 }
 0x417   : > { %3445 = vrot.lane.b32.xlu0 %v6202_v10, %s5308_s8 }
 0x418   : > { %3484 = vrot.lane.b32.xlu1 %v6200_v14, %s5309_s9 }
 0x41b   : > { %3486 = vrot.lane.b32.xlu0 %v6202_v10, %s5309_s9 }
 0x41c   : > { %3447 = vrot.lane.b32.xlu1 %v6205_v55, %s5308_s8 }
 0x41f   : > { %3488 = vrot.lane.b32.xlu0 %v6205_v55, %s5309_s9 }
 0x420   : > { %3525 = vrot.lane.b32.xlu1 %v6200_v14, %s5310_s10 }
 0x423   : > { %3527 = vrot.lane.b32.xlu0 %v6202_v10, %s5310_s10 }
 0x424   : > { %3566 = vrot.lane.b32.xlu1 %v6200_v14, %s5311_s11 }
 0x427   : > { %3568 = vrot.lane.b32.xlu0 %v6202_v10, %s5311_s11 }
 0x428   : > { %3529 = vrot.lane.b32.xlu1 %v6205_v55, %s5310_s10 }
 0x42b   : > { %3570 = vrot.lane.b32.xlu0 %v6205_v55, %s5311_s11 }
 0x42c   : > { %3607 = vrot.lane.b32.xlu1 %v6200_v14, %s5312_s12 }
 0x42f   : > { %3609 = vrot.lane.b32.xlu0 %v6202_v10, %s5312_s12 }
 0x430   : > { %3648 = vrot.lane.b32.xlu1 %v6200_v14, %s6952_s13 }
 0x433   : > { %3650 = vrot.lane.b32.xlu0 %v6202_v10, %s6952_s13 }
 0x434   : > { %3611 = vrot.lane.b32.xlu1 %v6205_v55, %s5312_s12 }
 0x437   : > { %3652 = vrot.lane.b32.xlu0 %v6205_v55, %s6952_s13 }
 0x438   : > { %3689 = vrot.lane.b32.xlu1 %v6200_v14, %s6990_s7 }
 0x439   : > { %v2903_v59 = vpop.permute.xlu0 %2902 }
 0x43a   : > { %v2905_v50 = vpop.permute.xlu1 %2904  ;;  %v2912_v6 = vrot.slane %v2903_v59, 4 }
 0x43b   : > { %v2913_v40 = vrot.slane %v2905_v50, 4  ;;  %3691 = vrot.lane.b32.xlu0 %v6202_v10, %s6990_s7 }
 0x43c   : > { %3730 = vrot.lane.b32.xlu1 %v6200_v14, %s6951_s17 }
 0x43d   : > { %v2944_v32 = vpop.permute.xlu0 %2943  ;;  %v2917_v22 = vsel %vm301_vm0, %v2912_v6, %v2913_v40 }
 0x43e   : > { %v2946_v62 = vpop.permute.xlu1 %2945  ;;  %v2953_v7 = vrot.slane %v2944_v32, 4  ;;  %v2918_v27 = vsel %vm303_vm2, %v2903_v59, %v2917_v22 }
 0x43f   : > { %v2954_v31 = vrot.slane %v2946_v62, 4  ;;  %3732 = vrot.lane.b32.xlu0 %v6202_v10, %s6951_s17 }
 0x440   : > { %3693 = vrot.lane.b32.xlu1 %v6205_v55, %s6990_s7 }
 0x441   : > { %v2958_v29 = vsel %vm301_vm0, %v2953_v7, %v2954_v31  ;;  %v6311_v54 = vpop.permute.xlu0 %2906 }
 0x442   : > { %v2959_v60 = vsel %vm379_vm1, %v2944_v32, %v2958_v29  ;;  %v6315_v56 = vpop.permute.xlu1 %2947  ;;  %v6974_v57 = vrot.slane %v6311_v54, 4 }
 0x443   : > { %v5087_v19 = vcombine.low %v2918_v27, %v2959_v60  ;;  %v6971_v24 = vrot.slane %v6315_v56, 4  ;;  %3734 = vrot.lane.b32.xlu0 %v6205_v55, %s6951_s17  ;;  %v5088_v3 = vcombine.high %v2918_v27, %v2959_v60 }
 0x444   : > { %3771 = vrot.lane.b32.xlu1 %v6200_v14, %s6992_s5  ;;  %v2919_v39 = vsel %vm301_vm0, %v2913_v40, %v6974_v57 }
 0x445   : > { %4650 = vmatprep.subr.bf16.mxu0 %v5088_v3  ;;  %v2985_v1 = vpop.permute.xlu0 %2984  ;;  %v2920_v26 = vsel %vm303_vm2, %v2905_v50, %v2919_v39  ;;  %v2960_v11 = vsel %vm301_vm0, %v2954_v31, %v6971_v24 }
 0x446   : > { %v2987_v16 = vpop.permute.xlu1 %2986  ;;  %4651 = vmatpush1.bf16.msra.mxu0 %v5087_v19  ;;  %v2961_v28 = vsel %vm379_vm1, %v2946_v62, %v2960_v11  ;;  %v2994_v18 = vrot.slane %v2985_v1, 4 }
 0x447   : > { %v2995_v21 = vrot.slane %v2987_v16, 4  ;;  %3773 = vrot.lane.b32.xlu0 %v6202_v10, %s6992_s5  ;;  %v5089_v41 = vcombine.low %v2920_v26, %v2961_v28  ;;  %v5090_v49 = vcombine.high %v2920_v26, %v2961_v28 }
 0x448   : > { %3812 = vrot.lane.b32.xlu1 %v6200_v14, %s6991_s6 }
 0x449   : > { %4691 = vmatprep.subr.bf16.mxu1 %v5090_v49  ;;  %v3026_v5 = vpop.permute.xlu0 %3025  ;;  %v2999_v15 = vsel %vm301_vm0, %v2994_v18, %v2995_v21 }
 0x44a   : > { %v3028_v47 = vpop.permute.xlu1 %3027  ;;  %4692 = vmatpush1.bf16.msra.mxu1 %v5089_v41  ;;  %v3035_v17 = vrot.slane %v3026_v5, 4  ;;  %v3000_v35 = vsel %vm454_vm3, %v2985_v1, %v2999_v15 }
 0x44b   : > { %v3036_v36 = vrot.slane %v3028_v47, 4  ;;  %3814 = vrot.lane.b32.xlu0 %v6202_v10, %s6991_s6 }
 0x44c   : > { %3775 = vrot.lane.b32.xlu1 %v6205_v55, %s6992_s5 }
 0x44d   : > { %v3040_v9 = vsel %vm301_vm0, %v3035_v17, %v3036_v36  ;;  %v6341_v52 = vpop.permute.xlu0 %2988 }
 0x44e   : > { %v3041_v53 = vsel %vm530_vm4, %v3026_v5, %v3040_v9  ;;  %v6345_v12 = vpop.permute.xlu1 %3029  ;;  %v6970_v38 = vrot.slane %v6341_v52, 4  ;;  %v6393_v9 = vld [vmem:[%s6907_s2] sm:$0xff] }
 0x44f   : > { %v5095_v46 = vcombine.low %v3000_v35, %v3041_v53  ;;  %v6968_v42 = vrot.slane %v6345_v12, 4  ;;  %3816 = vrot.lane.b32.xlu0 %v6205_v55, %s6991_s6  ;;  %v5096_v59 = vcombine.high %v3000_v35, %v3041_v53 }
 0x450   : > { %3853 = vrot.lane.b32.xlu1 %v6200_v14, %s6950_s18  ;;  %v3001_v50 = vsel %vm301_vm0, %v2995_v21, %v6970_v38 }
 0x451   : > { %4652 = vmatprep.subr.bf16.mxu0 %v5096_v59  ;;  %v3067_v40 = vpop.permute.xlu0 %3066  ;;  %v3002_v6 = vsel %vm454_vm3, %v2987_v16, %v3001_v50  ;;  %v3042_v32 = vsel %vm301_vm0, %v3036_v36, %v6968_v42 }
 0x452   : > { %v3069_v62 = vpop.permute.xlu1 %3068  ;;  %4653 = vmatpush1.bf16.msra.mxu0 %v5095_v46  ;;  %v3043_v7 = vsel %vm530_vm4, %v3028_v47, %v3042_v32  ;;  %v3076_v31 = vrot.slane %v3067_v40, 4  ;;  %v6398_v46 = vcombine.high %v6393_v9, %v6393_v9 }
 0x453   : > { %v3077_v22 = vrot.slane %v3069_v62, 4  ;;  %3855 = vrot.lane.b32.xlu0 %v6202_v10, %s6950_s18  ;;  %v5097_v29 = vcombine.low %v3002_v6, %v3043_v7  ;;  %v5098_v27 = vcombine.high %v3002_v6, %v3043_v7 }
 0x454   : > { %3894 = vrot.lane.b32.xlu1 %v6200_v14, %s5319_s19  ;;  %5200 = vmatprep.mubr.msk.bf16.mxu0 %vm4621_vm14, %v6398_v46 }
 0x455   : > { %4693 = vmatprep.subr.bf16.mxu1 %v5098_v27  ;;  %v3108_v60 = vpop.permute.xlu0 %3107  ;;  %v3081_v39 = vsel %vm301_vm0, %v3076_v31, %v3077_v22  ;;  %5202 = vmatprep.mubr.msk.bf16.mxu1 %vm4621_vm14, %v6398_v46 }
 0x456   : > { %v3110_v19 = vpop.permute.xlu1 %3109  ;;  %4694 = vmatpush1.bf16.msra.mxu1 %v5097_v29  ;;  %v3117_v3 = vrot.slane %v3108_v60, 4  ;;  %v3082_v16 = vsel %vm605_vm5, %v3067_v40, %v3081_v39  ;;  %v6400_v40 = vld [vmem:[#allocation2 + $0x18] sm:$0xff] }
 0x457   : > { %v3118_v1 = vrot.slane %v3110_v19, 4  ;;  %3896 = vrot.lane.b32.xlu0 %v6202_v10, %s5319_s19 }
 0x458   : > { %3857 = vrot.lane.b32.xlu1 %v6205_v55, %s6950_s18  ;;  %s7028_s18 = smov 17  }
 0x459   : > { %v3122_v26 = vsel %vm301_vm0, %v3117_v3, %v3118_v1  ;;  %v6371_v11 = vpop.permute.xlu0 %3070 }
 0x45a   : > { %v3123_v28 = vsel %vm681_vm6, %v3108_v60, %v3122_v26  ;;  %v6375_v21 = vpop.permute.xlu1 %3111  ;;  %v6967_v18 = vrot.slane %v6371_v11, 4  ;;  %v2896_v26 = vld [vmem:[#allocation2 + $0x20] sm:$0xf] }
 0x45b   : > { %v5103_v41 = vcombine.low %v3082_v16, %v3123_v28  ;;  %v6965_v49 = vrot.slane %v6375_v21, 4  ;;  %3898 = vrot.lane.b32.xlu0 %v6205_v55, %s5319_s19  ;;  %v5104_v5 = vcombine.high %v3082_v16, %v3123_v28 }
 0x45c   : > { %3935 = vrot.lane.b32.xlu1 %v6200_v14, %s7028_s18  ;;  %v3083_v47 = vsel %vm301_vm0, %v3077_v22, %v6967_v18 }
 0x45d   : > { %4654 = vmatprep.subr.bf16.mxu0 %v5104_v5  ;;  %v3149_v17 = vpop.permute.xlu0 %3148  ;;  %v3084_v15 = vsel %vm605_vm5, %v3069_v62, %v3083_v47  ;;  %v3124_v36 = vsel %vm301_vm0, %v3118_v1, %v6965_v49 }
 0x45e   : > { %v3151_v35 = vpop.permute.xlu1 %3150  ;;  %4655 = vmatpush1.bf16.msra.mxu0 %v5103_v41  ;;  %v3125_v53 = vsel %vm681_vm6, %v3110_v19, %v3124_v36  ;;  %v3158_v50 = vrot.slane %v3149_v17, 4  ;;  %v2937_v41 = vld [vmem:[#allocation2 + $0x20] sm:$0xf] }
 0x45f   : > { %v3159_v59 = vrot.slane %v3151_v35, 4  ;;  %3937 = vrot.lane.b32.xlu0 %v6202_v10, %s7028_s18  ;;  %v5105_v6 = vcombine.low %v3084_v15, %v3125_v53  ;;  %v5106_v32 = vcombine.high %v3084_v15, %v3125_v53 }
 0x460   : > { %2908 = vrot.lane.b32.xlu1 %v6400_v40, %s5296_s22 }
 0x461   : > { %4695 = vmatprep.subr.bf16.mxu1 %v5106_v32  ;;  %v3190_v62 = vpop.permute.xlu0 %3189  ;;  %v3163_v31 = vsel %vm301_vm0, %v3158_v50, %v3159_v59 }
 0x462   : > { %v3192_v7 = vpop.permute.xlu1 %3191  ;;  %4696 = vmatpush1.bf16.msra.mxu1 %v5105_v6  ;;  %v3199_v22 = vrot.slane %v3190_v62, 4  ;;  %v3164_v19 = vsel %vm756_vm7, %v3149_v17, %v3163_v31  ;;  %v2978_v31 = vld [vmem:[#allocation2 + $0x20] sm:$0xf] }
 0x463   : > { %v3200_v29 = vrot.slane %v3192_v7, 4  ;;  %2949 = vrot.lane.b32.xlu0 %v6400_v40, %s5295_s21 }
 0x464   : > { %3939 = vrot.lane.b32.xlu1 %v6205_v55, %s7028_s18 }
 0x465   : > { %v3204_v27 = vsel %vm301_vm0, %v3199_v22, %v3200_v29  ;;  %v6416_v60 = vpop.permute.xlu0 %3152 }
 0x466   : > { %v3205_v3 = vsel %vm7029_vm15, %v3190_v62, %v3204_v27  ;;  %v6420_v39 = vpop.permute.xlu1 %3193  ;;  %v6963_v1 = vrot.slane %v6416_v60, 4  ;;  %vm7037_vm15 = vcmask 72704  }
 0x467   : > { %v5111_v16 = vcombine.low %v3164_v19, %v3205_v3  ;;  %v6958_v28 = vrot.slane %v6420_v39, 4  ;;  %2910 = vrot.lane.b32.xlu0 %v2896_v26, %s5296_s22  ;;  %v5112_v55 = vcombine.high %v3164_v19, %v3205_v3  ;;  %s7048_s22 = smov 38  }
 0x468   : > { %v3165_v5 = vsel %vm301_vm0, %v3159_v59, %v6963_v1  ;;  %2951 = vrot.lane.b32.xlu1 %v2937_v41, %s5295_s21  ;;  %s7035_s21 = smov 90  }
 0x469   : > { %4656 = vmatprep.subr.bf16.mxu0 %v5112_v55  ;;  %v3231_v47 = vpop.permute.xlu0 %3230  ;;  %v3166_v17 = vsel %vm756_vm7, %v3151_v35, %v3165_v5  ;;  %v3206_v15 = vsel %vm301_vm0, %v3200_v29, %v6958_v28 }
 0x46a   : > { %v3233_v36 = vpop.permute.xlu1 %3232  ;;  %4657 = vmatpush1.bf16.msra.mxu0 %v5111_v16  ;;  %v3207_v53 = vsel %vm7030_vm11, %v3192_v7, %v3206_v15  ;;  %v3240_v6 = vrot.slane %v3231_v47, 4  ;;  %v3019_v7 = vld [vmem:[#allocation2 + $0x20] sm:$0xf]  ;;  %vm7038_vm11 = vmmov %vm7036_vm12 }
 0x46b   : > { %v3241_v50 = vrot.slane %v3233_v36, 4  ;;  %2990 = vrot.lane.b32.xlu0 %v6400_v40, %s5298_s24  ;;  %v5113_v59 = vcombine.low %v3166_v17, %v3207_v53  ;;  %v5114_v32 = vcombine.high %v3166_v17, %v3207_v53 }
 0x46c   : > { %3031 = vrot.lane.b32.xlu1 %v6400_v40, %s5297_s23 }
 0x46d   : > { %4697 = vmatprep.subr.bf16.mxu1 %v5114_v32  ;;  %v3272_v35 = vpop.permute.xlu0 %3271  ;;  %v3245_v29 = vsel %vm301_vm0, %v3240_v6, %v3241_v50 }
 0x46e   : > { %v3274_v62 = vpop.permute.xlu1 %3273  ;;  %4698 = vmatpush1.bf16.msra.mxu1 %v5113_v59  ;;  %v3281_v22 = vrot.slane %v3272_v35, 4  ;;  %v3246_v26 = vsel %vm7031_vm13, %v3231_v47, %v3245_v29  ;;  %vm7039_vm13 = vmmov %vm7037_vm15 }
 0x46f   : > { %v3282_v27 = vrot.slane %v3274_v62, 4  ;;  %2992 = vrot.lane.b32.xlu0 %v2978_v31, %s5298_s24  ;;  %s7054_s24 = smov 19  }
 0x470   : > { %3033 = vrot.lane.b32.xlu1 %v3019_v7, %s5297_s23  ;;  %v3101_v7 = vld [vmem:[#allocation2 + $0x20] sm:$0xf]  ;;  %s7051_s23 = smov 29  }
 0x471   : > { %v3286_v19 = vsel %vm301_vm0, %v3281_v22, %v3282_v27  ;;  %v6442_v3 = vpop.permute.xlu0 %3234 }
 0x472   : > { %v3287_v16 = vsel %vm7032_vm10, %v3272_v35, %v3286_v19  ;;  %v6446_v41 = vpop.permute.xlu1 %3275  ;;  %v6957_v55 = vrot.slane %v6442_v3, 4  ;;  %v3060_v35 = vld [vmem:[#allocation2 + $0x20] sm:$0xf]  ;;  %vm7040_vm10 = vcmask 7168  }
 0x473   : > { %v5119_v5 = vcombine.low %v3246_v26, %v3287_v16  ;;  %v5120_v17 = vcombine.high %v3246_v26, %v3287_v16  ;;  %v6956_v15 = vrot.slane %v6446_v41, 4  ;;  %3072 = vrot.lane.b32.xlu0 %v6400_v40, %s5299_s25 }
 0x474   : > { %v3247_v53 = vsel %vm301_vm0, %v3241_v50, %v6957_v55  ;;  %3113 = vrot.lane.b32.xlu1 %v6400_v40, %s5300_s26 }
 0x475   : > { %v3288_v47 = vsel %vm301_vm0, %v3282_v27, %v6956_v15  ;;  %4658 = vmatprep.subr.bf16.mxu0 %v5120_v17  ;;  %v3313_v6 = vpop.permute.xlu0 %3312  ;;  %v3248_v59 = vsel %vm7033_vm8, %v3233_v36, %v3247_v53  ;;  %vm7041_vm8 = vmmov %vm7040_vm10 }
 0x476   : > { %v3315_v32 = vpop.permute.xlu1 %3314  ;;  %4659 = vmatpush1.bf16.msra.mxu0 %v5119_v5  ;;  %v3289_v22 = vsel %vm7034_vm9, %v3274_v62, %v3288_v47  ;;  %v3322_v29 = vrot.slane %v3313_v6, 4  ;;  %vm7042_vm9 = vcmask 1039360  }
 0x477   : > { %v3323_v31 = vrot.slane %v3315_v32, 4  ;;  %3074 = vrot.lane.b32.xlu0 %v3060_v35, %s5299_s25  ;;  %v5121_v50 = vcombine.low %v3248_v59, %v3289_v22  ;;  %v5122_v19 = vcombine.high %v3248_v59, %v3289_v22  ;;  %v3142_v22 = vld [vmem:[#allocation2 + $0x20] sm:$0xf]  ;;  %s5213_s25 = sshll.u32 %s7141_s16, 5 }
 0x478   : > { %3115 = vrot.lane.b32.xlu1 %v3101_v7, %s5300_s26  ;;  %s197_s16 = scalar_lea.vmem %s6909_s4, %s5213_s25 }
 0x479   : > { %4699 = vmatprep.subr.bf16.mxu1 %v5122_v19  ;;  %v3354_v27 = vpop.permute.xlu0 %3353  ;;  %v3327_v36 = vsel %vm301_vm0, %v3322_v29, %v3323_v31  ;;  %v3183_v19 = vld [vmem:[#allocation2 + $0x20] sm:$0xf] }
 0x47a   : > { %v3356_v26 = vpop.permute.xlu1 %3355  ;;  %4700 = vmatpush1.bf16.msra.mxu1 %v5121_v50  ;;  %v3363_v16 = vrot.slane %v3354_v27, 4  ;;  %v3328_v53 = vsel %vm7036_vm12, %v3313_v6, %v3327_v36  ;;  %vm7043_vm12 = vcmask 973824  }
 0x47b   : > { %v3364_v5 = vrot.slane %v3356_v26, 4  ;;  %3154 = vrot.lane.b32.xlu0 %v6400_v40, %s5301_s27 }
 0x47c   : > { %3195 = vrot.lane.b32.xlu1 %v6400_v40, %s7035_s21 }
 0x47d   : > { %v3368_v62 = vsel %vm301_vm0, %v3363_v16, %v3364_v5  ;;  %v6470_v17 = vpop.permute.xlu0 %3316 }
 0x47e   : > { %v3369_v47 = vsel %vm7037_vm15, %v3354_v27, %v3368_v62  ;;  %v6474_v59 = vpop.permute.xlu1 %3357  ;;  %v6953_v35 = vrot.slane %v6470_v17, 4  ;;  %vm7044_vm15 = vmmov %vm7042_vm9 }
 0x47f   : > { %v5127_v29 = vcombine.low %v3328_v53, %v3369_v47  ;;  %v5128_v7 = vcombine.high %v3328_v53, %v3369_v47  ;;  %v6955_v50 = vrot.slane %v6474_v59, 4  ;;  %3156 = vrot.lane.b32.xlu0 %v3142_v22, %s5301_s27 }
 0x480   : > { %v3329_v16 = vsel %vm301_vm0, %v3323_v31, %v6953_v35  ;;  %3197 = vrot.lane.b32.xlu1 %v3183_v19, %s7035_s21  ;;  %v3224_v19 = vld [vmem:[#allocation2 + $0x20] sm:$0xf] }
 0x481   : > { %v3370_v6 = vsel %vm301_vm0, %v3364_v5, %v6955_v50  ;;  %4660 = vmatprep.subr.bf16.mxu0 %v5128_v7  ;;  %v3395_v27 = vpop.permute.xlu0 %3394  ;;  %v3330_v36 = vsel %vm7038_vm11, %v3315_v32, %v3329_v16  ;;  %vm7045_vm11 = vmmov %vm7043_vm12 }
 0x482   : > { %v3397_v62 = vpop.permute.xlu1 %3396  ;;  %4661 = vmatpush1.bf16.msra.mxu0 %v5127_v29  ;;  %v3404_v53 = vrot.slane %v3395_v27, 4  ;;  %v3371_v47 = vsel %vm7039_vm13, %v3356_v26, %v3370_v6  ;;  %vm7046_vm13 = vcmask 965632  }
 0x483   : > { %v3405_v22 = vrot.slane %v3397_v62, 4  ;;  %3236 = vrot.lane.b32.xlu0 %v6400_v40, %s5303_s29  ;;  %v5129_v31 = vcombine.low %v3330_v36, %v3371_v47  ;;  %v5130_v35 = vcombine.high %v3330_v36, %v3371_v47  ;;  %v3265_v36 = vld [vmem:[#allocation2 + $0x20] sm:$0xf] }
 0x484   : > { %3277 = vrot.lane.b32.xlu1 %v6400_v40, %s5304_s30 }
 0x485   : > { %v3409_v5 = vsel %vm301_vm0, %v3404_v53, %v3405_v22  ;;  %4701 = vmatprep.subr.bf16.mxu1 %v5130_v35  ;;  %v6493_v7 = vpop.permute.xlu0 %3398 }
 0x486   : > { %v3410_v32 = vsel %vm7040_vm10, %v3395_v27, %v3409_v5  ;;  %v3444_v29 = vpop.permute.xlu1 %3443  ;;  %4702 = vmatpush1.bf16.msra.mxu1 %v5129_v31  ;;  %v6954_v26 = vrot.slane %v6493_v7, 4  ;;  %vm7047_vm10 = vcmask 957440  }
 0x487   : > { %v5135_v16 = vcombine.low %v3410_v32, %v6200_v14  ;;  %v5136_v6 = vcombine.high %v3410_v32, %v6200_v14  ;;  %3238 = vrot.lane.b32.xlu0 %v3224_v19, %s5303_s29  ;;  %v3453_v32 = vrot.slane %v3444_v29, 4 }
 0x488   : > { %v3411_v35 = vsel %vm301_vm0, %v3405_v22, %v6954_v26  ;;  %3279 = vrot.lane.b32.xlu1 %v3265_v36, %s5304_s30  ;;  %v3306_v36 = vld [vmem:[#allocation2 + $0x20] sm:$0xf] }
 0x489   : > { %4662 = vmatprep.subr.bf16.mxu0 %v5136_v6  ;;  %v3446_v27 = vpop.permute.xlu0 %3445  ;;  %v3412_v53 = vsel %vm7041_vm8, %v3397_v62, %v3411_v35  ;;  %vm7049_vm8 = vmmov %vm7046_vm13 }
 0x48a   : > { %v3485_v47 = vpop.permute.xlu1 %3484  ;;  %4663 = vmatpush1.bf16.msra.mxu0 %v5135_v16  ;;  %v3454_v31 = vrot.slane %v3446_v27, 4  ;;  %v5137_v5 = vcombine.low %v3412_v53, %v6202_v10  ;;  %v5138_v14 = vcombine.high %v3412_v53, %v6202_v10  ;;  %v3347_v10 = vld [vmem:[#allocation2 + $0x20] sm:$0xf] }
 0x48b   : > { %3318 = vrot.lane.b32.xlu0 %v6400_v40, %s7025_s14  ;;  %v3494_v19 = vrot.slane %v3485_v47, 4 }
 0x48c   : > { %3359 = vrot.lane.b32.xlu1 %v6400_v40, %s7026_s20  ;;  %4703 = vmatprep.subr.bf16.mxu1 %v5138_v14  ;;  %v3458_v62 = vsel %vm301_vm0, %v3453_v32, %v3454_v31 }
 0x48d   : > { %4704 = vmatpush1.bf16.msra.mxu1 %v5137_v5  ;;  %v3487_v22 = vpop.permute.xlu0 %3486  ;;  %v3459_v5 = vsel %vm7042_vm9, %v3444_v29, %v3458_v62  ;;  %vm7050_vm9 = vmmov %vm7047_vm10 }
 0x48e   : > { %v6512_v6 = vpop.permute.xlu1 %3447  ;;  %v3495_v16 = vrot.slane %v3487_v22, 4 }
 0x48f   : > { %v6962_v35 = vrot.slane %v6512_v6, 4  ;;  %3320 = vrot.lane.b32.xlu0 %v3306_v36, %s7025_s14  ;;  %v3388_v36 = vld [vmem:[#allocation2 + $0x20] sm:$0xf] }
 0x490   : > { %v3499_v53 = vsel %vm301_vm0, %v3494_v19, %v3495_v16  ;;  %3361 = vrot.lane.b32.xlu1 %v3347_v10, %s7026_s20 }
 0x491   : > { %v6518_v26 = vpop.permute.xlu0 %3488  ;;  %v3500_v14 = vsel %vm7043_vm12, %v3485_v47, %v3499_v53  ;;  %v3460_v32 = vsel %vm301_vm0, %v3454_v31, %v6962_v35  ;;  %vm7052_vm12 = vcmask 318464  }
 0x492   : > { %v3526_v50 = vpop.permute.xlu1 %3525  ;;  %v6959_v15 = vrot.slane %v6518_v26, 4  ;;  %v5143_v55 = vcombine.low %v3459_v5, %v3500_v14  ;;  %v5144_v28 = vcombine.high %v3459_v5, %v3500_v14  ;;  %v3461_v47 = vsel %vm7044_vm15, %v3446_v27, %v3460_v32 }
 0x493   : > { %3400 = vrot.lane.b32.xlu0 %v6400_v40, %s7027_s28  ;;  %v3535_v40 = vrot.slane %v3526_v50, 4  ;;  %vm7053_vm15 = vcmask 310272  }
 0x494   : > { %v3501_v19 = vsel %vm301_vm0, %v3495_v16, %v6959_v15  ;;  %3402 = vrot.lane.b32.xlu1 %v3388_v36, %s7027_s28  ;;  %4664 = vmatprep.subr.bf16.mxu0 %v5144_v28 }
 0x495   : > { %4665 = vmatpush1.bf16.msra.mxu0 %v5143_v55  ;;  %v3528_v29 = vpop.permute.xlu0 %3527  ;;  %v3502_v31 = vsel %vm7045_vm11, %v3487_v22, %v3501_v19  ;;  %vm7055_vm11 = vmmov %vm7052_vm12 }
 0x496   : > { %v3567_v62 = vpop.permute.xlu1 %3566  ;;  %v3536_v10 = vrot.slane %v3528_v29, 4  ;;  %v5145_v53 = vcombine.low %v3461_v47, %v3502_v31  ;;  %v5146_v5 = vcombine.high %v3461_v47, %v3502_v31 }
 0x497   : > { %3449 = vrot.lane.b32.xlu0 %v6209_v20, %s5308_s8  ;;  %v3576_v55 = vrot.slane %v3567_v62, 4 }
 0x498   : > { %3490 = vrot.lane.b32.xlu1 %v6209_v20, %s5309_s9  ;;  %4705 = vmatprep.subr.bf16.mxu1 %v5146_v5  ;;  %v3540_v16 = vsel %vm301_vm0, %v3535_v40, %v3536_v10 }
 0x499   : > { %4706 = vmatpush1.bf16.msra.mxu1 %v5145_v53  ;;  %v3569_v28 = vpop.permute.xlu0 %3568  ;;  %v3541_v19 = vsel %vm7046_vm13, %v3526_v50, %v3540_v16  ;;  %vm7056_vm13 = vmmov %vm7053_vm15 }
 0x49a   : > { %v6539_v27 = vpop.permute.xlu1 %3529  ;;  %v3577_v22 = vrot.slane %v3569_v28, 4 }
 0x49b   : > { %v6960_v14 = vrot.slane %v6539_v27, 4  ;;  %3531 = vrot.lane.b32.xlu0 %v6209_v20, %s5310_s10 }
 0x49c   : > { %v3581_v32 = vsel %vm301_vm0, %v3576_v55, %v3577_v22  ;;  %3572 = vrot.lane.b32.xlu1 %v6209_v20, %s5311_s11 }
 0x49d   : > { %v6547_v36 = vpop.permute.xlu0 %3570  ;;  %v3582_v47 = vsel %vm7047_vm10, %v3567_v62, %v3581_v32  ;;  %v3542_v31 = vsel %vm301_vm0, %v3536_v10, %v6960_v14  ;;  %vm7057_vm10 = vcmask 302080  }
 0x49e   : > { %v3608_v53 = vpop.permute.xlu1 %3607  ;;  %v6961_v5 = vrot.slane %v6547_v36, 4  ;;  %v5151_v40 = vcombine.low %v3541_v19, %v3582_v47  ;;  %v5152_v15 = vcombine.high %v3541_v19, %v3582_v47  ;;  %v3543_v62 = vsel %vm7049_vm8, %v3528_v29, %v3542_v31 }
 0x49f   : > { %3613 = vrot.lane.b32.xlu0 %v6209_v20, %s5312_s12  ;;  %v3617_v14 = vrot.slane %v3608_v53, 4  ;;  %vm7058_vm8 = vcmask 236544  }
 0x4a0   : > { %v3583_v55 = vsel %vm301_vm0, %v3577_v22, %v6961_v5  ;;  %3654 = vrot.lane.b32.xlu1 %v6209_v20, %s7048_s22  ;;  %4666 = vmatprep.subr.bf16.mxu0 %v5152_v15 }
 0x4a1   : > { %4667 = vmatpush1.bf16.msra.mxu0 %v5151_v40  ;;  %v3610_v50 = vpop.permute.xlu0 %3609  ;;  %v3584_v10 = vsel %vm7050_vm9, %v3569_v28, %v3583_v55  ;;  %vm7059_vm9 = vmmov %vm7057_vm10 }
 0x4a2   : > { %v3649_v16 = vpop.permute.xlu1 %3648  ;;  %v3618_v32 = vrot.slane %v3610_v50, 4  ;;  %v5153_v19 = vcombine.low %v3543_v62, %v3584_v10  ;;  %v5154_v47 = vcombine.high %v3543_v62, %v3584_v10 }
 0x4a3   : > { %3695 = vrot.lane.b32.xlu0 %v6209_v20, %s6990_s7  ;;  %v3658_v22 = vrot.slane %v3649_v16, 4 }
 0x4a4   : > { %3736 = vrot.lane.b32.xlu1 %v6209_v20, %s7051_s23  ;;  %4707 = vmatprep.subr.bf16.mxu1 %v5154_v47  ;;  %v3622_v40 = vsel %vm301_vm0, %v3617_v14, %v3618_v32 }
 0x4a5   : > { %4708 = vmatpush1.bf16.msra.mxu1 %v5153_v19  ;;  %v3651_v15 = vpop.permute.xlu0 %3650  ;;  %v3623_v10 = vsel %vm7052_vm12, %v3608_v53, %v3622_v40  ;;  %vm7060_vm12 = vmmov %vm7058_vm8 }
 0x4a6   : > { %v6569_v29 = vpop.permute.xlu1 %3611  ;;  %v3659_v28 = vrot.slane %v3651_v15, 4 }
 0x4a7   : > { %v6964_v31 = vrot.slane %v6569_v29, 4  ;;  %3777 = vrot.lane.b32.xlu0 %v6209_v20, %s6992_s5 }
 0x4a8   : > { %v3663_v55 = vsel %vm301_vm0, %v3658_v22, %v3659_v28  ;;  %3818 = vrot.lane.b32.xlu1 %v6209_v20, %s6991_s6 }
 0x4a9   : > { %v6577_v62 = vpop.permute.xlu0 %3652  ;;  %v3664_v19 = vsel %vm7053_vm15, %v3649_v16, %v3663_v55  ;;  %v3624_v14 = vsel %vm301_vm0, %v3618_v32, %v6964_v31  ;;  %v3888_v16 = vld [vmem:[#allocation2 + $0x24] sm:$0xf]  ;;  %vm7061_vm15 = vcmask 228352  }
 0x4aa   : > { %v3690_v47 = vpop.permute.xlu1 %3689  ;;  %v6966_v5 = vrot.slane %v6577_v62, 4  ;;  %v5159_v35 = vcombine.low %v3623_v10, %v3664_v19  ;;  %v5160_v1 = vcombine.high %v3623_v10, %v3664_v19  ;;  %v3625_v32 = vsel %vm7055_vm11, %v3610_v50, %v3624_v14 }
 0x4ab   : > { %3859 = vrot.lane.b32.xlu0 %v6209_v20, %s7054_s24  ;;  %v3699_v49 = vrot.slane %v3690_v47, 4  ;;  %vm7062_vm11 = vcmask 220160  }
 0x4ac   : > { %v3665_v22 = vsel %vm301_vm0, %v3659_v28, %v6966_v5  ;;  %3900 = vrot.lane.b32.xlu1 %v6209_v20, %s5319_s19  ;;  %4668 = vmatprep.subr.bf16.mxu0 %v5160_v1 }
 0x4ad   : > { %4669 = vmatpush1.bf16.msra.mxu0 %v5159_v35  ;;  %v3692_v53 = vpop.permute.xlu0 %3691  ;;  %v3666_v40 = vsel %vm7056_vm13, %v3651_v15, %v3665_v22  ;;  %v3929_v35 = vld [vmem:[#allocation2 + $0x24] sm:$0xf]  ;;  %vm7063_vm13 = vmmov %vm7061_vm15 }
 0x4ae   : > { %v3731_v55 = vpop.permute.xlu1 %3730  ;;  %v3700_v10 = vrot.slane %v3692_v53, 4  ;;  %v5161_v19 = vcombine.low %v3625_v32, %v3666_v40  ;;  %v5162_v31 = vcombine.high %v3625_v32, %v3666_v40 }
 0x4af   : > { %3941 = vrot.lane.b32.xlu0 %v6209_v20, %s7028_s18  ;;  %v3740_v28 = vrot.slane %v3731_v55, 4 }
 0x4b0   : > { %3902 = vrot.lane.b32.xlu1 %v3888_v16, %s5319_s19  ;;  %4709 = vmatprep.subr.bf16.mxu1 %v5162_v31  ;;  %v3704_v5 = vsel %vm301_vm0, %v3699_v49, %v3700_v10 }
 0x4b1   : > { %4710 = vmatpush1.bf16.msra.mxu1 %v5161_v19  ;;  %v3733_v1 = vpop.permute.xlu0 %3732  ;;  %v3705_v16 = vsel %vm7057_vm10, %v3690_v47, %v3704_v5  ;;  %vm7064_vm10 = vmmov %vm7062_vm11 }
 0x4b2   : > { %v6598_v50 = vpop.permute.xlu1 %3693  ;;  %v3741_v15 = vrot.slane %v3733_v1, 4 }
 0x4b3   : > { %v6969_v14 = vrot.slane %v6598_v50, 4 }
 0x4b4   : > { %v3745_v22 = vsel %vm301_vm0, %v3740_v28, %v3741_v15  ;;  %3943 = vrot.lane.b32.xlu1 %v3929_v35, %s7028_s18 }
 0x4b5   : > { %v6603_v20 = vpop.permute.xlu0 %3734  ;;  %v3746_v31 = vsel %vm7058_vm8, %v3731_v55, %v3745_v22  ;;  %v3706_v32 = vsel %vm301_vm0, %v3700_v10, %v6969_v14  ;;  %vm7065_vm8 = vcmask 154624  }
 0x4b6   : > { %v3772_v49 = vpop.permute.xlu1 %3771  ;;  %v6972_v40 = vrot.slane %v6603_v20, 4  ;;  %v5167_v19 = vcombine.low %v3705_v16, %v3746_v31  ;;  %v5168_v18 = vcombine.high %v3705_v16, %v3746_v31  ;;  %v3707_v5 = vsel %vm7059_vm9, %v3692_v53, %v3706_v32 }
 0x4b7   : > { %v3781_v14 = vrot.slane %v3772_v49, 4  ;;  %vm7066_vm9 = vcmask 146432  }
 0x4b8   : > { %v3747_v28 = vsel %vm301_vm0, %v3741_v15, %v6972_v40  ;;  %4670 = vmatprep.subr.bf16.mxu0 %v5168_v18 }
 0x4b9   : > { %4671 = vmatpush1.bf16.msra.mxu0 %v5167_v19  ;;  %v3774_v35 = vpop.permute.xlu0 %3773  ;;  %v3748_v47 = vsel %vm7060_vm12, %v3733_v1, %v3747_v28  ;;  %vm7067_vm12 = vmmov %vm7065_vm8 }
 0x4ba   : > { %v3813_v55 = vpop.permute.xlu1 %3812  ;;  %v3782_v22 = vrot.slane %v3774_v35, 4  ;;  %v5169_v42 = vcombine.low %v3707_v5, %v3748_v47  ;;  %v5170_v10 = vcombine.high %v3707_v5, %v3748_v47 }
 0x4bb   : > { %v3822_v16 = vrot.slane %v3813_v55, 4 }
 0x4bc   : > { %4711 = vmatprep.subr.bf16.mxu1 %v5170_v10  ;;  %v3786_v31 = vsel %vm301_vm0, %v3781_v14, %v3782_v22 }
 0x4bd   : > { %4712 = vmatpush1.bf16.msra.mxu1 %v5169_v42  ;;  %v3815_v38 = vpop.permute.xlu0 %3814  ;;  %v3787_v1 = vsel %vm7061_vm15, %v3772_v49, %v3786_v31  ;;  %vm7068_vm15 = vmmov %vm7066_vm9 }
 0x4be   : > { %v6617_v24 = vpop.permute.xlu1 %3775  ;;  %v3823_v18 = vrot.slane %v3815_v38, 4 }
 0x4bf   : > { %v6973_v15 = vrot.slane %v6617_v24, 4 }
 0x4c0   : > { %v3827_v53 = vsel %vm301_vm0, %v3822_v16, %v3823_v18 }
 0x4c1   : > { %v6621_v32 = vpop.permute.xlu0 %3816  ;;  %v3828_v19 = vsel %vm7062_vm11, %v3813_v55, %v3827_v53  ;;  %v3788_v42 = vsel %vm301_vm0, %v3782_v22, %v6973_v15  ;;  %vm7069_vm11 = vcmask 138240  }
 0x4c2   : > { %v3854_v28 = vpop.permute.xlu1 %3853  ;;  %v6977_v14 = vrot.slane %v6621_v32, 4  ;;  %v5175_v5 = vcombine.low %v3787_v1, %v3828_v19  ;;  %v5176_v47 = vcombine.high %v3787_v1, %v3828_v19  ;;  %v3789_v49 = vsel %vm7063_vm13, %v3774_v35, %v3788_v42  ;;  %vm7072_vm13 = vmmov %vm7069_vm11 }
 0x4c3   : > { %v3863_v15 = vrot.slane %v3854_v28, 4 }
 0x4c4   : > { %v3829_v10 = vsel %vm301_vm0, %v3823_v18, %v6977_v14  ;;  %4672 = vmatprep.subr.bf16.mxu0 %v5176_v47 }
 0x4c5   : > { %4673 = vmatpush1.bf16.msra.mxu0 %v5175_v5  ;;  %v3856_v16 = vpop.permute.xlu0 %3855  ;;  %v3830_v55 = vsel %vm7064_vm10, %v3815_v38, %v3829_v10 }
 0x4c6   : > { %v3895_v31 = vpop.permute.xlu1 %3894  ;;  %v3864_v53 = vrot.slane %v3856_v16, 4  ;;  %v5177_v40 = vcombine.low %v3789_v49, %v3830_v55  ;;  %v5178_v22 = vcombine.high %v3789_v49, %v3830_v55 }
 0x4c7   : > { %v3904_v1 = vrot.slane %v3895_v31, 4 }
 0x4c8   : > { %4713 = vmatprep.subr.bf16.mxu1 %v5178_v22  ;;  %v3868_v19 = vsel %vm301_vm0, %v3863_v15, %v3864_v53 }
 0x4c9   : > { %4714 = vmatpush1.bf16.msra.mxu1 %v5177_v40  ;;  %v3897_v57 = vpop.permute.xlu0 %3896  ;;  %v3869_v38 = vsel %vm7065_vm8, %v3854_v28, %v3868_v19 }
 0x4ca   : > { %v6635_v23 = vpop.permute.xlu1 %3857  ;;  %v3905_v18 = vrot.slane %v3897_v57, 4 }
 0x4cb   : > { %v6978_v5 = vrot.slane %v6635_v23, 4 }
 0x4cc   : > { %v3909_v35 = vsel %vm301_vm0, %v3904_v1, %v3905_v18 }
 0x4cd   : > { %v6639_v42 = vpop.permute.xlu0 %3898  ;;  %v3910_v47 = vsel %vm7066_vm9, %v3895_v31, %v3909_v35  ;;  %v3870_v40 = vsel %vm301_vm0, %v3864_v53, %v6978_v5  ;;  %vm7094_vm9 = vcmask 7168  }
 0x4ce   : > { %v3936_v10 = vpop.permute.xlu1 %3935  ;;  %v6983_v15 = vrot.slane %v6639_v42, 4  ;;  %v5183_v49 = vcombine.low %v3869_v38, %v3910_v47  ;;  %v5184_v55 = vcombine.high %v3869_v38, %v3910_v47  ;;  %v3871_v28 = vsel %vm7067_vm12, %v3856_v16, %v3870_v40  ;;  %vm7095_vm12 = vmmov %vm7094_vm9 }
 0x4cf   : > { %v3945_v19 = vrot.slane %v3936_v10, 4  ;;  %v7070_v47 = vrot.slane %v6311_v54, 4 }
 0x4d0   : > { %v3911_v22 = vsel %vm301_vm0, %v3905_v18, %v6983_v15  ;;  %4674 = vmatprep.subr.bf16.mxu0 %v5184_v55 }
 0x4d1   : > { %4675 = vmatpush1.bf16.msra.mxu0 %v5183_v49  ;;  %v3938_v1 = vpop.permute.xlu0 %3937  ;;  %v3912_v31 = vsel %vm7068_vm15, %v3897_v57, %v3911_v22  ;;  %vm7098_vm15 = vcmask 1039360  }
 0x4d2   : > { %v2909_v35 = vpop.permute.xlu1 %2908  ;;  %v3946_v14 = vrot.slane %v3938_v1, 4  ;;  %v5185_v53 = vcombine.low %v3871_v28, %v3912_v31  ;;  %v5186_v5 = vcombine.high %v3871_v28, %v3912_v31  ;;  %v7071_v28 = vrot.slane %v6315_v56, 4 }
 0x4d3   : > { %v2915_v63 = vrot.slane %v2909_v35, 4 }
 0x4d4   : > { %v3950_v2 = vsel %vm301_vm0, %v3945_v19, %v3946_v14  ;;  %4715 = vmatprep.subr.bf16.mxu1 %v5186_v5 }
 0x4d5   : > { %4716 = vmatpush1.bf16.msra.mxu1 %v5185_v53  ;;  %v2950_v38 = vpop.permute.xlu0 %2949  ;;  %v3951_v18 = vsel %vm7069_vm11, %v3936_v10, %v3950_v2  ;;  %v2921_v49 = vsel %vm301_vm0, %v7070_v47, %v2915_v63  ;;  %v6667_v2 = vcombine.low %v6393_v9, %v6393_v9  ;;  %vm7099_vm11 = vcmask 973824  }
 0x4d6   : > { %v6657_v16 = vpop.permute.xlu1 %3939  ;;  %v2956_v57 = vrot.slane %v2950_v38, 4  ;;  %v5192_v40 = vcombine.high %v3951_v18, %v3951_v18  ;;  %v5191_v55 = vcombine.low %v3951_v18, %v3951_v18  ;;  %v2922_v53 = vsel %vm303_vm2, %v6311_v54, %v2921_v49 }
 0x4d7   : > { %v3947_v22 = vrot.slane %v6657_v16, 4 }
 0x4d8   : > { %v2962_v31 = vsel %vm301_vm0, %v7071_v28, %v2956_v57  ;;  %5199 = vmatprep.subr.msk.bf16.mxu0 %vm301_vm0, %v5192_v40  ;;  %v4627_v5 = vsel %vm301_vm0, %v5191_v55, 0 }
 0x4d9   : > { %v3952_v10 = vsel %vm301_vm0, %v3946_v14, %v3947_v22  ;;  %4677 = vmatpush1.bf16.msra.mxu0 %v4627_v5  ;;  %v2911_v19 = vpop.permute.xlu0 %2910  ;;  %v2963_v18 = vsel %vm379_vm1, %v6315_v56, %v2962_v31 }
 0x4da   : > { %v2952_v47 = vpop.permute.xlu1 %2951  ;;  %v2916_v40 = vrot.slane %v2911_v19, 4  ;;  %v3953_v55 = vsel %vm7072_vm13, %v3938_v1, %v3952_v10  ;;  %v5091_v28 = vcombine.low %v2922_v53, %v2963_v18  ;;  %v5092_v15 = vcombine.high %v2922_v53, %v2963_v18  ;;  %vm7100_vm13 = vmmov %vm7098_vm15 }
 0x4db   : > { %v2957_v9 = vrot.slane %v2952_v47, 4  ;;  %v5194_v8 = vcombine.high %v3953_v55, %v3953_v55  ;;  %v5193_v34 = vcombine.low %v3953_v55, %v3953_v55 }
 0x4dc   : > { %v2923_v33 = vsel %vm301_vm0, %v2915_v63, %v2916_v40  ;;  %4732 = vmatprep.subr.bf16.mxu0 %v5092_v15  ;;  %4683 = vmatmul.mubr.bf16.vlgmr.msra.gmra.mrb[8].mxu0 %v6667_v2 }
 0x4dd   : > { %v2964_v14 = vsel %vm301_vm0, %v2956_v57, %v2957_v9  ;;  %5201 = vmatprep.subr.msk.bf16.mxu1 %vm301_vm0, %v5194_v8  ;;  %v4633_v54 = vsel %vm301_vm0, %v5193_v34, 0  ;;  %4733 = vmatpush1.bf16.msra.mxu0 %v5091_v28  ;;  %v2991_v56 = vpop.permute.xlu0 %2990  ;;  %v2924_v1 = vsel %vm303_vm2, %v2909_v35, %v2923_v33  ;;  %v7073_v57 = vrot.slane %v6341_v52, 4 }
 0x4de   : > { %v3032_v49 = vpop.permute.xlu1 %3031  ;;  %4718 = vmatpush1.bf16.msra.mxu1 %v4633_v54  ;;  %v2997_v31 = vrot.slane %v2991_v56, 4  ;;  %v2965_v5 = vsel %vm379_vm1, %v2950_v38, %v2964_v14  ;;  %5204 = vmatprep.mubr.msk.bf16.mxu0 %vm4621_vm14, %v6398_v46  ;;  %v7074_v34 = vrot.slane %v6345_v12, 4  ;;  %vm7079_vm1 = vcmask 736256  }
 0x4df   : > { %v3038_v63 = vrot.slane %v3032_v49, 4  ;;  %v5093_v15 = vcombine.low %v2924_v1, %v2965_v5  ;;  %v5094_v10 = vcombine.high %v2924_v1, %v2965_v5  ;;  %vm7080_vm2 = vmmov %vm7079_vm1 }
 0x4e0   : > { %v3003_v8 = vsel %vm301_vm0, %v7073_v57, %v2997_v31 }
 0x4e1   : > { %v3044_v19 = vsel %vm301_vm0, %v7074_v34, %v3038_v63  ;;  %4773 = vmatprep.subr.bf16.mxu1 %v5094_v10  ;;  %4724 = vmatmul.mubr.bf16.vlgmr.msra.gmra.mrb[8].mxu1 %v6667_v2  ;;  %v2993_v33 = vpop.permute.xlu0 %2992  ;;  %v3004_v35 = vsel %vm454_vm3, %v6341_v52, %v3003_v8 }
 0x4e2   : > { %v3034_v38 = vpop.permute.xlu1 %3033  ;;  %4774 = vmatpush1.bf16.msra.mxu1 %v5093_v15  ;;  %v2998_v53 = vrot.slane %v2993_v33, 4  ;;  %v3045_v18 = vsel %vm530_vm4, %v6345_v12, %v3044_v19  ;;  %5206 = vmatprep.mubr.msk.bf16.mxu1 %vm4621_vm14, %v6398_v46  ;;  %v7075_v46 = vrot.slane %v6371_v11, 4  ;;  %vm7090_vm14 = vcmask 72704  }
 0x4e3   : > { %v3039_v47 = vrot.slane %v3034_v38, 4  ;;  %v5099_v40 = vcombine.low %v3004_v35, %v3045_v18  ;;  %v5100_v55 = vcombine.high %v3004_v35, %v3045_v18  ;;  %vm7092_vm8 = vmmov %vm7090_vm14 }
 0x4e4   : > { %v3005_v28 = vsel %vm301_vm0, %v2997_v31, %v2998_v53  ;;  %v7076_v31 = vrot.slane %v6375_v21, 4 }
 0x4e5   : > { %v3046_v9 = vsel %vm301_vm0, %v3038_v63, %v3039_v47  ;;  %4734 = vmatprep.subr.bf16.mxu0 %v5100_v55  ;;  %v3073_v14 = vpop.permute.xlu0 %3072  ;;  %v3006_v52 = vsel %vm454_vm3, %v2991_v56, %v3005_v28  ;;  %vm7083_vm3 = vcmask 728064  }
 0x4e6   : > { %v3114_v54 = vpop.permute.xlu1 %3113  ;;  %4735 = vmatpush1.bf16.msra.mxu0 %v5099_v40  ;;  %v3079_v1 = vrot.slane %v3073_v14, 4  ;;  %v3047_v5 = vsel %vm530_vm4, %v3032_v49, %v3046_v9  ;;  %vm7084_vm4 = vcmask 89088  }
 0x4e7   : > { %v3120_v12 = vrot.slane %v3114_v54, 4  ;;  %v5101_v15 = vcombine.low %v3006_v52, %v3047_v5  ;;  %v5102_v10 = vcombine.high %v3006_v52, %v3047_v5 }
 0x4e8   : > { %v3085_v57 = vsel %vm301_vm0, %v7075_v46, %v3079_v1 }
 0x4e9   : > { %v3126_v63 = vsel %vm301_vm0, %v7076_v31, %v3120_v12  ;;  %4775 = vmatprep.subr.bf16.mxu1 %v5102_v10  ;;  %v3075_v8 = vpop.permute.xlu0 %3074  ;;  %v3086_v56 = vsel %vm605_vm5, %v6371_v11, %v3085_v57 }
 0x4ea   : > { %v3116_v34 = vpop.permute.xlu1 %3115  ;;  %4776 = vmatpush1.bf16.msra.mxu1 %v5101_v15  ;;  %v3080_v19 = vrot.slane %v3075_v8, 4  ;;  %v3127_v49 = vsel %vm681_vm6, %v6375_v21, %v3126_v63  ;;  %v7077_v21 = vrot.slane %v6416_v60, 4 }
 0x4eb   : > { %v3121_v33 = vrot.slane %v3116_v34, 4  ;;  %v5107_v35 = vcombine.low %v3086_v56, %v3127_v49  ;;  %v5108_v38 = vcombine.high %v3086_v56, %v3127_v49 }
 0x4ec   : > { %v3087_v53 = vsel %vm301_vm0, %v3079_v1, %v3080_v19  ;;  %v7078_v1 = vrot.slane %v6420_v39, 4 }
 0x4ed   : > { %v3128_v18 = vsel %vm301_vm0, %v3120_v12, %v3121_v33  ;;  %4736 = vmatprep.subr.bf16.mxu0 %v5108_v38  ;;  %v3155_v47 = vpop.permute.xlu0 %3154  ;;  %v3088_v40 = vsel %vm605_vm5, %v3073_v14, %v3087_v53  ;;  %vm7085_vm5 = vmmov %vm7083_vm3 }
 0x4ee   : > { %v3196_v55 = vpop.permute.xlu1 %3195  ;;  %4737 = vmatpush1.bf16.msra.mxu0 %v5107_v35  ;;  %v3161_v11 = vrot.slane %v3155_v47, 4  ;;  %v3129_v28 = vsel %vm681_vm6, %v3114_v54, %v3128_v18  ;;  %vm7086_vm6 = vmmov %vm7084_vm4 }
 0x4ef   : > { %v3202_v9 = vrot.slane %v3196_v55, 4  ;;  %v5109_v52 = vcombine.low %v3088_v40, %v3129_v28  ;;  %v5110_v5 = vcombine.high %v3088_v40, %v3129_v28 }
 0x4f0   : > { %v3167_v15 = vsel %vm301_vm0, %v7077_v21, %v3161_v11 }
 0x4f1   : > { %v3208_v12 = vsel %vm301_vm0, %v7078_v1, %v3202_v9  ;;  %4777 = vmatprep.subr.bf16.mxu1 %v5110_v5  ;;  %v3157_v10 = vpop.permute.xlu0 %3156  ;;  %v3168_v14 = vsel %vm756_vm7, %v6416_v60, %v3167_v15 }
 0x4f2   : > { %v3198_v46 = vpop.permute.xlu1 %3197  ;;  %4778 = vmatpush1.bf16.msra.mxu1 %v5109_v52  ;;  %v3162_v57 = vrot.slane %v3157_v10, 4  ;;  %v3209_v54 = vsel %vm7079_vm1, %v6420_v39, %v3208_v12  ;;  %v7081_v39 = vrot.slane %v6442_v3, 4  ;;  %vm7101_vm1 = vmmov %vm7099_vm11 }
 0x4f3   : > { %v3203_v31 = vrot.slane %v3198_v46, 4  ;;  %v5115_v63 = vcombine.low %v3168_v14, %v3209_v54  ;;  %v5116_v8 = vcombine.high %v3168_v14, %v3209_v54 }
 0x4f4   : > { %v3169_v56 = vsel %vm301_vm0, %v3161_v11, %v3162_v57  ;;  %v7082_v11 = vrot.slane %v6446_v41, 4 }
 0x4f5   : > { %v3210_v34 = vsel %vm301_vm0, %v3202_v9, %v3203_v31  ;;  %4738 = vmatprep.subr.bf16.mxu0 %v5116_v8  ;;  %v3237_v19 = vpop.permute.xlu0 %3236  ;;  %v3170_v49 = vsel %vm756_vm7, %v3155_v47, %v3169_v56  ;;  %vm7089_vm7 = vcmask 80896  }
 0x4f6   : > { %v3278_v33 = vpop.permute.xlu1 %3277  ;;  %4739 = vmatpush1.bf16.msra.mxu0 %v5115_v63  ;;  %v3243_v60 = vrot.slane %v3237_v19, 4  ;;  %v3211_v35 = vsel %vm7080_vm2, %v3196_v55, %v3210_v34  ;;  %v7088_v34 = vrot.slane %v6474_v59, 4  ;;  %vm7091_vm10 = vmmov %vm7089_vm7  ;;  %vm7104_vm2 = vcmask 965632  }
 0x4f7   : > { %v3284_v38 = vrot.slane %v3278_v33, 4  ;;  %v5117_v53 = vcombine.low %v3170_v49, %v3211_v35  ;;  %v5118_v18 = vcombine.high %v3170_v49, %v3211_v35 }
 0x4f8   : > { %v3249_v40 = vsel %vm301_vm0, %v7081_v39, %v3243_v60 }
 0x4f9   : > { %v3290_v28 = vsel %vm301_vm0, %v7082_v11, %v3284_v38  ;;  %4779 = vmatprep.subr.bf16.mxu1 %v5118_v18  ;;  %v3239_v9 = vpop.permute.xlu0 %3238  ;;  %v3250_v47 = vsel %vm7083_vm3, %v6442_v3, %v3249_v40  ;;  %vm7105_vm3 = vmmov %vm7104_vm2 }
 0x4fa   : > { %v3280_v52 = vpop.permute.xlu1 %3279  ;;  %4780 = vmatpush1.bf16.msra.mxu1 %v5117_v53  ;;  %v3244_v5 = vrot.slane %v3239_v9, 4  ;;  %v3291_v55 = vsel %vm7084_vm4, %v6446_v41, %v3290_v28  ;;  %v7087_v41 = vrot.slane %v6470_v17, 4  ;;  %vm7106_vm4 = vcmask 957440  }
 0x4fb   : > { %v3285_v21 = vrot.slane %v3280_v52, 4  ;;  %v5123_v15 = vcombine.low %v3250_v47, %v3291_v55  ;;  %v5124_v1 = vcombine.high %v3250_v47, %v3291_v55 }
 0x4fc   : > { %v3251_v12 = vsel %vm301_vm0, %v3243_v60, %v3244_v5 }
 0x4fd   : > { %v3292_v10 = vsel %vm301_vm0, %v3284_v38, %v3285_v21  ;;  %4740 = vmatprep.subr.bf16.mxu0 %v5124_v1  ;;  %v3319_v14 = vpop.permute.xlu0 %3318  ;;  %v3252_v46 = vsel %vm7085_vm5, %v3237_v19, %v3251_v12  ;;  %v3457_v1 = vrot.slane %v6253_v45, 4  ;;  %vm7107_vm5 = vmmov %vm7106_vm4 }
 0x4fe   : > { %v3360_v57 = vpop.permute.xlu1 %3359  ;;  %4741 = vmatpush1.bf16.msra.mxu0 %v5123_v15  ;;  %v3325_v3 = vrot.slane %v3319_v14, 4  ;;  %v3293_v54 = vsel %vm7086_vm6, %v3278_v33, %v3292_v10  ;;  %vm7110_vm6 = vcmask 318464  }
 0x4ff   : > { %v3366_v31 = vrot.slane %v3360_v57, 4  ;;  %v5125_v63 = vcombine.low %v3252_v46, %v3293_v54  ;;  %v5126_v8 = vcombine.high %v3252_v46, %v3293_v54  ;;  %v3427_v46 = vld [vmem:[#allocation2 + $0x14] sm:$0xff] }
 0x500   : > { %v3331_v56 = vsel %vm301_vm0, %v7087_v41, %v3325_v3  ;;  %v3498_v41 = vrot.slane %v6190_v30, 4 }
 0x501   : > { %v3372_v49 = vsel %vm301_vm0, %v7088_v34, %v3366_v31  ;;  %4781 = vmatprep.subr.bf16.mxu1 %v5126_v8  ;;  %v3321_v60 = vpop.permute.xlu0 %3320  ;;  %v3332_v19 = vsel %vm7089_vm7, %v6470_v17, %v3331_v56  ;;  %vm7111_vm7 = vmmov %vm7110_vm6 }
 0x502   : > { %v3362_v35 = vpop.permute.xlu1 %3361  ;;  %4782 = vmatpush1.bf16.msra.mxu1 %v5125_v63  ;;  %v3326_v38 = vrot.slane %v3321_v60, 4  ;;  %v3373_v33 = vsel %vm7090_vm14, %v6474_v59, %v3372_v49  ;;  %v7093_v59 = vrot.slane %v6493_v7, 4  ;;  %v3580_v49 = vrot.slane %v6192_v4, 4 }
 0x503   : > { %v3367_v53 = vrot.slane %v3362_v35, 4  ;;  %v5131_v18 = vcombine.low %v3332_v19, %v3373_v33  ;;  %v5132_v39 = vcombine.high %v3332_v19, %v3373_v33  ;;  %v7096_v60 = vrot.slane %v6512_v6, 4 }
 0x504   : > { %v3333_v40 = vsel %vm301_vm0, %v3325_v3, %v3326_v38  ;;  %v3428_v3 = vld [vmem:[#allocation2 + $0x1c] sm:$0xff]  ;;  %v3539_v35 = vrot.slane %v6261_v43, 4  ;;  %v7097_v38 = vrot.slane %v6518_v26, 4  ;;  %vm7112_vm14 = vcmask 310272  }
 0x505   : > { %v3374_v11 = vsel %vm301_vm0, %v3366_v31, %v3367_v53  ;;  %4742 = vmatprep.subr.bf16.mxu0 %v5132_v39  ;;  %v3401_v28 = vpop.permute.xlu0 %3400  ;;  %v3334_v9 = vsel %vm7091_vm10, %v3319_v14, %v3333_v40  ;;  %vm7113_vm10 = vmmov %vm7112_vm14 }
 0x506   : > { %v3403_v47 = vpop.permute.xlu1 %3402  ;;  %4743 = vmatpush1.bf16.msra.mxu0 %v5131_v18  ;;  %v3407_v17 = vrot.slane %v3401_v28, 4  ;;  %v3375_v52 = vsel %vm7092_vm8, %v3360_v57, %v3374_v11  ;;  %vm7116_vm8 = vcmask 302080  }
 0x507   : > { %v3408_v5 = vrot.slane %v3403_v47, 4  ;;  %v5133_v55 = vcombine.low %v3334_v9, %v3375_v52  ;;  %v5134_v21 = vcombine.high %v3334_v9, %v3375_v52  ;;  %v3662_v52 = vrot.slane %v6194_v25, 4 }
 0x508   : > { %v3413_v15 = vsel %vm301_vm0, %v7093_v59, %v3407_v17 }
 0x509   : > { %v3415_v12 = vsel %vm301_vm0, %v3407_v17, %v3408_v5  ;;  %4783 = vmatprep.subr.bf16.mxu1 %v5134_v21  ;;  %v3450_v10 = vpop.permute.xlu0 %3449  ;;  %v3414_v14 = vsel %vm7094_vm9, %v6493_v7, %v3413_v15  ;;  %v7102_v5 = vrot.slane %v6539_v27, 4  ;;  %v7103_v15 = vrot.slane %v6547_v36, 4  ;;  %vm7117_vm9 = vmmov %vm7116_vm8 }
 0x50a   : > { %v3416_v57 = vsel %vm7095_vm12, %v3401_v28, %v3415_v12  ;;  %v3491_v54 = vpop.permute.xlu1 %3490  ;;  %4784 = vmatpush1.bf16.msra.mxu1 %v5133_v55  ;;  %v3456_v31 = vrot.slane %v3450_v10, 4  ;;  %v5139_v63 = vcombine.low %v3414_v14, %v3427_v46  ;;  %v5140_v8 = vcombine.high %v3414_v14, %v3427_v46 }
 0x50b   : > { %v5141_v56 = vcombine.low %v3416_v57, %v3428_v3  ;;  %v5142_v45 = vcombine.high %v3416_v57, %v3428_v3  ;;  %v3497_v34 = vrot.slane %v3491_v54, 4  ;;  %vm7118_vm12 = vcmask 236544  }
 0x50c   : > { %v3462_v7 = vsel %vm301_vm0, %v7096_v60, %v3456_v31  ;;  %v3464_v19 = vsel %vm301_vm0, %v3456_v31, %v3457_v1  ;;  %4744 = vmatprep.subr.bf16.mxu0 %v5140_v8 }
 0x50d   : > { %v3503_v33 = vsel %vm301_vm0, %v7097_v38, %v3497_v34  ;;  %v3505_v30 = vsel %vm301_vm0, %v3497_v34, %v3498_v41  ;;  %v3465_v53 = vsel %vm7098_vm15, %v3450_v10, %v3464_v19  ;;  %4785 = vmatprep.subr.bf16.mxu1 %v5142_v45  ;;  %4745 = vmatpush1.bf16.msra.mxu0 %v5139_v63  ;;  %v3532_v4 = vpop.permute.xlu0 %3531  ;;  %v3621_v10 = vrot.slane %v6269_v13, 4  ;;  %vm7119_vm15 = vmmov %vm7118_vm12 }
 0x50e   : > { %v3506_v18 = vsel %vm7099_vm11, %v3491_v54, %v3505_v30  ;;  %v3573_v39 = vpop.permute.xlu1 %3572  ;;  %4786 = vmatpush1.bf16.msra.mxu1 %v5141_v56  ;;  %v3538_v40 = vrot.slane %v3532_v4, 4  ;;  %v3463_v11 = vsel %vm7100_vm13, %v6512_v6, %v3462_v7  ;;  %v3504_v43 = vsel %vm7101_vm1, %v6518_v26, %v3503_v33 }
 0x50f   : > { %v5149_v28 = vcombine.low %v3465_v53, %v3506_v18  ;;  %v5150_v9 = vcombine.high %v3465_v53, %v3506_v18  ;;  %v3579_v47 = vrot.slane %v3573_v39, 4  ;;  %v5147_v17 = vcombine.low %v3463_v11, %v3504_v43 }
 0x510   : > { %v3544_v55 = vsel %vm301_vm0, %v7102_v5, %v3538_v40  ;;  %v3546_v21 = vsel %vm301_vm0, %v3538_v40, %v3539_v35  ;;  %v5148_v59 = vcombine.high %v3463_v11, %v3504_v43  ;;  %v3744_v41 = vrot.slane %v6196_v51, 4 }
 0x511   : > { %v3585_v6 = vsel %vm301_vm0, %v7103_v15, %v3579_v47  ;;  %v3587_v1 = vsel %vm301_vm0, %v3579_v47, %v3580_v49  ;;  %v3547_v26 = vsel %vm7104_vm2, %v3532_v4, %v3546_v21  ;;  %4787 = vmatprep.subr.bf16.mxu1 %v5150_v9  ;;  %v3614_v12 = vpop.permute.xlu0 %3613  ;;  %v3545_v25 = vsel %vm7105_vm3, %v6539_v27, %v3544_v55 }
 0x512   : > { %v3588_v14 = vsel %vm7106_vm4, %v3573_v39, %v3587_v1  ;;  %4746 = vmatprep.subr.bf16.mxu0 %v5148_v59  ;;  %v3655_v46 = vpop.permute.xlu1 %3654  ;;  %4788 = vmatpush1.bf16.msra.mxu1 %v5149_v28  ;;  %v3620_v3 = vrot.slane %v3614_v12, 4  ;;  %v3586_v57 = vsel %vm7107_vm5, %v6547_v36, %v3585_v6  ;;  %v7108_v27 = vrot.slane %v6569_v29, 4 }
 0x513   : > { %v5157_v54 = vcombine.low %v3547_v26, %v3588_v14  ;;  %v5158_v31 = vcombine.high %v3547_v26, %v3588_v14  ;;  %v3661_v63 = vrot.slane %v3655_v46, 4  ;;  %4747 = vmatpush1.bf16.msra.mxu0 %v5147_v17  ;;  %v5155_v8 = vcombine.low %v3545_v25, %v3586_v57 }
 0x514   : > { %v3626_v13 = vsel %vm301_vm0, %v7108_v27, %v3620_v3  ;;  %v3628_v56 = vsel %vm301_vm0, %v3620_v3, %v3621_v10  ;;  %v5156_v45 = vcombine.high %v3545_v25, %v3586_v57  ;;  %v7109_v34 = vrot.slane %v6577_v62, 4 }
 0x515   : > { %v3669_v36 = vsel %vm301_vm0, %v3661_v63, %v3662_v52  ;;  %v3629_v60 = vsel %vm7110_vm6, %v3614_v12, %v3628_v56  ;;  %4789 = vmatprep.subr.bf16.mxu1 %v5158_v31  ;;  %v3696_v7 = vpop.permute.xlu0 %3695  ;;  %v3627_v51 = vsel %vm7111_vm7, %v6569_v29, %v3626_v13  ;;  %v3703_v19 = vrot.slane %v6277_v44, 4 }
 0x516   : > { %v3667_v49 = vsel %vm301_vm0, %v7109_v34, %v3661_v63  ;;  %v3670_v35 = vsel %vm7112_vm14, %v3655_v46, %v3669_v36  ;;  %4748 = vmatprep.subr.bf16.mxu0 %v5156_v45  ;;  %v3737_v38 = vpop.permute.xlu1 %3736  ;;  %4790 = vmatpush1.bf16.msra.mxu1 %v5157_v54  ;;  %v3702_v33 = vrot.slane %v3696_v7, 4  ;;  %v3826_v40 = vrot.slane %v6198_v0, 4 }
 0x517   : > { %v3668_v30 = vsel %vm7113_vm10, %v6577_v62, %v3667_v49  ;;  %v5165_v53 = vcombine.low %v3629_v60, %v3670_v35  ;;  %v5166_v4 = vcombine.high %v3629_v60, %v3670_v35  ;;  %v3743_v18 = vrot.slane %v3737_v38, 4  ;;  %4749 = vmatpush1.bf16.msra.mxu0 %v5155_v8 }
 0x518   : > { %v5163_v39 = vcombine.low %v3627_v51, %v3668_v30  ;;  %v7114_v29 = vrot.slane %v6598_v50, 4  ;;  %v3710_v11 = vsel %vm301_vm0, %v3702_v33, %v3703_v19  ;;  %v5164_v43 = vcombine.high %v3627_v51, %v3668_v30 }
 0x519   : > { %v7115_v28 = vrot.slane %v6603_v20, 4  ;;  %v3751_v62 = vsel %vm301_vm0, %v3743_v18, %v3744_v41  ;;  %v3711_v47 = vsel %vm7116_vm8, %v3696_v7, %v3710_v11  ;;  %4791 = vmatprep.subr.bf16.mxu1 %v5166_v4  ;;  %v3778_v17 = vpop.permute.xlu0 %3777  ;;  %v3785_v52 = vrot.slane %v6285_v61, 4 }
 0x51a   : > { %v3708_v44 = vsel %vm301_vm0, %v7114_v29, %v3702_v33  ;;  %v3752_v5 = vsel %vm7118_vm12, %v3737_v38, %v3751_v62  ;;  %4750 = vmatprep.subr.bf16.mxu0 %v5164_v43  ;;  %v3819_v55 = vpop.permute.xlu1 %3818  ;;  %4792 = vmatpush1.bf16.msra.mxu1 %v5165_v53  ;;  %v3784_v21 = vrot.slane %v3778_v17, 4  ;;  %v7120_v12 = vrot.slane %v6617_v24, 4 }
 0x51b   : > { %v3749_v9 = vsel %vm301_vm0, %v7115_v28, %v3743_v18  ;;  %v3709_v0 = vsel %vm7117_vm9, %v6598_v50, %v3708_v44  ;;  %v5173_v15 = vcombine.low %v3711_v47, %v3752_v5  ;;  %v5174_v6 = vcombine.high %v3711_v47, %v3752_v5  ;;  %4751 = vmatpush1.bf16.msra.mxu0 %v5163_v39 }
 0x51c   : > { %v3750_v59 = vsel %vm7119_vm15, %v6603_v20, %v3749_v9  ;;  %v3825_v1 = vrot.slane %v3819_v55, 4  ;;  %v3790_v50 = vsel %vm301_vm0, %v7120_v12, %v3784_v21  ;;  %v3792_v61 = vsel %vm301_vm0, %v3784_v21, %v3785_v52  ;;  %v7135_v12 = vld [vmem:[#allocation6_spill] sm:$0xff] }
 0x51d   : > { %v5171_v26 = vcombine.low %v3709_v0, %v3750_v59  ;;  %v5172_v25 = vcombine.high %v3709_v0, %v3750_v59  ;;  %v7121_v10 = vrot.slane %v6621_v32, 4  ;;  %vm7122_vm11 = vcmask 228352   ;;  %4793 = vmatprep.subr.bf16.mxu1 %v5174_v6  ;;  %v3860_v3 = vpop.permute.xlu0 %3859  ;;  %v7134_v6 = vld [vmem:[#allocation5_spill] sm:$0xff] }
 0x51e   : > { %v3833_v46 = vsel %vm301_vm0, %v3825_v1, %v3826_v40  ;;  %v3793_v20 = vsel %vm7122_vm11, %v3778_v17, %v3792_v61  ;;  %vm7123_vm13 = vmmov %vm7122_vm11  ;;  %vm7124_vm1 = vcmask 220160   ;;  %v3901_v31 = vpop.permute.xlu1 %3900  ;;  %4794 = vmatpush1.bf16.msra.mxu1 %v5173_v15  ;;  %v3866_v63 = vrot.slane %v3860_v3, 4 }
 0x51f   : > { %v3831_v14 = vsel %vm301_vm0, %v7121_v10, %v3825_v1  ;;  %v3791_v57 = vsel %vm7123_vm13, %v6617_v24, %v3790_v50  ;;  %v3834_v54 = vsel %vm7124_vm1, %v3819_v55, %v3833_v46  ;;  %4752 = vmatprep.subr.bf16.mxu0 %v5172_v25  ;;  %vm7125_vm2 = vmmov %vm7124_vm1  ;;  %v3907_v13 = vrot.slane %v3901_v31, 4  ;;  %v7136_v46 = vld [vmem:[#allocation7_spill] sm:$0xff] }
 0x520   : > { %v3832_v8 = vsel %vm7125_vm2, %v6621_v32, %v3831_v14  ;;  %v5181_v41 = vcombine.low %v3793_v20, %v3834_v54  ;;  %v5182_v27 = vcombine.high %v3793_v20, %v3834_v54  ;;  %4753 = vmatpush1.bf16.msra.mxu0 %v5171_v26  ;;  %v7126_v45 = vrot.slane %v6635_v23, 4 }
 0x521   : > { %v5179_v56 = vcombine.low %v3791_v57, %v3832_v8  ;;  %v5180_v49 = vcombine.high %v3791_v57, %v3832_v8  ;;  %v3867_v24 = vrot.slane %v6293_v37, 4  ;;  %v7127_v36 = vrot.slane %v6639_v42, 4  ;;  %v3942_v7 = vpop.permute.xlu0 %3941  ;;  %v7137_v57 = vld [vmem:[#allocation8_spill] sm:$0xff] }
 0x522   : > { %v3872_v34 = vsel %vm301_vm0, %v7126_v45, %v3866_v63  ;;  %4795 = vmatprep.subr.bf16.mxu1 %v5182_v27  ;;  %vm7128_vm3 = vcmask 154624   ;;  %v3903_v51 = vpop.permute.xlu1 %3902  ;;  %v3948_v19 = vrot.slane %v3942_v7, 4  ;;  %vm7129_vm4 = vcmask 146432   ;;  %v7138_v27 = vld [vmem:[#allocation9_spill] sm:$0xff] }
 0x523   : > { %v3913_v60 = vsel %vm301_vm0, %v7127_v36, %v3907_v13  ;;  %v3873_v32 = vsel %vm7128_vm3, %v6635_v23, %v3872_v34  ;;  %4754 = vmatprep.subr.bf16.mxu0 %v5180_v49  ;;  %4796 = vmatpush1.bf16.msra.mxu1 %v5181_v41  ;;  %v3874_v38 = vsel %vm301_vm0, %v3866_v63, %v3867_v24  ;;  %v3908_v33 = vrot.slane %v3903_v51, 4  ;;  %vm7131_vm6 = vmmov %vm7128_vm3  ;;  %v7139_v34 = vld [vmem:[#allocation10_spill] sm:$0xff] }
 0x524   : > { %v3914_v35 = vsel %vm7129_vm4, %v6639_v42, %v3913_v60  ;;  %4755 = vmatpush1.bf16.msra.mxu0 %v5179_v56  ;;  %v3954_v53 = vsel %vm301_vm0, %v3947_v22, %v3948_v19  ;;  %vm7130_vm5 = vcmask 138240   ;;  %v3875_v18 = vsel %vm7131_vm6, %v3860_v3, %v3874_v38  ;;  %vm7132_vm7 = vmmov %vm7129_vm4 }
 0x525   : > { %v5187_v37 = vcombine.low %v3873_v32, %v3914_v35  ;;  %v5188_v30 = vcombine.high %v3873_v32, %v3914_v35  ;;  %v3915_v4 = vsel %vm301_vm0, %v3907_v13, %v3908_v33  ;;  %v3955_v23 = vsel %vm7130_vm5, %v6657_v16, %v3954_v53  ;;  %vm7133_vm14 = vmmov %vm7130_vm5 }
 0x526   : > { %v3944_v39 = vpop.permute.xlu1 %3943  ;;  %v5196_v42 = vcombine.high %v3955_v23, %v3955_v23  ;;  %v3916_v40 = vsel %vm7132_vm7, %v3901_v31, %v3915_v4  ;;  %v5195_v29 = vcombine.low %v3955_v23, %v3955_v23 }
 0x527   : > { %4756 = vmatprep.subr.bf16.mxu0 %v5188_v30  ;;  %v3949_v44 = vrot.slane %v3944_v39, 4  ;;  %v5189_v11 = vcombine.low %v3875_v18, %v3916_v40  ;;  %v5190_v43 = vcombine.high %v3875_v18, %v3916_v40 }
 0x528   : > { %4757 = vmatpush1.bf16.msra.mxu0 %v5187_v37  ;;  %v4639_v22 = vsel %vm301_vm0, %v5195_v29, 0 }
 0x529   : > { %5203 = vmatprep.subr.msk.bf16.mxu0 %vm301_vm0, %v5196_v42  ;;  %v3956_v28 = vsel %vm301_vm0, %v3948_v19, %v3949_v44  ;;  %4797 = vmatprep.subr.bf16.mxu1 %v5190_v43 }
 0x52a   : > { %v3957_v16 = vsel %vm7133_vm14, %v3942_v7, %v3956_v28  ;;  %4798 = vmatpush1.bf16.msra.mxu1 %v5189_v11 }
 0x52b   : > { %v5198_v9 = vcombine.high %v3957_v16, %v3957_v16  ;;  %v5197_v62 = vcombine.low %v3957_v16, %v3957_v16 }
 0x52c   : > { %4759 = vmatpush1.bf16.msra.mxu0 %v4639_v22 }
 0x52d   : > { %5205 = vmatprep.subr.msk.bf16.mxu1 %vm301_vm0, %v5198_v9  ;;  %v4645_v47 = vsel %vm301_vm0, %v5197_v62, 0 }
 0x52e   : > { %4800 = vmatpush1.bf16.msra.mxu1 %v4645_v47 }
 0x52f   : > { %4765 = vmatmul.mubr.bf16.vlgmr.msra.gmra.mrb[12].mxu0 %v6667_v2 }
 0x531   : > { %4806 = vmatmul.mubr.bf16.vlgmr.msra.gmra.mrb[12].mxu1 %v6667_v2 }
 0x5af   : > { %v4684_v17 = vpop.f32.mrb[8].mxu0 }
 0x5b0   : > { %v4814_v0 = vmul.f32 %v4684_v17, %v6144_v48  ;;  %v4686_v52 = vpop.f32.mrb[9].mxu0 }
 0x5b1   : > { %v4815_v5 = vmul.f32 %v4686_v52, %v6146_v58  ;;  %v4688_v55 = vpop.f32.mrb[10].mxu0 }
 0x5b2   : > { %v4689_v21 = vpop.f32.mrb[11].mxu0 }
 0x5b3   : > { %v4822_v59 = vadd.f32 %v4815_v5, %v4814_v0 }
 0x5b4   : > { %v4725_v15 = vpop.f32.mrb[8].mxu1 }
 0x5b5   : > { %v4816_v1 = vmul.f32 %v4725_v15, %v7134_v6  ;;  %v4727_v26 = vpop.f32.mrb[9].mxu1 }
 0x5b6   : > { %v4817_v50 = vmul.f32 %v4727_v26, %v7135_v12  ;;  %v4729_v61 = vpop.f32.mrb[10].mxu1 }
 0x5b7   : > { %v4823_v25 = vadd.f32 %v4822_v59, %v4816_v1  ;;  %v4730_v10 = vpop.f32.mrb[11].mxu1 }
 0x5b9   : > { %v4824_v14 = vadd.f32 %v4823_v25, %v4817_v50 }
 0x602   : > { %v4766_v2 = vpop.f32.mrb[12].mxu0 }
 0x603   : > { %v4818_v20 = vmul.f32 %v4766_v2, %v7136_v46  ;;  %v4768_v3 = vpop.f32.mrb[13].mxu0 }
 0x604   : > { %v4819_v54 = vmul.f32 %v4768_v3, %v7137_v57  ;;  %v4770_v31 = vpop.f32.mrb[14].mxu0  ;;  %v4807_v41 = vpop.f32.mrb[12].mxu1 }
 0x605   : > { %v4825_v63 = vadd.f32 %v4824_v14, %v4818_v20  ;;  %v4771_v8 = vpop.f32.mrb[15].mxu0  ;;  %v4820_v13 = vmul.f32 %v4807_v41, %v7138_v27  ;;  %v4809_v56 = vpop.f32.mrb[13].mxu1 }
 0x606   : > { %v4821_v49 = vmul.f32 %v4809_v56, %v7139_v34  ;;  %v4811_v24 = vpop.f32.mrb[14].mxu1 }
 0x607   : > { %v4826_v45 = vadd.f32 %v4825_v63, %v4819_v54  ;;  %v4812_v36 = vpop.f32.mrb[15].mxu1 }
 0x609   : > { %v4827_v60 = vadd.f32 %v4826_v45, %v4820_v13 }
 0x60b   : > { %v4828_v7 = vadd.f32 %v4827_v60, %v4821_v49 }
 0x60d   : > { %4829 = vadd.xlane.f32.xlu0 %v4828_v7 }
 0x69a   : > { %v4830_v32 = vpop.xlane.xlu0 %4829 }
 0x69b   : > { %v4831_v51 = vmul.f32 0.001953125, %v4830_v32 }
 0x69d   : > { %v4832_v19 = vsub.f32 %v4684_v17, %v4831_v51  ;;  %v4833_v35 = vsub.f32 %v4686_v52, %v4831_v51  ;;  %v4834_v38 = vsub.f32 %v4725_v15, %v4831_v51  ;;  %v4835_v33 = vsub.f32 %v4727_v26, %v4831_v51 }
 0x69e   : > { %v4836_v37 = vsub.f32 %v4766_v2, %v4831_v51  ;;  %v4837_v23 = vsub.f32 %v4768_v3, %v4831_v51  ;;  %v4838_v40 = vsub.f32 %v4807_v41, %v4831_v51  ;;  %v4839_v43 = vsub.f32 %v4809_v56, %v4831_v51 }
 0x69f   : > { %v4840_v30 = vmul.f32 %v4832_v19, %v6144_v48  ;;  %v4841_v53 = vmul.f32 %v4833_v35, %v6146_v58  ;;  %v4842_v4 = vmul.f32 %v4834_v38, %v7134_v6  ;;  %v4843_v18 = vmul.f32 %v4835_v33, %v7135_v12 }
 0x6a0   : > { %v4844_v29 = vmul.f32 %v4836_v37, %v7136_v46  ;;  %v4845_v22 = vmul.f32 %v4837_v23, %v7137_v57  ;;  %v4846_v48 = vmul.f32 %v4838_v40, %v7138_v27  ;;  %v4847_v62 = vmul.f32 %v4839_v43, %v7139_v34 }
 0x6a1   : > { %v4848_v39 = vmul.f32 %v4840_v30, %v4840_v30  ;;  %v4849_v42 = vmul.f32 %v4841_v53, %v4841_v53  ;;  %v4850_v44 = vmul.f32 %v4842_v4, %v4842_v4  ;;  %v4851_v28 = vmul.f32 %v4843_v18, %v4843_v18 }
 0x6a2   : > { %v4852_v58 = vmul.f32 %v4844_v29, %v4844_v29  ;;  %v4853_v47 = vmul.f32 %v4845_v22, %v4845_v22  ;;  %v4854_v0 = vmul.f32 %v4846_v48, %v4846_v48  ;;  %v4855_v5 = vmul.f32 %v4847_v62, %v4847_v62 }
 0x6a3   : > { %v4856_v11 = vadd.f32 %v4849_v42, %v4848_v39 }
 0x6a5   : > { %v4857_v16 = vadd.f32 %v4856_v11, %v4850_v44 }
 0x6a7   : > { %v4858_v9 = vadd.f32 %v4857_v16, %v4851_v28 }
 0x6a9   : > { %v4859_v17 = vadd.f32 %v4858_v9, %v4852_v58 }
 0x6ab   : > { %v4860_v52 = vadd.f32 %v4859_v17, %v4853_v47 }
 0x6ad   : > { %v4861_v55 = vadd.f32 %v4860_v52, %v4854_v0 }
 0x6af   : > { %v4862_v21 = vadd.f32 %v4861_v55, %v4855_v5 }
 0x6b1   : > { %4863 = vadd.xlane.f32.xlu1 %v4862_v21 }
 0x73e   : > { %v4864_v59 = vpop.xlane.xlu1 %4863 }
 0x73f   : > { %v4865_v15 = vmul.f32 0.001953125, %v4864_v59 }
 0x741   : > { %v4866_v6 = vadd.f32 1e-05, %v4865_v15 }
 0x743   : > { %5284 = vrsqrt.f32 %v4866_v6 }
 0x74d   : > { %v5285_v1 = vpop.eup %5284 }
 0x74e   : > { %v4868_v26 = vmul.f32 %v5285_v1, %v4840_v30  ;;  %v4869_v12 = vmul.f32 %v5285_v1, %v4841_v53  ;;  %v4870_v50 = vmul.f32 %v5285_v1, %v4842_v4  ;;  %v4871_v61 = vmul.f32 %v5285_v1, %v4843_v18 }
 0x74f   : > { %v4872_v25 = vmul.f32 %v5285_v1, %v4844_v29  ;;  %v4873_v10 = vmul.f32 %v5285_v1, %v4845_v22  ;;  %v4874_v14 = vmul.f32 %v5285_v1, %v4846_v48  ;;  %v4875_v2 = vmul.f32 %v5285_v1, %v4847_v62 }
 0x750   : > { %vm4876_vm0 = vcmp.ge.f32.partialorder %v4868_v26, 0.0  ;;  %vm4877_vm10 = vcmp.ge.f32.partialorder %v4869_v12, 0.0  ;;  %vm4878_vm8 = vcmp.ge.f32.partialorder %v4870_v50, 0.0  ;;  %vm4879_vm9 = vcmp.ge.f32.partialorder %v4871_v61, 0.0 }
 0x751   : > { %vm4880_vm12 = vcmp.ge.f32.partialorder %v4872_v25, 0.0  ;;  %vm4881_vm15 = vcmp.ge.f32.partialorder %v4873_v10, 0.0  ;;  %vm4882_vm11 = vcmp.ge.f32.partialorder %v4874_v14, 0.0  ;;  %vm4883_vm13 = vcmp.ge.f32.partialorder %v4875_v2, 0.0 }
 0x752   : > { %v4884_v46 = vmul.f32 0.2, %v4868_v26  ;;  %v4885_v20 = vmul.f32 0.2, %v4869_v12  ;;  %v4886_v3 = vmul.f32 0.2, %v4870_v50 }
 0x753   : > { %v4887_v57 = vmul.f32 0.2, %v4871_v61  ;;  %v4888_v54 = vmul.f32 0.2, %v4872_v25  ;;  %v4889_v31 = vmul.f32 0.2, %v4873_v10 }
 0x754   : > { %v4890_v63 = vmul.f32 0.2, %v4874_v14  ;;  %v4891_v8 = vmul.f32 0.2, %v4875_v2  ;;  %v4892_v41 = vsel %vm4876_vm0, %v4868_v26, %v4884_v46  ;;  %v4893_v27 = vsel %vm4877_vm10, %v4869_v12, %v4885_v20 }
 0x755   : > { %v4894_v13 = vsel %vm4878_vm8, %v4870_v50, %v4886_v3  ;;  %v4895_v56 = vsel %vm4879_vm9, %v4871_v61, %v4887_v57  ;;  %v4896_v45 = vsel %vm4880_vm12, %v4872_v25, %v4888_v54  ;;  %v4897_v34 = vsel %vm4881_vm15, %v4873_v10, %v4889_v31 }
 0x756   : > { %v4898_v49 = vsel %vm4882_vm11, %v4874_v14, %v4890_v63  ;;  %v4899_v24 = vsel %vm4883_vm13, %v4875_v2, %v4891_v8  ;;  %v5218_v36 = vpack.c.bf16 %v4893_v27, %v4892_v41  ;;  %v5219_v60 = vpack.c.bf16 %v4895_v56, %v4894_v13 }
 0x757   : > { %v5220_v7 = vpack.c.bf16 %v4897_v34, %v4896_v45  ;;  %v5221_v32 = vpack.c.bf16 %v4899_v24, %v4898_v49 }
 0x758   : > { %4932 = vst [vmem:[%s197_s16] sm:$0xff] %v5218_v36  ;;  %4933 = vst [vmem:[%s197_s16 + $0x8] sm:$0xff] %v5219_v60 }
 0x759   : > { %4934 = vst [vmem:[%s197_s16 + $0x10] sm:$0xff] %v5220_v7  ;;  %4935 = vst [vmem:[%s197_s16 + $0x18] sm:$0xff] %v5221_v32 }
 0x75a PF: > { %s14_s15 = sadd.s32 1, %s5292_s15  }
 0x75b   : > { %p11_p4 = scmp.ge.s32.totalorder %s14_s15, 4  }
 0x75d   :  { %13 = sbr.rel (!%p11_p4) target bundleno = 1 (0x1), region = 66 }

</bundles_post_ra>
